<compile_context>
chip_gen: v6e
topology: v6e:2x2x1
jax: 0.10.0
libtpu: 0.0.40
codegen_flags: <defaults>
</compile_context>

<pallas_src>
import math

import numpy as np
import jax
import jax.numpy as jnp
from jax.experimental import pallas as pl
from jax.experimental.pallas import tpu as pltpu

# ----------------------------- config ---------------------------------------
BATCH = 2
SEQ = 8
INPUT_SIZE = 16
HIDDEN = 32
NUM_HEADS = 4
INTERMEDIATE = 64
NUM_LAYERS = 2
MAX_POS = 16
OUTPUT_SIZE = 8

assert HIDDEN % NUM_HEADS == 0, "hidden size must be a multiple of num heads"
HEAD_DIM = HIDDEN // NUM_HEADS

# ---- packed-slab row offsets (all sublane-aligned: multiples of 8) ----------
_EMBW0 = 0                               # emb_w            rows [0, 16)
_POS0 = _EMBW0 + INPUT_SIZE              # pos + emb_b      rows [16, 24)
_WP0 = _POS0 + SEQ                       # pooler dense     rows [24, 56)
_WT0 = _WP0 + HIDDEN                     # head transform   rows [56, 88)
_WD0 = _WT0 + HIDDEN                     # decoder (padded) rows [88, 120)
_SMALL_ROWS = _WD0 + HIDDEN              # 120

# per-layer vector slab rows (width = INTERMEDIATE)
_V_BAO, _V_G1, _V_BE1, _V_BI, _V_BO, _V_G2, _V_BE2 = range(7)
# head vector slab rows (width = HIDDEN)
_HV_BP, _HV_BT, _HV_GH, _HV_BEH, _HV_BD = range(5)


# --------------------------- math helpers (in-kernel safe) ------------------
def _erf_poly(x):
    # Abramowitz & Stegun 7.1.26 rational approximation of erf (f32 accurate).
    a1, a2, a3, a4, a5 = 0.254829592, -0.284496736, 1.421413741, -1.453152027, 1.061405429
    p = 0.3275911
    s = jnp.where(x >= 0.0, 1.0, -1.0)
    ax = jnp.abs(x)
    # divide -> EUP approximate reciprocal (free slot, error << test tolerance)
    t = pl.reciprocal(1.0 + p * ax, approx=True)
    poly = ((((a5 * t + a4) * t + a3) * t + a2) * t + a1) * t
    return s * (1.0 - poly * jnp.exp(-ax * ax))


def _gelu(x):
    # exact-erf gelu, as in the PyTorch module
    return x * 0.5 * (1.0 + _erf_poly(x * (1.0 / math.sqrt(2.0))))


def _layernorm(x, gamma, beta, eps=1e-12):
    u = jnp.mean(x, axis=-1, keepdims=True)
    xc = x - u
    s = jnp.mean(xc * xc, axis=-1, keepdims=True)
    return gamma * (xc * jax.lax.rsqrt(s + eps)) + beta


# ------------------------------ fused kernel ---------------------------------
def kfc_kernel(x_ref, mask_ref, small_ref, qkvw_ref, qb_ref, matsh_ref, wi_ref,
               vecs_ref, hvec_ref, y_ref):
    B, S, IN = x_ref.shape
    H, I, nh, hd = HIDDEN, INTERMEDIATE, NUM_HEADS, HEAD_DIM
    f32 = jnp.float32
    scale = 1.0 / math.sqrt(hd)

    emb_w = small_ref[_EMBW0:_EMBW0 + IN, :]           # (IN, H)
    embpos = small_ref[_POS0:_POS0 + S, :]              # (S, H) = pos[:S] + emb_b

    # -------- embeddings: x @ W + (b + positional encoding) -----------------
    x2 = x_ref[...].reshape(B * S, IN)
    h = (jnp.dot(x2, emb_w, preferred_element_type=f32).reshape(B, S, H)
         + embpos[None, :, :])                           # (B, S, H)

    # -------- additive attention-mask bias, computed ONCE (hoisted) ---------
    bias3 = ((1.0 - mask_ref[...]) * -10000.0)[:, None, :]          # (B, 1, S)

    # -------- encoder layers -------------------------------------------------
    for l in range(NUM_LAYERS):
        h2 = h.reshape(B * S, H)
        wao = matsh_ref[l, 0:H, :]                       # (H, H)
        wo = matsh_ref[l, H:H + I, :]                    # (I, H)

        # multi-head self-attention: per-head weights are pre-split on the host
        # (leading-axis index -> no lane slices); all dots are batched over B.
        ao = None
        for n in range(nh):
            wq_n = qkvw_ref[l, 0, n]                     # (H, hd)
            wk_n = qkvw_ref[l, 1, n]
            wv_n = qkvw_ref[l, 2, n]
            qh = (jnp.dot(h2, wq_n, preferred_element_type=f32)
                  + qb_ref[l, n]).reshape(B, S, hd)
            kh = jnp.dot(h2, wk_n, preferred_element_type=f32).reshape(B, S, hd)
            vh = jnp.dot(h2, wv_n, preferred_element_type=f32).reshape(B, S, hd)
            scores = jnp.einsum('bqd,bkd->bqk', qh, kh,
                                preferred_element_type=f32) * scale + bias3
            scores = scores - jnp.max(scores, axis=-1, keepdims=True)
            p = jnp.exp(scores)
            p = p * pl.reciprocal(jnp.sum(p, axis=-1, keepdims=True), approx=True)
            ctx = jnp.einsum('bqk,bkd->bqd', p, vh,
                             preferred_element_type=f32)            # (B, S, hd)
            # fold context -> hidden per head; wao rows are an 8-aligned
            # SUBLANE slice (free), accumulation chain is MRB-friendly on v7x.
            contrib = jnp.dot(ctx.reshape(B * S, hd),
                              wao[n * hd:(n + 1) * hd, :],
                              preferred_element_type=f32)           # (B*S, H)
            ao = contrib if ao is None else ao + contrib

        bao = vecs_ref[l, _V_BAO:_V_BAO + 1, :H]         # includes folded V bias
        x1 = _layernorm(ao.reshape(B, S, H) + bao + h,
                        vecs_ref[l, _V_G1:_V_G1 + 1, :H],
                        vecs_ref[l, _V_BE1:_V_BE1 + 1, :H])
        inter = _gelu(jnp.dot(x1.reshape(B * S, H), wi_ref[l],
                              preferred_element_type=f32)
                      + vecs_ref[l, _V_BI:_V_BI + 1, :])             # (B*S, I)
        o2 = (jnp.dot(inter, wo, preferred_element_type=f32).reshape(B, S, H)
              + vecs_ref[l, _V_BO:_V_BO + 1, :H])
        h = _layernorm(o2 + x1,
                       vecs_ref[l, _V_G2:_V_G2 + 1, :H],
                       vecs_ref[l, _V_BE2:_V_BE2 + 1, :H])

    # -------- pooler (first token) + prediction head -------------------------
    cls = h[:, 0, :]                                     # (B, H) plain slice
    wp = small_ref[_WP0:_WP0 + H, :]
    wt = small_ref[_WT0:_WT0 + H, :]
    wd = small_ref[_WD0:_WD0 + H, :]                     # (H, H), cols >= OUT are 0

    pooled = jnp.tanh(jnp.dot(cls, wp, preferred_element_type=f32)
                      + hvec_ref[_HV_BP:_HV_BP + 1, :])
    t = _gelu(jnp.dot(pooled, wt, preferred_element_type=f32)
              + hvec_ref[_HV_BT:_HV_BT + 1, :])
    t = _layernorm(t, hvec_ref[_HV_GH:_HV_GH + 1, :], hvec_ref[_HV_BEH:_HV_BEH + 1, :])
    yfull = jnp.dot(t, wd, preferred_element_type=f32) + hvec_ref[_HV_BD:_HV_BD + 1, :]
    y = yfull[:, :OUTPUT_SIZE]                           # (B, OUT)

    # y[:, 1:] = sigmoid(y[:, 1:]);  sigmoid via EUP tanh (no divide)
    col = jax.lax.broadcasted_iota(jnp.int32, y.shape, 1)
    sig = 0.5 * (1.0 + jnp.tanh(0.5 * y))
    y_ref[...] = jnp.where(col >= 1, sig, y)


# ------------------------------ wrappers --------------------------------------
_VMEM = pl.BlockSpec(memory_space=pltpu.MemorySpace.VMEM)


def pack_params(params):
    """Pack the natural per-module parameters into a few VMEM slabs (9 DMAs)."""
    L, H, I, nh, hd = NUM_LAYERS, HIDDEN, INTERMEDIATE, NUM_HEADS, HEAD_DIM
    layers = params["layers"]

    # small_mats: emb_w | (pos[:S] + emb_b) | wp | wt | wd (lane-padded to H)
    wd_pad = jnp.zeros((H, H), jnp.float32).at[:, :OUTPUT_SIZE].set(params["wd"])
    small = jnp.concatenate(
        [params["emb_w"], params["pos"][:SEQ] + params["emb_b"],
         params["wp"], params["wt"], wd_pad], axis=0)
    assert small.shape == (_SMALL_ROWS, H)

    def heads(w):                                        # (H, H) -> (nh, H, hd)
        return jnp.stack([w[:, n * hd:(n + 1) * hd] for n in range(nh)], axis=0)

    qkv_w = jnp.stack(
        [jnp.stack([heads(lp["wq"]), heads(lp["wk"]), heads(lp["wv"])], axis=0)
         for lp in layers], axis=0)                      # (L, 3, nh, H, hd)
    q_b = jnp.stack(
        [jnp.stack([lp["bq"][:, n * hd:(n + 1) * hd] for n in range(nh)], axis=0)
         for lp in layers], axis=0)                      # (L, nh, 1, hd)

    # mats_h: [wao ; wo] per layer  -> (L, H + I, H)
    mats_h = jnp.stack([jnp.concatenate([lp["wao"], lp["wo"]], axis=0)
                        for lp in layers], axis=0)
    wi = jnp.stack([lp["wi"] for lp in layers], axis=0)  # (L, H, I)

    def pad_i(v):                                        # (1, w) -> (I,) zero-padded
        v = v.reshape(-1)
        return jnp.zeros((I,), jnp.float32).at[:v.shape[0]].set(v)

    vec_rows = []
    for lp in layers:
        # V bias folded into attention-output bias (softmax rows sum to 1);
        # K bias is dropped entirely — it cancels exactly in the softmax.
        bao_eff = lp["bao"] + lp["bv"] @ lp["wao"]
        vec_rows.append(jnp.stack(
            [pad_i(bao_eff), pad_i(lp["g1"]), pad_i(lp["be1"]), pad_i(lp["bi"]),
             pad_i(lp["bo"]), pad_i(lp["g2"]), pad_i(lp["be2"])], axis=0))
    vecs = jnp.stack(vec_rows, axis=0)                   # (L, 7, I)

    bd_pad = jnp.zeros((1, H), jnp.float32).at[:, :OUTPUT_SIZE].set(params["bd"])
    head_vecs = jnp.concatenate(
        [params["bp"], params["bt"], params["gh"], params["beh"], bd_pad], axis=0)

    return dict(small=small, qkv_w=qkv_w, q_b=q_b, mats_h=mats_h, wi=wi,
                vecs=vecs, head_vecs=head_vecs)


def kfc_forward(x, attention_mask, packed):
    # Single fused pallas_call: whole model resident in VMEM, one launch.
    # (No grid: at B=2 the kernel is launch-latency bound; a "parallel" batch
    #  grid only pays off on v7x at much larger batch sizes.)
    B = x.shape[0]
    args = (x, attention_mask.astype(jnp.float32), packed["small"], packed["qkv_w"],
            packed["q_b"], packed["mats_h"], packed["wi"], packed["vecs"],
            packed["head_vecs"])
    return pl.pallas_call(
        kfc_kernel,
        out_shape=jax.ShapeDtypeStruct((B, OUTPUT_SIZE), jnp.float32),
        in_specs=[_VMEM] * len(args),
        out_specs=_VMEM,
        compiler_params=pltpu.CompilerParams(vmem_limit_bytes=4 * 1024 * 1024),
    )(*args)


# ------------------------- parameter initialization ---------------------------
def init_positional_encoding(hidden_dim, max_seq_len):
    position_enc = np.array(
        [[pos / np.power(10000, 2 * i / hidden_dim) for i in range(hidden_dim)]
         if pos != 0 else np.zeros(hidden_dim) for pos in range(max_seq_len)])
    position_enc[1:, 0::2] = np.sin(position_enc[1:, 0::2])
    position_enc[1:, 1::2] = np.cos(position_enc[1:, 1::2])
    denominator = np.sqrt(np.sum(position_enc ** 2, axis=1, keepdims=True))
    position_enc = position_enc / (denominator + 1e-08)
    return jnp.asarray(position_enc, dtype=jnp.float32)


def init_params(key):
    keys = iter(jax.random.split(key, 64))

    def lin(fan_in, fan_out):
        w = 0.02 * jax.random.normal(next(keys), (fan_in, fan_out), jnp.float32)
        b = 0.05 * jax.random.normal(next(keys), (1, fan_out), jnp.float32)
        return w, b

    params = {}
    params["emb_w"], params["emb_b"] = lin(INPUT_SIZE, HIDDEN)
    params["pos"] = init_positional_encoding(HIDDEN, MAX_POS)

    layers = []
    for _ in range(NUM_LAYERS):
        lp = {}
        lp["wq"], lp["bq"] = lin(HIDDEN, HIDDEN)
        lp["wk"], lp["bk"] = lin(HIDDEN, HIDDEN)
        lp["wv"], lp["bv"] = lin(HIDDEN, HIDDEN)
        lp["wao"], lp["bao"] = lin(HIDDEN, HIDDEN)
        lp["g1"] = jnp.ones((1, HIDDEN), jnp.float32)
        lp["be1"] = jnp.zeros((1, HIDDEN), jnp.float32)
        lp["wi"], lp["bi"] = lin(HIDDEN, INTERMEDIATE)
        lp["wo"], lp["bo"] = lin(INTERMEDIATE, HIDDEN)
        lp["g2"] = jnp.ones((1, HIDDEN), jnp.float32)
        lp["be2"] = jnp.zeros((1, HIDDEN), jnp.float32)
        layers.append(lp)
    params["layers"] = layers

    params["wp"], params["bp"] = lin(HIDDEN, HIDDEN)       # pooler
    params["wt"], params["bt"] = lin(HIDDEN, HIDDEN)       # head transform
    params["gh"] = jnp.ones((1, HIDDEN), jnp.float32)
    params["beh"] = jnp.zeros((1, HIDDEN), jnp.float32)
    params["wd"], params["bd"] = lin(HIDDEN, OUTPUT_SIZE)  # decoder
    return params


# ---------------------------- pure-JAX reference ------------------------------
def ref_forward(x, attention_mask, params):
    B, S, _ = x.shape
    erf = jax.scipy.special.erf
    gelu = lambda t: t * 0.5 * (1.0 + erf(t / math.sqrt(2.0)))
    ln = lambda t, g, b: g * ((t - t.mean(-1, keepdims=True)) /
                              jnp.sqrt(((t - t.mean(-1, keepdims=True)) ** 2).mean(-1, keepdims=True)
                                       + 1e-12)) + b
    ext = ((1.0 - attention_mask) * -10000.0)[:, None, None, :]        # (B,1,1,S)

    h = x @ params["emb_w"] + params["emb_b"] + params["pos"][None, :S, :]
    nh, hd = NUM_HEADS, HIDDEN // NUM_HEADS
    for lp in params["layers"]:
        q = (h.reshape(B * S, HIDDEN) @ lp["wq"] + lp["bq"]).reshape(B, S, nh, hd).transpose(0, 2, 1, 3)
        k = (h.reshape(B * S, HIDDEN) @ lp["wk"] + lp["bk"]).reshape(B, S, nh, hd).transpose(0, 2, 1, 3)
        v = (h.reshape(B * S, HIDDEN) @ lp["wv"] + lp["bv"]).reshape(B, S, nh, hd).transpose(0, 2, 1, 3)
        scores = jnp.einsum("bhqd,bhkd->bhqk", q, k) / math.sqrt(hd) + ext
        probs = jax.nn.softmax(scores, axis=-1)
        ctx = jnp.einsum("bhqk,bhkd->bhqd", probs, v).transpose(0, 2, 1, 3).reshape(B, S, HIDDEN)
        ao = ctx @ lp["wao"] + lp["bao"]
        x1 = ln(ao + h, lp["g1"], lp["be1"])
        inter = gelu(x1 @ lp["wi"] + lp["bi"])
        o2 = inter @ lp["wo"] + lp["bo"]
        h = ln(o2 + x1, lp["g2"], lp["be2"])

    cls = h[:, 0]
    pooled = jnp.tanh(cls @ params["wp"] + params["bp"])
    t = gelu(pooled @ params["wt"] + params["bt"])
    t = ln(t, params["gh"], params["beh"])
    y = t @ params["wd"] + params["bd"]
    y = y.at[:, 1:].set(jax.nn.sigmoid(y[:, 1:]))
    return y


# ----------------------------------- main -------------------------------------
if __name__ == "__main__":
    key = jax.random.PRNGKey(0)
    kx, kp = jax.random.split(key)

    x = jax.random.normal(kx, (BATCH, SEQ, INPUT_SIZE), dtype=jnp.float32)
    attention_mask = jnp.ones((BATCH, SEQ), dtype=jnp.float32).at[1, 6:].set(0.0)

    params = init_params(kp)
    packed = pack_params(params)

    y = kfc_forward(x, attention_mask, packed)
    y = jax.block_until_ready(y)

    y_ref = jax.block_until_ready(ref_forward(x, attention_mask, params))
    # tolerance accounts for the EUP approximate-reciprocal paths (softmax, erf)
    np.testing.assert_allclose(np.asarray(y), np.asarray(y_ref), rtol=2e-3, atol=2e-3)

    print("KERNEL_OK")
</pallas_src>

<mosaic_0001>
module attributes {stable_mosaic.version = 11 : i64} {
  func.func @kfc_kernel(%arg0: memref<2x8x16xf32, #tpu.memory_space<vmem>>, %arg1: memref<2x8xf32, #tpu.memory_space<vmem>>, %arg2: memref<120x32xf32, #tpu.memory_space<vmem>>, %arg3: memref<2x3x4x32x8xf32, #tpu.memory_space<vmem>>, %arg4: memref<2x4x1x8xf32, #tpu.memory_space<vmem>>, %arg5: memref<2x96x32xf32, #tpu.memory_space<vmem>>, %arg6: memref<2x32x64xf32, #tpu.memory_space<vmem>>, %arg7: memref<2x7x64xf32, #tpu.memory_space<vmem>>, %arg8: memref<5x32xf32, #tpu.memory_space<vmem>>, %arg9: memref<2x8xf32, #tpu.memory_space<vmem>>) attributes {dimension_semantics = [], scalar_prefetch = 0 : i64, scratch_operands = 0 : i64, tpu.core_type = #tpu.core_type<tc>} {
    %c0 = arith.constant 0 : index
    %c0_0 = arith.constant 0 : index
    %0 = vector.load %arg2[%c0, %c0_0] : memref<120x32xf32, #tpu.memory_space<vmem>>, vector<16x32xf32>
    %c16 = arith.constant 16 : index
    %c0_1 = arith.constant 0 : index
    %1 = vector.load %arg2[%c16, %c0_1] : memref<120x32xf32, #tpu.memory_space<vmem>>, vector<8x32xf32>
    %c0_2 = arith.constant 0 : index
    %c0_3 = arith.constant 0 : index
    %c0_4 = arith.constant 0 : index
    %2 = vector.load %arg0[%c0_2, %c0_3, %c0_4] : memref<2x8x16xf32, #tpu.memory_space<vmem>>, vector<2x8x16xf32>
    %3 = vector.shape_cast %2 : vector<2x8x16xf32> to vector<16x16xf32>
    %cst = arith.constant dense<0.000000e+00> : vector<16x32xf32>
    %4 = tpu.matmul %3, %0, %cst {dimension_numbers = #tpu.dot_dimension_numbers<[1], [0], [0], [1], [0, 0, 1, 1], [], []>} : vector<16x16xf32>, vector<16x32xf32>, vector<16x32xf32> -> vector<16x32xf32>
    %5 = vector.shape_cast %4 : vector<16x32xf32> to vector<2x8x32xf32>
    %6 = vector.shape_cast %1 : vector<8x32xf32> to vector<1x8x32xf32>
    %7 = vector.broadcast %6 : vector<1x8x32xf32> to vector<2x8x32xf32>
    %8 = arith.addf %5, %7 : vector<2x8x32xf32>
    %c0_5 = arith.constant 0 : index
    %c0_6 = arith.constant 0 : index
    %9 = vector.load %arg1[%c0_5, %c0_6] : memref<2x8xf32, #tpu.memory_space<vmem>>, vector<2x8xf32>
    %cst_7 = arith.constant 1.000000e+00 : f32
    %10 = vector.broadcast %cst_7 : f32 to vector<2x8xf32>
    %11 = arith.subf %10, %9 : vector<2x8xf32>
    %cst_8 = arith.constant -1.000000e+04 : f32
    %12 = vector.broadcast %cst_8 : f32 to vector<2x8xf32>
    %13 = arith.mulf %11, %12 : vector<2x8xf32>
    %14 = vector.shape_cast %13 : vector<2x8xf32> to vector<2x1x8xf32>
    %15 = vector.shape_cast %8 : vector<2x8x32xf32> to vector<16x32xf32>
    %c0_9 = arith.constant 0 : index
    %c0_10 = arith.constant 0 : index
    %c0_11 = arith.constant 0 : index
    %16 = vector.load %arg5[%c0_9, %c0_10, %c0_11] : memref<2x96x32xf32, #tpu.memory_space<vmem>>, vector<1x32x32xf32>
    %17 = vector.shape_cast %16 : vector<1x32x32xf32> to vector<32x32xf32>
    %c0_12 = arith.constant 0 : index
    %c32 = arith.constant 32 : index
    %c0_13 = arith.constant 0 : index
    %18 = vector.load %arg5[%c0_12, %c32, %c0_13] : memref<2x96x32xf32, #tpu.memory_space<vmem>>, vector<1x64x32xf32>
    %19 = vector.shape_cast %18 : vector<1x64x32xf32> to vector<64x32xf32>
    %c0_14 = arith.constant 0 : index
    %c0_15 = arith.constant 0 : index
    %c0_16 = arith.constant 0 : index
    %c0_17 = arith.constant 0 : index
    %c0_18 = arith.constant 0 : index
    %20 = vector.load %arg3[%c0_14, %c0_15, %c0_16, %c0_17, %c0_18] : memref<2x3x4x32x8xf32, #tpu.memory_space<vmem>>, vector<1x1x1x32x8xf32>
    %21 = vector.shape_cast %20 : vector<1x1x1x32x8xf32> to vector<32x8xf32>
    %c0_19 = arith.constant 0 : index
    %c1 = arith.constant 1 : index
    %c0_20 = arith.constant 0 : index
    %c0_21 = arith.constant 0 : index
    %c0_22 = arith.constant 0 : index
    %22 = vector.load %arg3[%c0_19, %c1, %c0_20, %c0_21, %c0_22] : memref<2x3x4x32x8xf32, #tpu.memory_space<vmem>>, vector<1x1x1x32x8xf32>
    %23 = vector.shape_cast %22 : vector<1x1x1x32x8xf32> to vector<32x8xf32>
    %c0_23 = arith.constant 0 : index
    %c2 = arith.constant 2 : index
    %c0_24 = arith.constant 0 : index
    %c0_25 = arith.constant 0 : index
    %c0_26 = arith.constant 0 : index
    %24 = vector.load %arg3[%c0_23, %c2, %c0_24, %c0_25, %c0_26] : memref<2x3x4x32x8xf32, #tpu.memory_space<vmem>>, vector<1x1x1x32x8xf32>
    %25 = vector.shape_cast %24 : vector<1x1x1x32x8xf32> to vector<32x8xf32>
    %cst_27 = arith.constant dense<0.000000e+00> : vector<16x8xf32>
    %26 = tpu.matmul %15, %21, %cst_27 {dimension_numbers = #tpu.dot_dimension_numbers<[1], [0], [0], [1], [0, 0, 1, 1], [], []>} : vector<16x32xf32>, vector<32x8xf32>, vector<16x8xf32> -> vector<16x8xf32>
    %c0_28 = arith.constant 0 : index
    %c0_29 = arith.constant 0 : index
    %c0_30 = arith.constant 0 : index
    %c0_31 = arith.constant 0 : index
    %27 = vector.load %arg4[%c0_28, %c0_29, %c0_30, %c0_31] : memref<2x4x1x8xf32, #tpu.memory_space<vmem>>, vector<1x1x1x8xf32>
    %28 = vector.shape_cast %27 : vector<1x1x1x8xf32> to vector<1x8xf32>
    %29 = vector.broadcast %28 : vector<1x8xf32> to vector<16x8xf32>
    %30 = arith.addf %26, %29 : vector<16x8xf32>
    %31 = vector.shape_cast %30 : vector<16x8xf32> to vector<2x8x8xf32>
    %cst_32 = arith.constant dense<0.000000e+00> : vector<16x8xf32>
    %32 = tpu.matmul %15, %23, %cst_32 {dimension_numbers = #tpu.dot_dimension_numbers<[1], [0], [0], [1], [0, 0, 1, 1], [], []>} : vector<16x32xf32>, vector<32x8xf32>, vector<16x8xf32> -> vector<16x8xf32>
    %33 = vector.shape_cast %32 : vector<16x8xf32> to vector<2x8x8xf32>
    %cst_33 = arith.constant dense<0.000000e+00> : vector<16x8xf32>
    %34 = tpu.matmul %15, %25, %cst_33 {dimension_numbers = #tpu.dot_dimension_numbers<[1], [0], [0], [1], [0, 0, 1, 1], [], []>} : vector<16x32xf32>, vector<32x8xf32>, vector<16x8xf32> -> vector<16x8xf32>
    %35 = vector.shape_cast %34 : vector<16x8xf32> to vector<2x8x8xf32>
    "tpu.trace_start"() <{level = 10 : i32, message = "bqd,bkd->bqk"}> : () -> ()
    %cst_34 = arith.constant dense<0.000000e+00> : vector<2x8x8xf32>
    %36 = tpu.matmul %31, %33, %cst_34 {dimension_numbers = #tpu.dot_dimension_numbers<[2], [2], [1], [1], [0, 0, 0, 1, 1, 1], [0], [0]>} : vector<2x8x8xf32>, vector<2x8x8xf32>, vector<2x8x8xf32> -> vector<2x8x8xf32>
    "tpu.trace_stop"() : () -> ()
    %cst_35 = arith.constant 0.353553385 : f32
    %37 = vector.broadcast %cst_35 : f32 to vector<2x8x8xf32>
    %38 = arith.mulf %36, %37 : vector<2x8x8xf32>
    %39 = vector.broadcast %14 : vector<2x1x8xf32> to vector<2x8x8xf32>
    %40 = arith.addf %38, %39 : vector<2x8x8xf32>
    %cst_36 = arith.constant dense<0xFF800000> : vector<2x8xf32>
    %41 = vector.multi_reduction <maximumf>, %40, %cst_36 [2] : vector<2x8x8xf32> to vector<2x8xf32>
    %42 = vector.shape_cast %41 : vector<2x8xf32> to vector<2x8x1xf32>
    %43 = vector.broadcast %42 : vector<2x8x1xf32> to vector<2x8x8xf32>
    %44 = arith.subf %40, %43 : vector<2x8x8xf32>
    %45 = math.exp %44 : vector<2x8x8xf32>
    %cst_37 = arith.constant dense<0.000000e+00> : vector<2x8xf32>
    %46 = vector.multi_reduction <add>, %45, %cst_37 [2] : vector<2x8x8xf32> to vector<2x8xf32>
    %47 = vector.shape_cast %46 : vector<2x8xf32> to vector<2x8x1xf32>
    %48 = tpu.reciprocal %47 {approx = true} : vector<2x8x1xf32> -> vector<2x8x1xf32>
    %49 = vector.broadcast %48 : vector<2x8x1xf32> to vector<2x8x8xf32>
    %50 = arith.mulf %45, %49 : vector<2x8x8xf32>
    "tpu.trace_start"() <{level = 10 : i32, message = "bqk,bkd->bqd"}> : () -> ()
    %cst_38 = arith.constant dense<0.000000e+00> : vector<2x8x8xf32>
    %51 = tpu.matmul %50, %35, %cst_38 {dimension_numbers = #tpu.dot_dimension_numbers<[2], [1], [1], [2], [0, 0, 0, 1, 1, 2], [0], [0]>} : vector<2x8x8xf32>, vector<2x8x8xf32>, vector<2x8x8xf32> -> vector<2x8x8xf32>
    "tpu.trace_stop"() : () -> ()
    %52 = vector.shape_cast %51 : vector<2x8x8xf32> to vector<16x8xf32>
    %53 = vector.extract_strided_slice %17 {offsets = [0, 0], sizes = [8, 32], strides = [1, 1]} : vector<32x32xf32> to vector<8x32xf32>
    %cst_39 = arith.constant dense<0.000000e+00> : vector<16x32xf32>
    %54 = tpu.matmul %52, %53, %cst_39 {dimension_numbers = #tpu.dot_dimension_numbers<[1], [0], [0], [1], [0, 0, 1, 1], [], []>} : vector<16x8xf32>, vector<8x32xf32>, vector<16x32xf32> -> vector<16x32xf32>
    %c0_40 = arith.constant 0 : index
    %c0_41 = arith.constant 0 : index
    %c1_42 = arith.constant 1 : index
    %c0_43 = arith.constant 0 : index
    %c0_44 = arith.constant 0 : index
    %55 = vector.load %arg3[%c0_40, %c0_41, %c1_42, %c0_43, %c0_44] : memref<2x3x4x32x8xf32, #tpu.memory_space<vmem>>, vector<1x1x1x32x8xf32>
    %56 = vector.shape_cast %55 : vector<1x1x1x32x8xf32> to vector<32x8xf32>
    %c0_45 = arith.constant 0 : index
    %c1_46 = arith.constant 1 : index
    %c1_47 = arith.constant 1 : index
    %c0_48 = arith.constant 0 : index
    %c0_49 = arith.constant 0 : index
    %57 = vector.load %arg3[%c0_45, %c1_46, %c1_47, %c0_48, %c0_49] : memref<2x3x4x32x8xf32, #tpu.memory_space<vmem>>, vector<1x1x1x32x8xf32>
    %58 = vector.shape_cast %57 : vector<1x1x1x32x8xf32> to vector<32x8xf32>
    %c0_50 = arith.constant 0 : index
    %c2_51 = arith.constant 2 : index
    %c1_52 = arith.constant 1 : index
    %c0_53 = arith.constant 0 : index
    %c0_54 = arith.constant 0 : index
    %59 = vector.load %arg3[%c0_50, %c2_51, %c1_52, %c0_53, %c0_54] : memref<2x3x4x32x8xf32, #tpu.memory_space<vmem>>, vector<1x1x1x32x8xf32>
    %60 = vector.shape_cast %59 : vector<1x1x1x32x8xf32> to vector<32x8xf32>
    %cst_55 = arith.constant dense<0.000000e+00> : vector<16x8xf32>
    %61 = tpu.matmul %15, %56, %cst_55 {dimension_numbers = #tpu.dot_dimension_numbers<[1], [0], [0], [1], [0, 0, 1, 1], [], []>} : vector<16x32xf32>, vector<32x8xf32>, vector<16x8xf32> -> vector<16x8xf32>
    %c0_56 = arith.constant 0 : index
    %c1_57 = arith.constant 1 : index
    %c0_58 = arith.constant 0 : index
    %c0_59 = arith.constant 0 : index
    %62 = vector.load %arg4[%c0_56, %c1_57, %c0_58, %c0_59] : memref<2x4x1x8xf32, #tpu.memory_space<vmem>>, vector<1x1x1x8xf32>
    %63 = vector.shape_cast %62 : vector<1x1x1x8xf32> to vector<1x8xf32>
    %64 = vector.broadcast %63 : vector<1x8xf32> to vector<16x8xf32>
    %65 = arith.addf %61, %64 : vector<16x8xf32>
    %66 = vector.shape_cast %65 : vector<16x8xf32> to vector<2x8x8xf32>
    %cst_60 = arith.constant dense<0.000000e+00> : vector<16x8xf32>
    %67 = tpu.matmul %15, %58, %cst_60 {dimension_numbers = #tpu.dot_dimension_numbers<[1], [0], [0], [1], [0, 0, 1, 1], [], []>} : vector<16x32xf32>, vector<32x8xf32>, vector<16x8xf32> -> vector<16x8xf32>
    %68 = vector.shape_cast %67 : vector<16x8xf32> to vector<2x8x8xf32>
    %cst_61 = arith.constant dense<0.000000e+00> : vector<16x8xf32>
    %69 = tpu.matmul %15, %60, %cst_61 {dimension_numbers = #tpu.dot_dimension_numbers<[1], [0], [0], [1], [0, 0, 1, 1], [], []>} : vector<16x32xf32>, vector<32x8xf32>, vector<16x8xf32> -> vector<16x8xf32>
    %70 = vector.shape_cast %69 : vector<16x8xf32> to vector<2x8x8xf32>
    "tpu.trace_start"() <{level = 10 : i32, message = "bqd,bkd->bqk"}> : () -> ()
    %cst_62 = arith.constant dense<0.000000e+00> : vector<2x8x8xf32>
    %71 = tpu.matmul %66, %68, %cst_62 {dimension_numbers = #tpu.dot_dimension_numbers<[2], [2], [1], [1], [0, 0, 0, 1, 1, 1], [0], [0]>} : vector<2x8x8xf32>, vector<2x8x8xf32>, vector<2x8x8xf32> -> vector<2x8x8xf32>
    "tpu.trace_stop"() : () -> ()
    %cst_63 = arith.constant 0.353553385 : f32
    %72 = vector.broadcast %cst_63 : f32 to vector<2x8x8xf32>
    %73 = arith.mulf %71, %72 : vector<2x8x8xf32>
    %74 = vector.broadcast %14 : vector<2x1x8xf32> to vector<2x8x8xf32>
    %75 = arith.addf %73, %74 : vector<2x8x8xf32>
    %cst_64 = arith.constant dense<0xFF800000> : vector<2x8xf32>
    %76 = vector.multi_reduction <maximumf>, %75, %cst_64 [2] : vector<2x8x8xf32> to vector<2x8xf32>
    %77 = vector.shape_cast %76 : vector<2x8xf32> to vector<2x8x1xf32>
    %78 = vector.broadcast %77 : vector<2x8x1xf32> to vector<2x8x8xf32>
    %79 = arith.subf %75, %78 : vector<2x8x8xf32>
    %80 = math.exp %79 : vector<2x8x8xf32>
    %cst_65 = arith.constant dense<0.000000e+00> : vector<2x8xf32>
    %81 = vector.multi_reduction <add>, %80, %cst_65 [2] : vector<2x8x8xf32> to vector<2x8xf32>
    %82 = vector.shape_cast %81 : vector<2x8xf32> to vector<2x8x1xf32>
    %83 = tpu.reciprocal %82 {approx = true} : vector<2x8x1xf32> -> vector<2x8x1xf32>
    %84 = vector.broadcast %83 : vector<2x8x1xf32> to vector<2x8x8xf32>
    %85 = arith.mulf %80, %84 : vector<2x8x8xf32>
    "tpu.trace_start"() <{level = 10 : i32, message = "bqk,bkd->bqd"}> : () -> ()
    %cst_66 = arith.constant dense<0.000000e+00> : vector<2x8x8xf32>
    %86 = tpu.matmul %85, %70, %cst_66 {dimension_numbers = #tpu.dot_dimension_numbers<[2], [1], [1], [2], [0, 0, 0, 1, 1, 2], [0], [0]>} : vector<2x8x8xf32>, vector<2x8x8xf32>, vector<2x8x8xf32> -> vector<2x8x8xf32>
    "tpu.trace_stop"() : () -> ()
    %87 = vector.shape_cast %86 : vector<2x8x8xf32> to vector<16x8xf32>
    %88 = vector.extract_strided_slice %17 {offsets = [8, 0], sizes = [8, 32], strides = [1, 1]} : vector<32x32xf32> to vector<8x32xf32>
    %cst_67 = arith.constant dense<0.000000e+00> : vector<16x32xf32>
    %89 = tpu.matmul %87, %88, %cst_67 {dimension_numbers = #tpu.dot_dimension_numbers<[1], [0], [0], [1], [0, 0, 1, 1], [], []>} : vector<16x8xf32>, vector<8x32xf32>, vector<16x32xf32> -> vector<16x32xf32>
    %90 = arith.addf %54, %89 : vector<16x32xf32>
    %c0_68 = arith.constant 0 : index
    %c0_69 = arith.constant 0 : index
    %c2_70 = arith.constant 2 : index
    %c0_71 = arith.constant 0 : index
    %c0_72 = arith.constant 0 : index
    %91 = vector.load %arg3[%c0_68, %c0_69, %c2_70, %c0_71, %c0_72] : memref<2x3x4x32x8xf32, #tpu.memory_space<vmem>>, vector<1x1x1x32x8xf32>
    %92 = vector.shape_cast %91 : vector<1x1x1x32x8xf32> to vector<32x8xf32>
    %c0_73 = arith.constant 0 : index
    %c1_74 = arith.constant 1 : index
    %c2_75 = arith.constant 2 : index
    %c0_76 = arith.constant 0 : index
    %c0_77 = arith.constant 0 : index
    %93 = vector.load %arg3[%c0_73, %c1_74, %c2_75, %c0_76, %c0_77] : memref<2x3x4x32x8xf32, #tpu.memory_space<vmem>>, vector<1x1x1x32x8xf32>
    %94 = vector.shape_cast %93 : vector<1x1x1x32x8xf32> to vector<32x8xf32>
    %c0_78 = arith.constant 0 : index
    %c2_79 = arith.constant 2 : index
    %c2_80 = arith.constant 2 : index
    %c0_81 = arith.constant 0 : index
    %c0_82 = arith.constant 0 : index
    %95 = vector.load %arg3[%c0_78, %c2_79, %c2_80, %c0_81, %c0_82] : memref<2x3x4x32x8xf32, #tpu.memory_space<vmem>>, vector<1x1x1x32x8xf32>
    %96 = vector.shape_cast %95 : vector<1x1x1x32x8xf32> to vector<32x8xf32>
    %cst_83 = arith.constant dense<0.000000e+00> : vector<16x8xf32>
    %97 = tpu.matmul %15, %92, %cst_83 {dimension_numbers = #tpu.dot_dimension_numbers<[1], [0], [0], [1], [0, 0, 1, 1], [], []>} : vector<16x32xf32>, vector<32x8xf32>, vector<16x8xf32> -> vector<16x8xf32>
    %c0_84 = arith.constant 0 : index
    %c2_85 = arith.constant 2 : index
    %c0_86 = arith.constant 0 : index
    %c0_87 = arith.constant 0 : index
    %98 = vector.load %arg4[%c0_84, %c2_85, %c0_86, %c0_87] : memref<2x4x1x8xf32, #tpu.memory_space<vmem>>, vector<1x1x1x8xf32>
    %99 = vector.shape_cast %98 : vector<1x1x1x8xf32> to vector<1x8xf32>
    %100 = vector.broadcast %99 : vector<1x8xf32> to vector<16x8xf32>
    %101 = arith.addf %97, %100 : vector<16x8xf32>
    %102 = vector.shape_cast %101 : vector<16x8xf32> to vector<2x8x8xf32>
    %cst_88 = arith.constant dense<0.000000e+00> : vector<16x8xf32>
    %103 = tpu.matmul %15, %94, %cst_88 {dimension_numbers = #tpu.dot_dimension_numbers<[1], [0], [0], [1], [0, 0, 1, 1], [], []>} : vector<16x32xf32>, vector<32x8xf32>, vector<16x8xf32> -> vector<16x8xf32>
    %104 = vector.shape_cast %103 : vector<16x8xf32> to vector<2x8x8xf32>
    %cst_89 = arith.constant dense<0.000000e+00> : vector<16x8xf32>
    %105 = tpu.matmul %15, %96, %cst_89 {dimension_numbers = #tpu.dot_dimension_numbers<[1], [0], [0], [1], [0, 0, 1, 1], [], []>} : vector<16x32xf32>, vector<32x8xf32>, vector<16x8xf32> -> vector<16x8xf32>
    %106 = vector.shape_cast %105 : vector<16x8xf32> to vector<2x8x8xf32>
    "tpu.trace_start"() <{level = 10 : i32, message = "bqd,bkd->bqk"}> : () -> ()
    %cst_90 = arith.constant dense<0.000000e+00> : vector<2x8x8xf32>
    %107 = tpu.matmul %102, %104, %cst_90 {dimension_numbers = #tpu.dot_dimension_numbers<[2], [2], [1], [1], [0, 0, 0, 1, 1, 1], [0], [0]>} : vector<2x8x8xf32>, vector<2x8x8xf32>, vector<2x8x8xf32> -> vector<2x8x8xf32>
    "tpu.trace_stop"() : () -> ()
    %cst_91 = arith.constant 0.353553385 : f32
    %108 = vector.broadcast %cst_91 : f32 to vector<2x8x8xf32>
    %109 = arith.mulf %107, %108 : vector<2x8x8xf32>
    %110 = vector.broadcast %14 : vector<2x1x8xf32> to vector<2x8x8xf32>
    %111 = arith.addf %109, %110 : vector<2x8x8xf32>
    %cst_92 = arith.constant dense<0xFF800000> : vector<2x8xf32>
    %112 = vector.multi_reduction <maximumf>, %111, %cst_92 [2] : vector<2x8x8xf32> to vector<2x8xf32>
    %113 = vector.shape_cast %112 : vector<2x8xf32> to vector<2x8x1xf32>
    %114 = vector.broadcast %113 : vector<2x8x1xf32> to vector<2x8x8xf32>
    %115 = arith.subf %111, %114 : vector<2x8x8xf32>
    %116 = math.exp %115 : vector<2x8x8xf32>
    %cst_93 = arith.constant dense<0.000000e+00> : vector<2x8xf32>
    %117 = vector.multi_reduction <add>, %116, %cst_93 [2] : vector<2x8x8xf32> to vector<2x8xf32>
    %118 = vector.shape_cast %117 : vector<2x8xf32> to vector<2x8x1xf32>
    %119 = tpu.reciprocal %118 {approx = true} : vector<2x8x1xf32> -> vector<2x8x1xf32>
    %120 = vector.broadcast %119 : vector<2x8x1xf32> to vector<2x8x8xf32>
    %121 = arith.mulf %116, %120 : vector<2x8x8xf32>
    "tpu.trace_start"() <{level = 10 : i32, message = "bqk,bkd->bqd"}> : () -> ()
    %cst_94 = arith.constant dense<0.000000e+00> : vector<2x8x8xf32>
    %122 = tpu.matmul %121, %106, %cst_94 {dimension_numbers = #tpu.dot_dimension_numbers<[2], [1], [1], [2], [0, 0, 0, 1, 1, 2], [0], [0]>} : vector<2x8x8xf32>, vector<2x8x8xf32>, vector<2x8x8xf32> -> vector<2x8x8xf32>
    "tpu.trace_stop"() : () -> ()
    %123 = vector.shape_cast %122 : vector<2x8x8xf32> to vector<16x8xf32>
    %124 = vector.extract_strided_slice %17 {offsets = [16, 0], sizes = [8, 32], strides = [1, 1]} : vector<32x32xf32> to vector<8x32xf32>
    %cst_95 = arith.constant dense<0.000000e+00> : vector<16x32xf32>
    %125 = tpu.matmul %123, %124, %cst_95 {dimension_numbers = #tpu.dot_dimension_numbers<[1], [0], [0], [1], [0, 0, 1, 1], [], []>} : vector<16x8xf32>, vector<8x32xf32>, vector<16x32xf32> -> vector<16x32xf32>
    %126 = arith.addf %90, %125 : vector<16x32xf32>
    %c0_96 = arith.constant 0 : index
    %c0_97 = arith.constant 0 : index
    %c3 = arith.constant 3 : index
    %c0_98 = arith.constant 0 : index
    %c0_99 = arith.constant 0 : index
    %127 = vector.load %arg3[%c0_96, %c0_97, %c3, %c0_98, %c0_99] : memref<2x3x4x32x8xf32, #tpu.memory_space<vmem>>, vector<1x1x1x32x8xf32>
    %128 = vector.shape_cast %127 : vector<1x1x1x32x8xf32> to vector<32x8xf32>
    %c0_100 = arith.constant 0 : index
    %c1_101 = arith.constant 1 : index
    %c3_102 = arith.constant 3 : index
    %c0_103 = arith.constant 0 : index
    %c0_104 = arith.constant 0 : index
    %129 = vector.load %arg3[%c0_100, %c1_101, %c3_102, %c0_103, %c0_104] : memref<2x3x4x32x8xf32, #tpu.memory_space<vmem>>, vector<1x1x1x32x8xf32>
    %130 = vector.shape_cast %129 : vector<1x1x1x32x8xf32> to vector<32x8xf32>
    %c0_105 = arith.constant 0 : index
    %c2_106 = arith.constant 2 : index
    %c3_107 = arith.constant 3 : index
    %c0_108 = arith.constant 0 : index
    %c0_109 = arith.constant 0 : index
    %131 = vector.load %arg3[%c0_105, %c2_106, %c3_107, %c0_108, %c0_109] : memref<2x3x4x32x8xf32, #tpu.memory_space<vmem>>, vector<1x1x1x32x8xf32>
    %132 = vector.shape_cast %131 : vector<1x1x1x32x8xf32> to vector<32x8xf32>
    %cst_110 = arith.constant dense<0.000000e+00> : vector<16x8xf32>
    %133 = tpu.matmul %15, %128, %cst_110 {dimension_numbers = #tpu.dot_dimension_numbers<[1], [0], [0], [1], [0, 0, 1, 1], [], []>} : vector<16x32xf32>, vector<32x8xf32>, vector<16x8xf32> -> vector<16x8xf32>
    %c0_111 = arith.constant 0 : index
    %c3_112 = arith.constant 3 : index
    %c0_113 = arith.constant 0 : index
    %c0_114 = arith.constant 0 : index
    %134 = vector.load %arg4[%c0_111, %c3_112, %c0_113, %c0_114] : memref<2x4x1x8xf32, #tpu.memory_space<vmem>>, vector<1x1x1x8xf32>
    %135 = vector.shape_cast %134 : vector<1x1x1x8xf32> to vector<1x8xf32>
    %136 = vector.broadcast %135 : vector<1x8xf32> to vector<16x8xf32>
    %137 = arith.addf %133, %136 : vector<16x8xf32>
    %138 = vector.shape_cast %137 : vector<16x8xf32> to vector<2x8x8xf32>
    %cst_115 = arith.constant dense<0.000000e+00> : vector<16x8xf32>
    %139 = tpu.matmul %15, %130, %cst_115 {dimension_numbers = #tpu.dot_dimension_numbers<[1], [0], [0], [1], [0, 0, 1, 1], [], []>} : vector<16x32xf32>, vector<32x8xf32>, vector<16x8xf32> -> vector<16x8xf32>
    %140 = vector.shape_cast %139 : vector<16x8xf32> to vector<2x8x8xf32>
    %cst_116 = arith.constant dense<0.000000e+00> : vector<16x8xf32>
    %141 = tpu.matmul %15, %132, %cst_116 {dimension_numbers = #tpu.dot_dimension_numbers<[1], [0], [0], [1], [0, 0, 1, 1], [], []>} : vector<16x32xf32>, vector<32x8xf32>, vector<16x8xf32> -> vector<16x8xf32>
    %142 = vector.shape_cast %141 : vector<16x8xf32> to vector<2x8x8xf32>
    "tpu.trace_start"() <{level = 10 : i32, message = "bqd,bkd->bqk"}> : () -> ()
    %cst_117 = arith.constant dense<0.000000e+00> : vector<2x8x8xf32>
    %143 = tpu.matmul %138, %140, %cst_117 {dimension_numbers = #tpu.dot_dimension_numbers<[2], [2], [1], [1], [0, 0, 0, 1, 1, 1], [0], [0]>} : vector<2x8x8xf32>, vector<2x8x8xf32>, vector<2x8x8xf32> -> vector<2x8x8xf32>
    "tpu.trace_stop"() : () -> ()
    %cst_118 = arith.constant 0.353553385 : f32
    %144 = vector.broadcast %cst_118 : f32 to vector<2x8x8xf32>
    %145 = arith.mulf %143, %144 : vector<2x8x8xf32>
    %146 = vector.broadcast %14 : vector<2x1x8xf32> to vector<2x8x8xf32>
    %147 = arith.addf %145, %146 : vector<2x8x8xf32>
    %cst_119 = arith.constant dense<0xFF800000> : vector<2x8xf32>
    %148 = vector.multi_reduction <maximumf>, %147, %cst_119 [2] : vector<2x8x8xf32> to vector<2x8xf32>
    %149 = vector.shape_cast %148 : vector<2x8xf32> to vector<2x8x1xf32>
    %150 = vector.broadcast %149 : vector<2x8x1xf32> to vector<2x8x8xf32>
    %151 = arith.subf %147, %150 : vector<2x8x8xf32>
    %152 = math.exp %151 : vector<2x8x8xf32>
    %cst_120 = arith.constant dense<0.000000e+00> : vector<2x8xf32>
    %153 = vector.multi_reduction <add>, %152, %cst_120 [2] : vector<2x8x8xf32> to vector<2x8xf32>
    %154 = vector.shape_cast %153 : vector<2x8xf32> to vector<2x8x1xf32>
    %155 = tpu.reciprocal %154 {approx = true} : vector<2x8x1xf32> -> vector<2x8x1xf32>
    %156 = vector.broadcast %155 : vector<2x8x1xf32> to vector<2x8x8xf32>
    %157 = arith.mulf %152, %156 : vector<2x8x8xf32>
    "tpu.trace_start"() <{level = 10 : i32, message = "bqk,bkd->bqd"}> : () -> ()
    %cst_121 = arith.constant dense<0.000000e+00> : vector<2x8x8xf32>
    %158 = tpu.matmul %157, %142, %cst_121 {dimension_numbers = #tpu.dot_dimension_numbers<[2], [1], [1], [2], [0, 0, 0, 1, 1, 2], [0], [0]>} : vector<2x8x8xf32>, vector<2x8x8xf32>, vector<2x8x8xf32> -> vector<2x8x8xf32>
    "tpu.trace_stop"() : () -> ()
    %159 = vector.shape_cast %158 : vector<2x8x8xf32> to vector<16x8xf32>
    %160 = vector.extract_strided_slice %17 {offsets = [24, 0], sizes = [8, 32], strides = [1, 1]} : vector<32x32xf32> to vector<8x32xf32>
    %cst_122 = arith.constant dense<0.000000e+00> : vector<16x32xf32>
    %161 = tpu.matmul %159, %160, %cst_122 {dimension_numbers = #tpu.dot_dimension_numbers<[1], [0], [0], [1], [0, 0, 1, 1], [], []>} : vector<16x8xf32>, vector<8x32xf32>, vector<16x32xf32> -> vector<16x32xf32>
    %162 = arith.addf %126, %161 : vector<16x32xf32>
    %c0_123 = arith.constant 0 : index
    %c0_124 = arith.constant 0 : index
    %c0_125 = arith.constant 0 : index
    %163 = vector.load %arg7[%c0_123, %c0_124, %c0_125] : memref<2x7x64xf32, #tpu.memory_space<vmem>>, vector<1x1x32xf32>
    %164 = vector.shape_cast %163 : vector<1x1x32xf32> to vector<1x32xf32>
    %165 = vector.shape_cast %162 : vector<16x32xf32> to vector<2x8x32xf32>
    %166 = vector.shape_cast %164 : vector<1x32xf32> to vector<1x1x32xf32>
    %167 = vector.broadcast %166 : vector<1x1x32xf32> to vector<2x8x32xf32>
    %168 = arith.addf %165, %167 : vector<2x8x32xf32>
    %169 = arith.addf %168, %8 : vector<2x8x32xf32>
    %c0_126 = arith.constant 0 : index
    %c1_127 = arith.constant 1 : index
    %c0_128 = arith.constant 0 : index
    %170 = vector.load %arg7[%c0_126, %c1_127, %c0_128] : memref<2x7x64xf32, #tpu.memory_space<vmem>>, vector<1x1x32xf32>
    %171 = vector.shape_cast %170 : vector<1x1x32xf32> to vector<1x32xf32>
    %c0_129 = arith.constant 0 : index
    %c2_130 = arith.constant 2 : index
    %c0_131 = arith.constant 0 : index
    %172 = vector.load %arg7[%c0_129, %c2_130, %c0_131] : memref<2x7x64xf32, #tpu.memory_space<vmem>>, vector<1x1x32xf32>
    %173 = vector.shape_cast %172 : vector<1x1x32xf32> to vector<1x32xf32>
    %cst_132 = arith.constant dense<0.000000e+00> : vector<2x8xf32>
    %174 = vector.multi_reduction <add>, %169, %cst_132 [2] : vector<2x8x32xf32> to vector<2x8xf32>
    %175 = vector.shape_cast %174 : vector<2x8xf32> to vector<2x8x1xf32>
    %cst_133 = arith.constant 3.200000e+01 : f32
    %176 = vector.broadcast %cst_133 : f32 to vector<2x8x1xf32>
    %177 = arith.divf %175, %176 : vector<2x8x1xf32>
    %178 = vector.broadcast %177 : vector<2x8x1xf32> to vector<2x8x32xf32>
    %179 = arith.subf %169, %178 : vector<2x8x32xf32>
    %180 = arith.mulf %179, %179 : vector<2x8x32xf32>
    %cst_134 = arith.constant dense<0.000000e+00> : vector<2x8xf32>
    %181 = vector.multi_reduction <add>, %180, %cst_134 [2] : vector<2x8x32xf32> to vector<2x8xf32>
    %182 = vector.shape_cast %181 : vector<2x8xf32> to vector<2x8x1xf32>
    %cst_135 = arith.constant 3.200000e+01 : f32
    %183 = vector.broadcast %cst_135 : f32 to vector<2x8x1xf32>
    %184 = arith.divf %182, %183 : vector<2x8x1xf32>
    %cst_136 = arith.constant 9.99999996E-13 : f32
    %185 = vector.broadcast %cst_136 : f32 to vector<2x8x1xf32>
    %186 = arith.addf %184, %185 : vector<2x8x1xf32>
    %187 = math.rsqrt %186 : vector<2x8x1xf32>
    %188 = vector.broadcast %187 : vector<2x8x1xf32> to vector<2x8x32xf32>
    %189 = arith.mulf %179, %188 : vector<2x8x32xf32>
    %190 = vector.shape_cast %171 : vector<1x32xf32> to vector<1x1x32xf32>
    %191 = vector.broadcast %190 : vector<1x1x32xf32> to vector<2x8x32xf32>
    %192 = arith.mulf %191, %189 : vector<2x8x32xf32>
    %193 = vector.shape_cast %173 : vector<1x32xf32> to vector<1x1x32xf32>
    %194 = vector.broadcast %193 : vector<1x1x32xf32> to vector<2x8x32xf32>
    %195 = arith.addf %192, %194 : vector<2x8x32xf32>
    %196 = vector.shape_cast %195 : vector<2x8x32xf32> to vector<16x32xf32>
    %c0_137 = arith.constant 0 : index
    %c0_138 = arith.constant 0 : index
    %c0_139 = arith.constant 0 : index
    %197 = vector.load %arg6[%c0_137, %c0_138, %c0_139] : memref<2x32x64xf32, #tpu.memory_space<vmem>>, vector<1x32x64xf32>
    %198 = vector.shape_cast %197 : vector<1x32x64xf32> to vector<32x64xf32>
    %cst_140 = arith.constant dense<0.000000e+00> : vector<16x64xf32>
    %199 = tpu.matmul %196, %198, %cst_140 {dimension_numbers = #tpu.dot_dimension_numbers<[1], [0], [0], [1], [0, 0, 1, 1], [], []>} : vector<16x32xf32>, vector<32x64xf32>, vector<16x64xf32> -> vector<16x64xf32>
    %c0_141 = arith.constant 0 : index
    %c3_142 = arith.constant 3 : index
    %c0_143 = arith.constant 0 : index
    %200 = vector.load %arg7[%c0_141, %c3_142, %c0_143] : memref<2x7x64xf32, #tpu.memory_space<vmem>>, vector<1x1x64xf32>
    %201 = vector.shape_cast %200 : vector<1x1x64xf32> to vector<1x64xf32>
    %202 = vector.broadcast %201 : vector<1x64xf32> to vector<16x64xf32>
    %203 = arith.addf %199, %202 : vector<16x64xf32>
    %cst_144 = arith.constant 5.000000e-01 : f32
    %204 = vector.broadcast %cst_144 : f32 to vector<16x64xf32>
    %205 = arith.mulf %203, %204 : vector<16x64xf32>
    %cst_145 = arith.constant 0.707106769 : f32
    %206 = vector.broadcast %cst_145 : f32 to vector<16x64xf32>
    %207 = arith.mulf %203, %206 : vector<16x64xf32>
    %cst_146 = arith.constant 0.000000e+00 : f32
    %208 = vector.broadcast %cst_146 : f32 to vector<16x64xf32>
    %209 = arith.cmpf oge, %207, %208 : vector<16x64xf32>
    %cst_147 = arith.constant 1.000000e+00 : f32
    %cst_148 = arith.constant -1.000000e+00 : f32
    %210 = vector.broadcast %cst_147 : f32 to vector<16x64xf32>
    %211 = vector.broadcast %cst_148 : f32 to vector<16x64xf32>
    %212 = arith.select %209, %210, %211 : vector<16x64xi1>, vector<16x64xf32>
    %213 = math.absf %207 : vector<16x64xf32>
    %cst_149 = arith.constant 0.327591091 : f32
    %214 = vector.broadcast %cst_149 : f32 to vector<16x64xf32>
    %215 = arith.mulf %214, %213 : vector<16x64xf32>
    %cst_150 = arith.constant 1.000000e+00 : f32
    %216 = vector.broadcast %cst_150 : f32 to vector<16x64xf32>
    %217 = arith.addf %216, %215 : vector<16x64xf32>
    %218 = tpu.reciprocal %217 {approx = true} : vector<16x64xf32> -> vector<16x64xf32>
    %cst_151 = arith.constant 1.06140542 : f32
    %219 = vector.broadcast %cst_151 : f32 to vector<16x64xf32>
    %220 = arith.mulf %219, %218 : vector<16x64xf32>
    %cst_152 = arith.constant -1.45315206 : f32
    %221 = vector.broadcast %cst_152 : f32 to vector<16x64xf32>
    %222 = arith.addf %220, %221 : vector<16x64xf32>
    %223 = arith.mulf %222, %218 : vector<16x64xf32>
    %cst_153 = arith.constant 1.42141378 : f32
    %224 = vector.broadcast %cst_153 : f32 to vector<16x64xf32>
    %225 = arith.addf %223, %224 : vector<16x64xf32>
    %226 = arith.mulf %225, %218 : vector<16x64xf32>
    %cst_154 = arith.constant -0.284496725 : f32
    %227 = vector.broadcast %cst_154 : f32 to vector<16x64xf32>
    %228 = arith.addf %226, %227 : vector<16x64xf32>
    %229 = arith.mulf %228, %218 : vector<16x64xf32>
    %cst_155 = arith.constant 0.254829586 : f32
    %230 = vector.broadcast %cst_155 : f32 to vector<16x64xf32>
    %231 = arith.addf %229, %230 : vector<16x64xf32>
    %232 = arith.mulf %231, %218 : vector<16x64xf32>
    %cst_156 = arith.constant 0.000000e+00 : f32
    %233 = vector.broadcast %cst_156 : f32 to vector<16x64xf32>
    %234 = arith.subf %233, %213 : vector<16x64xf32>
    %235 = arith.mulf %234, %213 : vector<16x64xf32>
    %236 = math.exp %235 : vector<16x64xf32>
    %237 = arith.mulf %232, %236 : vector<16x64xf32>
    %cst_157 = arith.constant 1.000000e+00 : f32
    %238 = vector.broadcast %cst_157 : f32 to vector<16x64xf32>
    %239 = arith.subf %238, %237 : vector<16x64xf32>
    %240 = arith.mulf %212, %239 : vector<16x64xf32>
    %cst_158 = arith.constant 1.000000e+00 : f32
    %241 = vector.broadcast %cst_158 : f32 to vector<16x64xf32>
    %242 = arith.addf %241, %240 : vector<16x64xf32>
    %243 = arith.mulf %205, %242 : vector<16x64xf32>
    %cst_159 = arith.constant dense<0.000000e+00> : vector<16x32xf32>
    %244 = tpu.matmul %243, %19, %cst_159 {dimension_numbers = #tpu.dot_dimension_numbers<[1], [0], [0], [1], [0, 0, 1, 1], [], []>} : vector<16x64xf32>, vector<64x32xf32>, vector<16x32xf32> -> vector<16x32xf32>
    %245 = vector.shape_cast %244 : vector<16x32xf32> to vector<2x8x32xf32>
    %c0_160 = arith.constant 0 : index
    %c4 = arith.constant 4 : index
    %c0_161 = arith.constant 0 : index
    %246 = vector.load %arg7[%c0_160, %c4, %c0_161] : memref<2x7x64xf32, #tpu.memory_space<vmem>>, vector<1x1x32xf32>
    %247 = vector.shape_cast %246 : vector<1x1x32xf32> to vector<1x32xf32>
    %248 = vector.shape_cast %247 : vector<1x32xf32> to vector<1x1x32xf32>
    %249 = vector.broadcast %248 : vector<1x1x32xf32> to vector<2x8x32xf32>
    %250 = arith.addf %245, %249 : vector<2x8x32xf32>
    %251 = arith.addf %250, %195 : vector<2x8x32xf32>
    %c0_162 = arith.constant 0 : index
    %c5 = arith.constant 5 : index
    %c0_163 = arith.constant 0 : index
    %252 = vector.load %arg7[%c0_162, %c5, %c0_163] : memref<2x7x64xf32, #tpu.memory_space<vmem>>, vector<1x1x32xf32>
    %253 = vector.shape_cast %252 : vector<1x1x32xf32> to vector<1x32xf32>
    %c0_164 = arith.constant 0 : index
    %c6 = arith.constant 6 : index
    %c0_165 = arith.constant 0 : index
    %254 = vector.load %arg7[%c0_164, %c6, %c0_165] : memref<2x7x64xf32, #tpu.memory_space<vmem>>, vector<1x1x32xf32>
    %255 = vector.shape_cast %254 : vector<1x1x32xf32> to vector<1x32xf32>
    %cst_166 = arith.constant dense<0.000000e+00> : vector<2x8xf32>
    %256 = vector.multi_reduction <add>, %251, %cst_166 [2] : vector<2x8x32xf32> to vector<2x8xf32>
    %257 = vector.shape_cast %256 : vector<2x8xf32> to vector<2x8x1xf32>
    %cst_167 = arith.constant 3.200000e+01 : f32
    %258 = vector.broadcast %cst_167 : f32 to vector<2x8x1xf32>
    %259 = arith.divf %257, %258 : vector<2x8x1xf32>
    %260 = vector.broadcast %259 : vector<2x8x1xf32> to vector<2x8x32xf32>
    %261 = arith.subf %251, %260 : vector<2x8x32xf32>
    %262 = arith.mulf %261, %261 : vector<2x8x32xf32>
    %cst_168 = arith.constant dense<0.000000e+00> : vector<2x8xf32>
    %263 = vector.multi_reduction <add>, %262, %cst_168 [2] : vector<2x8x32xf32> to vector<2x8xf32>
    %264 = vector.shape_cast %263 : vector<2x8xf32> to vector<2x8x1xf32>
    %cst_169 = arith.constant 3.200000e+01 : f32
    %265 = vector.broadcast %cst_169 : f32 to vector<2x8x1xf32>
    %266 = arith.divf %264, %265 : vector<2x8x1xf32>
    %cst_170 = arith.constant 9.99999996E-13 : f32
    %267 = vector.broadcast %cst_170 : f32 to vector<2x8x1xf32>
    %268 = arith.addf %266, %267 : vector<2x8x1xf32>
    %269 = math.rsqrt %268 : vector<2x8x1xf32>
    %270 = vector.broadcast %269 : vector<2x8x1xf32> to vector<2x8x32xf32>
    %271 = arith.mulf %261, %270 : vector<2x8x32xf32>
    %272 = vector.shape_cast %253 : vector<1x32xf32> to vector<1x1x32xf32>
    %273 = vector.broadcast %272 : vector<1x1x32xf32> to vector<2x8x32xf32>
    %274 = arith.mulf %273, %271 : vector<2x8x32xf32>
    %275 = vector.shape_cast %255 : vector<1x32xf32> to vector<1x1x32xf32>
    %276 = vector.broadcast %275 : vector<1x1x32xf32> to vector<2x8x32xf32>
    %277 = arith.addf %274, %276 : vector<2x8x32xf32>
    %278 = vector.shape_cast %277 : vector<2x8x32xf32> to vector<16x32xf32>
    %c1_171 = arith.constant 1 : index
    %c0_172 = arith.constant 0 : index
    %c0_173 = arith.constant 0 : index
    %279 = vector.load %arg5[%c1_171, %c0_172, %c0_173] : memref<2x96x32xf32, #tpu.memory_space<vmem>>, vector<1x32x32xf32>
    %280 = vector.shape_cast %279 : vector<1x32x32xf32> to vector<32x32xf32>
    %c1_174 = arith.constant 1 : index
    %c32_175 = arith.constant 32 : index
    %c0_176 = arith.constant 0 : index
    %281 = vector.load %arg5[%c1_174, %c32_175, %c0_176] : memref<2x96x32xf32, #tpu.memory_space<vmem>>, vector<1x64x32xf32>
    %282 = vector.shape_cast %281 : vector<1x64x32xf32> to vector<64x32xf32>
    %c1_177 = arith.constant 1 : index
    %c0_178 = arith.constant 0 : index
    %c0_179 = arith.constant 0 : index
    %c0_180 = arith.constant 0 : index
    %c0_181 = arith.constant 0 : index
    %283 = vector.load %arg3[%c1_177, %c0_178, %c0_179, %c0_180, %c0_181] : memref<2x3x4x32x8xf32, #tpu.memory_space<vmem>>, vector<1x1x1x32x8xf32>
    %284 = vector.shape_cast %283 : vector<1x1x1x32x8xf32> to vector<32x8xf32>
    %c1_182 = arith.constant 1 : index
    %c1_183 = arith.constant 1 : index
    %c0_184 = arith.constant 0 : index
    %c0_185 = arith.constant 0 : index
    %c0_186 = arith.constant 0 : index
    %285 = vector.load %arg3[%c1_182, %c1_183, %c0_184, %c0_185, %c0_186] : memref<2x3x4x32x8xf32, #tpu.memory_space<vmem>>, vector<1x1x1x32x8xf32>
    %286 = vector.shape_cast %285 : vector<1x1x1x32x8xf32> to vector<32x8xf32>
    %c1_187 = arith.constant 1 : index
    %c2_188 = arith.constant 2 : index
    %c0_189 = arith.constant 0 : index
    %c0_190 = arith.constant 0 : index
    %c0_191 = arith.constant 0 : index
    %287 = vector.load %arg3[%c1_187, %c2_188, %c0_189, %c0_190, %c0_191] : memref<2x3x4x32x8xf32, #tpu.memory_space<vmem>>, vector<1x1x1x32x8xf32>
    %288 = vector.shape_cast %287 : vector<1x1x1x32x8xf32> to vector<32x8xf32>
    %cst_192 = arith.constant dense<0.000000e+00> : vector<16x8xf32>
    %289 = tpu.matmul %278, %284, %cst_192 {dimension_numbers = #tpu.dot_dimension_numbers<[1], [0], [0], [1], [0, 0, 1, 1], [], []>} : vector<16x32xf32>, vector<32x8xf32>, vector<16x8xf32> -> vector<16x8xf32>
    %c1_193 = arith.constant 1 : index
    %c0_194 = arith.constant 0 : index
    %c0_195 = arith.constant 0 : index
    %c0_196 = arith.constant 0 : index
    %290 = vector.load %arg4[%c1_193, %c0_194, %c0_195, %c0_196] : memref<2x4x1x8xf32, #tpu.memory_space<vmem>>, vector<1x1x1x8xf32>
    %291 = vector.shape_cast %290 : vector<1x1x1x8xf32> to vector<1x8xf32>
    %292 = vector.broadcast %291 : vector<1x8xf32> to vector<16x8xf32>
    %293 = arith.addf %289, %292 : vector<16x8xf32>
    %294 = vector.shape_cast %293 : vector<16x8xf32> to vector<2x8x8xf32>
    %cst_197 = arith.constant dense<0.000000e+00> : vector<16x8xf32>
    %295 = tpu.matmul %278, %286, %cst_197 {dimension_numbers = #tpu.dot_dimension_numbers<[1], [0], [0], [1], [0, 0, 1, 1], [], []>} : vector<16x32xf32>, vector<32x8xf32>, vector<16x8xf32> -> vector<16x8xf32>
    %296 = vector.shape_cast %295 : vector<16x8xf32> to vector<2x8x8xf32>
    %cst_198 = arith.constant dense<0.000000e+00> : vector<16x8xf32>
    %297 = tpu.matmul %278, %288, %cst_198 {dimension_numbers = #tpu.dot_dimension_numbers<[1], [0], [0], [1], [0, 0, 1, 1], [], []>} : vector<16x32xf32>, vector<32x8xf32>, vector<16x8xf32> -> vector<16x8xf32>
    %298 = vector.shape_cast %297 : vector<16x8xf32> to vector<2x8x8xf32>
    "tpu.trace_start"() <{level = 10 : i32, message = "bqd,bkd->bqk"}> : () -> ()
    %cst_199 = arith.constant dense<0.000000e+00> : vector<2x8x8xf32>
    %299 = tpu.matmul %294, %296, %cst_199 {dimension_numbers = #tpu.dot_dimension_numbers<[2], [2], [1], [1], [0, 0, 0, 1, 1, 1], [0], [0]>} : vector<2x8x8xf32>, vector<2x8x8xf32>, vector<2x8x8xf32> -> vector<2x8x8xf32>
    "tpu.trace_stop"() : () -> ()
    %cst_200 = arith.constant 0.353553385 : f32
    %300 = vector.broadcast %cst_200 : f32 to vector<2x8x8xf32>
    %301 = arith.mulf %299, %300 : vector<2x8x8xf32>
    %302 = vector.broadcast %14 : vector<2x1x8xf32> to vector<2x8x8xf32>
    %303 = arith.addf %301, %302 : vector<2x8x8xf32>
    %cst_201 = arith.constant dense<0xFF800000> : vector<2x8xf32>
    %304 = vector.multi_reduction <maximumf>, %303, %cst_201 [2] : vector<2x8x8xf32> to vector<2x8xf32>
    %305 = vector.shape_cast %304 : vector<2x8xf32> to vector<2x8x1xf32>
    %306 = vector.broadcast %305 : vector<2x8x1xf32> to vector<2x8x8xf32>
    %307 = arith.subf %303, %306 : vector<2x8x8xf32>
    %308 = math.exp %307 : vector<2x8x8xf32>
    %cst_202 = arith.constant dense<0.000000e+00> : vector<2x8xf32>
    %309 = vector.multi_reduction <add>, %308, %cst_202 [2] : vector<2x8x8xf32> to vector<2x8xf32>
    %310 = vector.shape_cast %309 : vector<2x8xf32> to vector<2x8x1xf32>
    %311 = tpu.reciprocal %310 {approx = true} : vector<2x8x1xf32> -> vector<2x8x1xf32>
    %312 = vector.broadcast %311 : vector<2x8x1xf32> to vector<2x8x8xf32>
    %313 = arith.mulf %308, %312 : vector<2x8x8xf32>
    "tpu.trace_start"() <{level = 10 : i32, message = "bqk,bkd->bqd"}> : () -> ()
    %cst_203 = arith.constant dense<0.000000e+00> : vector<2x8x8xf32>
    %314 = tpu.matmul %313, %298, %cst_203 {dimension_numbers = #tpu.dot_dimension_numbers<[2], [1], [1], [2], [0, 0, 0, 1, 1, 2], [0], [0]>} : vector<2x8x8xf32>, vector<2x8x8xf32>, vector<2x8x8xf32> -> vector<2x8x8xf32>
    "tpu.trace_stop"() : () -> ()
    %315 = vector.shape_cast %314 : vector<2x8x8xf32> to vector<16x8xf32>
    %316 = vector.extract_strided_slice %280 {offsets = [0, 0], sizes = [8, 32], strides = [1, 1]} : vector<32x32xf32> to vector<8x32xf32>
    %cst_204 = arith.constant dense<0.000000e+00> : vector<16x32xf32>
    %317 = tpu.matmul %315, %316, %cst_204 {dimension_numbers = #tpu.dot_dimension_numbers<[1], [0], [0], [1], [0, 0, 1, 1], [], []>} : vector<16x8xf32>, vector<8x32xf32>, vector<16x32xf32> -> vector<16x32xf32>
    %c1_205 = arith.constant 1 : index
    %c0_206 = arith.constant 0 : index
    %c1_207 = arith.constant 1 : index
    %c0_208 = arith.constant 0 : index
    %c0_209 = arith.constant 0 : index
    %318 = vector.load %arg3[%c1_205, %c0_206, %c1_207, %c0_208, %c0_209] : memref<2x3x4x32x8xf32, #tpu.memory_space<vmem>>, vector<1x1x1x32x8xf32>
    %319 = vector.shape_cast %318 : vector<1x1x1x32x8xf32> to vector<32x8xf32>
    %c1_210 = arith.constant 1 : index
    %c1_211 = arith.constant 1 : index
    %c1_212 = arith.constant 1 : index
    %c0_213 = arith.constant 0 : index
    %c0_214 = arith.constant 0 : index
    %320 = vector.load %arg3[%c1_210, %c1_211, %c1_212, %c0_213, %c0_214] : memref<2x3x4x32x8xf32, #tpu.memory_space<vmem>>, vector<1x1x1x32x8xf32>
    %321 = vector.shape_cast %320 : vector<1x1x1x32x8xf32> to vector<32x8xf32>
    %c1_215 = arith.constant 1 : index
    %c2_216 = arith.constant 2 : index
    %c1_217 = arith.constant 1 : index
    %c0_218 = arith.constant 0 : index
    %c0_219 = arith.constant 0 : index
    %322 = vector.load %arg3[%c1_215, %c2_216, %c1_217, %c0_218, %c0_219] : memref<2x3x4x32x8xf32, #tpu.memory_space<vmem>>, vector<1x1x1x32x8xf32>
    %323 = vector.shape_cast %322 : vector<1x1x1x32x8xf32> to vector<32x8xf32>
    %cst_220 = arith.constant dense<0.000000e+00> : vector<16x8xf32>
    %324 = tpu.matmul %278, %319, %cst_220 {dimension_numbers = #tpu.dot_dimension_numbers<[1], [0], [0], [1], [0, 0, 1, 1], [], []>} : vector<16x32xf32>, vector<32x8xf32>, vector<16x8xf32> -> vector<16x8xf32>
    %c1_221 = arith.constant 1 : index
    %c1_222 = arith.constant 1 : index
    %c0_223 = arith.constant 0 : index
    %c0_224 = arith.constant 0 : index
    %325 = vector.load %arg4[%c1_221, %c1_222, %c0_223, %c0_224] : memref<2x4x1x8xf32, #tpu.memory_space<vmem>>, vector<1x1x1x8xf32>
    %326 = vector.shape_cast %325 : vector<1x1x1x8xf32> to vector<1x8xf32>
    %327 = vector.broadcast %326 : vector<1x8xf32> to vector<16x8xf32>
    %328 = arith.addf %324, %327 : vector<16x8xf32>
    %329 = vector.shape_cast %328 : vector<16x8xf32> to vector<2x8x8xf32>
    %cst_225 = arith.constant dense<0.000000e+00> : vector<16x8xf32>
    %330 = tpu.matmul %278, %321, %cst_225 {dimension_numbers = #tpu.dot_dimension_numbers<[1], [0], [0], [1], [0, 0, 1, 1], [], []>} : vector<16x32xf32>, vector<32x8xf32>, vector<16x8xf32> -> vector<16x8xf32>
    %331 = vector.shape_cast %330 : vector<16x8xf32> to vector<2x8x8xf32>
    %cst_226 = arith.constant dense<0.000000e+00> : vector<16x8xf32>
    %332 = tpu.matmul %278, %323, %cst_226 {dimension_numbers = #tpu.dot_dimension_numbers<[1], [0], [0], [1], [0, 0, 1, 1], [], []>} : vector<16x32xf32>, vector<32x8xf32>, vector<16x8xf32> -> vector<16x8xf32>
    %333 = vector.shape_cast %332 : vector<16x8xf32> to vector<2x8x8xf32>
    "tpu.trace_start"() <{level = 10 : i32, message = "bqd,bkd->bqk"}> : () -> ()
    %cst_227 = arith.constant dense<0.000000e+00> : vector<2x8x8xf32>
    %334 = tpu.matmul %329, %331, %cst_227 {dimension_numbers = #tpu.dot_dimension_numbers<[2], [2], [1], [1], [0, 0, 0, 1, 1, 1], [0], [0]>} : vector<2x8x8xf32>, vector<2x8x8xf32>, vector<2x8x8xf32> -> vector<2x8x8xf32>
    "tpu.trace_stop"() : () -> ()
    %cst_228 = arith.constant 0.353553385 : f32
    %335 = vector.broadcast %cst_228 : f32 to vector<2x8x8xf32>
    %336 = arith.mulf %334, %335 : vector<2x8x8xf32>
    %337 = vector.broadcast %14 : vector<2x1x8xf32> to vector<2x8x8xf32>
    %338 = arith.addf %336, %337 : vector<2x8x8xf32>
    %cst_229 = arith.constant dense<0xFF800000> : vector<2x8xf32>
    %339 = vector.multi_reduction <maximumf>, %338, %cst_229 [2] : vector<2x8x8xf32> to vector<2x8xf32>
    %340 = vector.shape_cast %339 : vector<2x8xf32> to vector<2x8x1xf32>
    %341 = vector.broadcast %340 : vector<2x8x1xf32> to vector<2x8x8xf32>
    %342 = arith.subf %338, %341 : vector<2x8x8xf32>
    %343 = math.exp %342 : vector<2x8x8xf32>
    %cst_230 = arith.constant dense<0.000000e+00> : vector<2x8xf32>
    %344 = vector.multi_reduction <add>, %343, %cst_230 [2] : vector<2x8x8xf32> to vector<2x8xf32>
    %345 = vector.shape_cast %344 : vector<2x8xf32> to vector<2x8x1xf32>
    %346 = tpu.reciprocal %345 {approx = true} : vector<2x8x1xf32> -> vector<2x8x1xf32>
    %347 = vector.broadcast %346 : vector<2x8x1xf32> to vector<2x8x8xf32>
    %348 = arith.mulf %343, %347 : vector<2x8x8xf32>
    "tpu.trace_start"() <{level = 10 : i32, message = "bqk,bkd->bqd"}> : () -> ()
    %cst_231 = arith.constant dense<0.000000e+00> : vector<2x8x8xf32>
    %349 = tpu.matmul %348, %333, %cst_231 {dimension_numbers = #tpu.dot_dimension_numbers<[2], [1], [1], [2], [0, 0, 0, 1, 1, 2], [0], [0]>} : vector<2x8x8xf32>, vector<2x8x8xf32>, vector<2x8x8xf32> -> vector<2x8x8xf32>
    "tpu.trace_stop"() : () -> ()
    %350 = vector.shape_cast %349 : vector<2x8x8xf32> to vector<16x8xf32>
    %351 = vector.extract_strided_slice %280 {offsets = [8, 0], sizes = [8, 32], strides = [1, 1]} : vector<32x32xf32> to vector<8x32xf32>
    %cst_232 = arith.constant dense<0.000000e+00> : vector<16x32xf32>
    %352 = tpu.matmul %350, %351, %cst_232 {dimension_numbers = #tpu.dot_dimension_numbers<[1], [0], [0], [1], [0, 0, 1, 1], [], []>} : vector<16x8xf32>, vector<8x32xf32>, vector<16x32xf32> -> vector<16x32xf32>
    %353 = arith.addf %317, %352 : vector<16x32xf32>
    %c1_233 = arith.constant 1 : index
    %c0_234 = arith.constant 0 : index
    %c2_235 = arith.constant 2 : index
    %c0_236 = arith.constant 0 : index
    %c0_237 = arith.constant 0 : index
    %354 = vector.load %arg3[%c1_233, %c0_234, %c2_235, %c0_236, %c0_237] : memref<2x3x4x32x8xf32, #tpu.memory_space<vmem>>, vector<1x1x1x32x8xf32>
    %355 = vector.shape_cast %354 : vector<1x1x1x32x8xf32> to vector<32x8xf32>
    %c1_238 = arith.constant 1 : index
    %c1_239 = arith.constant 1 : index
    %c2_240 = arith.constant 2 : index
    %c0_241 = arith.constant 0 : index
    %c0_242 = arith.constant 0 : index
    %356 = vector.load %arg3[%c1_238, %c1_239, %c2_240, %c0_241, %c0_242] : memref<2x3x4x32x8xf32, #tpu.memory_space<vmem>>, vector<1x1x1x32x8xf32>
    %357 = vector.shape_cast %356 : vector<1x1x1x32x8xf32> to vector<32x8xf32>
    %c1_243 = arith.constant 1 : index
    %c2_244 = arith.constant 2 : index
    %c2_245 = arith.constant 2 : index
    %c0_246 = arith.constant 0 : index
    %c0_247 = arith.constant 0 : index
    %358 = vector.load %arg3[%c1_243, %c2_244, %c2_245, %c0_246, %c0_247] : memref<2x3x4x32x8xf32, #tpu.memory_space<vmem>>, vector<1x1x1x32x8xf32>
    %359 = vector.shape_cast %358 : vector<1x1x1x32x8xf32> to vector<32x8xf32>
    %cst_248 = arith.constant dense<0.000000e+00> : vector<16x8xf32>
    %360 = tpu.matmul %278, %355, %cst_248 {dimension_numbers = #tpu.dot_dimension_numbers<[1], [0], [0], [1], [0, 0, 1, 1], [], []>} : vector<16x32xf32>, vector<32x8xf32>, vector<16x8xf32> -> vector<16x8xf32>
    %c1_249 = arith.constant 1 : index
    %c2_250 = arith.constant 2 : index
    %c0_251 = arith.constant 0 : index
    %c0_252 = arith.constant 0 : index
    %361 = vector.load %arg4[%c1_249, %c2_250, %c0_251, %c0_252] : memref<2x4x1x8xf32, #tpu.memory_space<vmem>>, vector<1x1x1x8xf32>
    %362 = vector.shape_cast %361 : vector<1x1x1x8xf32> to vector<1x8xf32>
    %363 = vector.broadcast %362 : vector<1x8xf32> to vector<16x8xf32>
    %364 = arith.addf %360, %363 : vector<16x8xf32>
    %365 = vector.shape_cast %364 : vector<16x8xf32> to vector<2x8x8xf32>
    %cst_253 = arith.constant dense<0.000000e+00> : vector<16x8xf32>
    %366 = tpu.matmul %278, %357, %cst_253 {dimension_numbers = #tpu.dot_dimension_numbers<[1], [0], [0], [1], [0, 0, 1, 1], [], []>} : vector<16x32xf32>, vector<32x8xf32>, vector<16x8xf32> -> vector<16x8xf32>
    %367 = vector.shape_cast %366 : vector<16x8xf32> to vector<2x8x8xf32>
    %cst_254 = arith.constant dense<0.000000e+00> : vector<16x8xf32>
    %368 = tpu.matmul %278, %359, %cst_254 {dimension_numbers = #tpu.dot_dimension_numbers<[1], [0], [0], [1], [0, 0, 1, 1], [], []>} : vector<16x32xf32>, vector<32x8xf32>, vector<16x8xf32> -> vector<16x8xf32>
    %369 = vector.shape_cast %368 : vector<16x8xf32> to vector<2x8x8xf32>
    "tpu.trace_start"() <{level = 10 : i32, message = "bqd,bkd->bqk"}> : () -> ()
    %cst_255 = arith.constant dense<0.000000e+00> : vector<2x8x8xf32>
    %370 = tpu.matmul %365, %367, %cst_255 {dimension_numbers = #tpu.dot_dimension_numbers<[2], [2], [1], [1], [0, 0, 0, 1, 1, 1], [0], [0]>} : vector<2x8x8xf32>, vector<2x8x8xf32>, vector<2x8x8xf32> -> vector<2x8x8xf32>
    "tpu.trace_stop"() : () -> ()
    %cst_256 = arith.constant 0.353553385 : f32
    %371 = vector.broadcast %cst_256 : f32 to vector<2x8x8xf32>
    %372 = arith.mulf %370, %371 : vector<2x8x8xf32>
    %373 = vector.broadcast %14 : vector<2x1x8xf32> to vector<2x8x8xf32>
    %374 = arith.addf %372, %373 : vector<2x8x8xf32>
    %cst_257 = arith.constant dense<0xFF800000> : vector<2x8xf32>
    %375 = vector.multi_reduction <maximumf>, %374, %cst_257 [2] : vector<2x8x8xf32> to vector<2x8xf32>
    %376 = vector.shape_cast %375 : vector<2x8xf32> to vector<2x8x1xf32>
    %377 = vector.broadcast %376 : vector<2x8x1xf32> to vector<2x8x8xf32>
    %378 = arith.subf %374, %377 : vector<2x8x8xf32>
    %379 = math.exp %378 : vector<2x8x8xf32>
    %cst_258 = arith.constant dense<0.000000e+00> : vector<2x8xf32>
    %380 = vector.multi_reduction <add>, %379, %cst_258 [2] : vector<2x8x8xf32> to vector<2x8xf32>
    %381 = vector.shape_cast %380 : vector<2x8xf32> to vector<2x8x1xf32>
    %382 = tpu.reciprocal %381 {approx = true} : vector<2x8x1xf32> -> vector<2x8x1xf32>
    %383 = vector.broadcast %382 : vector<2x8x1xf32> to vector<2x8x8xf32>
    %384 = arith.mulf %379, %383 : vector<2x8x8xf32>
    "tpu.trace_start"() <{level = 10 : i32, message = "bqk,bkd->bqd"}> : () -> ()
    %cst_259 = arith.constant dense<0.000000e+00> : vector<2x8x8xf32>
    %385 = tpu.matmul %384, %369, %cst_259 {dimension_numbers = #tpu.dot_dimension_numbers<[2], [1], [1], [2], [0, 0, 0, 1, 1, 2], [0], [0]>} : vector<2x8x8xf32>, vector<2x8x8xf32>, vector<2x8x8xf32> -> vector<2x8x8xf32>
    "tpu.trace_stop"() : () -> ()
    %386 = vector.shape_cast %385 : vector<2x8x8xf32> to vector<16x8xf32>
    %387 = vector.extract_strided_slice %280 {offsets = [16, 0], sizes = [8, 32], strides = [1, 1]} : vector<32x32xf32> to vector<8x32xf32>
    %cst_260 = arith.constant dense<0.000000e+00> : vector<16x32xf32>
    %388 = tpu.matmul %386, %387, %cst_260 {dimension_numbers = #tpu.dot_dimension_numbers<[1], [0], [0], [1], [0, 0, 1, 1], [], []>} : vector<16x8xf32>, vector<8x32xf32>, vector<16x32xf32> -> vector<16x32xf32>
    %389 = arith.addf %353, %388 : vector<16x32xf32>
    %c1_261 = arith.constant 1 : index
    %c0_262 = arith.constant 0 : index
    %c3_263 = arith.constant 3 : index
    %c0_264 = arith.constant 0 : index
    %c0_265 = arith.constant 0 : index
    %390 = vector.load %arg3[%c1_261, %c0_262, %c3_263, %c0_264, %c0_265] : memref<2x3x4x32x8xf32, #tpu.memory_space<vmem>>, vector<1x1x1x32x8xf32>
    %391 = vector.shape_cast %390 : vector<1x1x1x32x8xf32> to vector<32x8xf32>
    %c1_266 = arith.constant 1 : index
    %c1_267 = arith.constant 1 : index
    %c3_268 = arith.constant 3 : index
    %c0_269 = arith.constant 0 : index
    %c0_270 = arith.constant 0 : index
    %392 = vector.load %arg3[%c1_266, %c1_267, %c3_268, %c0_269, %c0_270] : memref<2x3x4x32x8xf32, #tpu.memory_space<vmem>>, vector<1x1x1x32x8xf32>
    %393 = vector.shape_cast %392 : vector<1x1x1x32x8xf32> to vector<32x8xf32>
    %c1_271 = arith.constant 1 : index
    %c2_272 = arith.constant 2 : index
    %c3_273 = arith.constant 3 : index
    %c0_274 = arith.constant 0 : index
    %c0_275 = arith.constant 0 : index
    %394 = vector.load %arg3[%c1_271, %c2_272, %c3_273, %c0_274, %c0_275] : memref<2x3x4x32x8xf32, #tpu.memory_space<vmem>>, vector<1x1x1x32x8xf32>
    %395 = vector.shape_cast %394 : vector<1x1x1x32x8xf32> to vector<32x8xf32>
    %cst_276 = arith.constant dense<0.000000e+00> : vector<16x8xf32>
    %396 = tpu.matmul %278, %391, %cst_276 {dimension_numbers = #tpu.dot_dimension_numbers<[1], [0], [0], [1], [0, 0, 1, 1], [], []>} : vector<16x32xf32>, vector<32x8xf32>, vector<16x8xf32> -> vector<16x8xf32>
    %c1_277 = arith.constant 1 : index
    %c3_278 = arith.constant 3 : index
    %c0_279 = arith.constant 0 : index
    %c0_280 = arith.constant 0 : index
    %397 = vector.load %arg4[%c1_277, %c3_278, %c0_279, %c0_280] : memref<2x4x1x8xf32, #tpu.memory_space<vmem>>, vector<1x1x1x8xf32>
    %398 = vector.shape_cast %397 : vector<1x1x1x8xf32> to vector<1x8xf32>
    %399 = vector.broadcast %398 : vector<1x8xf32> to vector<16x8xf32>
    %400 = arith.addf %396, %399 : vector<16x8xf32>
    %401 = vector.shape_cast %400 : vector<16x8xf32> to vector<2x8x8xf32>
    %cst_281 = arith.constant dense<0.000000e+00> : vector<16x8xf32>
    %402 = tpu.matmul %278, %393, %cst_281 {dimension_numbers = #tpu.dot_dimension_numbers<[1], [0], [0], [1], [0, 0, 1, 1], [], []>} : vector<16x32xf32>, vector<32x8xf32>, vector<16x8xf32> -> vector<16x8xf32>
    %403 = vector.shape_cast %402 : vector<16x8xf32> to vector<2x8x8xf32>
    %cst_282 = arith.constant dense<0.000000e+00> : vector<16x8xf32>
    %404 = tpu.matmul %278, %395, %cst_282 {dimension_numbers = #tpu.dot_dimension_numbers<[1], [0], [0], [1], [0, 0, 1, 1], [], []>} : vector<16x32xf32>, vector<32x8xf32>, vector<16x8xf32> -> vector<16x8xf32>
    %405 = vector.shape_cast %404 : vector<16x8xf32> to vector<2x8x8xf32>
    "tpu.trace_start"() <{level = 10 : i32, message = "bqd,bkd->bqk"}> : () -> ()
    %cst_283 = arith.constant dense<0.000000e+00> : vector<2x8x8xf32>
    %406 = tpu.matmul %401, %403, %cst_283 {dimension_numbers = #tpu.dot_dimension_numbers<[2], [2], [1], [1], [0, 0, 0, 1, 1, 1], [0], [0]>} : vector<2x8x8xf32>, vector<2x8x8xf32>, vector<2x8x8xf32> -> vector<2x8x8xf32>
    "tpu.trace_stop"() : () -> ()
    %cst_284 = arith.constant 0.353553385 : f32
    %407 = vector.broadcast %cst_284 : f32 to vector<2x8x8xf32>
    %408 = arith.mulf %406, %407 : vector<2x8x8xf32>
    %409 = vector.broadcast %14 : vector<2x1x8xf32> to vector<2x8x8xf32>
    %410 = arith.addf %408, %409 : vector<2x8x8xf32>
    %cst_285 = arith.constant dense<0xFF800000> : vector<2x8xf32>
    %411 = vector.multi_reduction <maximumf>, %410, %cst_285 [2] : vector<2x8x8xf32> to vector<2x8xf32>
    %412 = vector.shape_cast %411 : vector<2x8xf32> to vector<2x8x1xf32>
    %413 = vector.broadcast %412 : vector<2x8x1xf32> to vector<2x8x8xf32>
    %414 = arith.subf %410, %413 : vector<2x8x8xf32>
    %415 = math.exp %414 : vector<2x8x8xf32>
    %cst_286 = arith.constant dense<0.000000e+00> : vector<2x8xf32>
    %416 = vector.multi_reduction <add>, %415, %cst_286 [2] : vector<2x8x8xf32> to vector<2x8xf32>
    %417 = vector.shape_cast %416 : vector<2x8xf32> to vector<2x8x1xf32>
    %418 = tpu.reciprocal %417 {approx = true} : vector<2x8x1xf32> -> vector<2x8x1xf32>
    %419 = vector.broadcast %418 : vector<2x8x1xf32> to vector<2x8x8xf32>
    %420 = arith.mulf %415, %419 : vector<2x8x8xf32>
    "tpu.trace_start"() <{level = 10 : i32, message = "bqk,bkd->bqd"}> : () -> ()
    %cst_287 = arith.constant dense<0.000000e+00> : vector<2x8x8xf32>
    %421 = tpu.matmul %420, %405, %cst_287 {dimension_numbers = #tpu.dot_dimension_numbers<[2], [1], [1], [2], [0, 0, 0, 1, 1, 2], [0], [0]>} : vector<2x8x8xf32>, vector<2x8x8xf32>, vector<2x8x8xf32> -> vector<2x8x8xf32>
    "tpu.trace_stop"() : () -> ()
    %422 = vector.shape_cast %421 : vector<2x8x8xf32> to vector<16x8xf32>
    %423 = vector.extract_strided_slice %280 {offsets = [24, 0], sizes = [8, 32], strides = [1, 1]} : vector<32x32xf32> to vector<8x32xf32>
    %cst_288 = arith.constant dense<0.000000e+00> : vector<16x32xf32>
    %424 = tpu.matmul %422, %423, %cst_288 {dimension_numbers = #tpu.dot_dimension_numbers<[1], [0], [0], [1], [0, 0, 1, 1], [], []>} : vector<16x8xf32>, vector<8x32xf32>, vector<16x32xf32> -> vector<16x32xf32>
    %425 = arith.addf %389, %424 : vector<16x32xf32>
    %c1_289 = arith.constant 1 : index
    %c0_290 = arith.constant 0 : index
    %c0_291 = arith.constant 0 : index
    %426 = vector.load %arg7[%c1_289, %c0_290, %c0_291] : memref<2x7x64xf32, #tpu.memory_space<vmem>>, vector<1x1x32xf32>
    %427 = vector.shape_cast %426 : vector<1x1x32xf32> to vector<1x32xf32>
    %428 = vector.shape_cast %425 : vector<16x32xf32> to vector<2x8x32xf32>
    %429 = vector.shape_cast %427 : vector<1x32xf32> to vector<1x1x32xf32>
    %430 = vector.broadcast %429 : vector<1x1x32xf32> to vector<2x8x32xf32>
    %431 = arith.addf %428, %430 : vector<2x8x32xf32>
    %432 = arith.addf %431, %277 : vector<2x8x32xf32>
    %c1_292 = arith.constant 1 : index
    %c1_293 = arith.constant 1 : index
    %c0_294 = arith.constant 0 : index
    %433 = vector.load %arg7[%c1_292, %c1_293, %c0_294] : memref<2x7x64xf32, #tpu.memory_space<vmem>>, vector<1x1x32xf32>
    %434 = vector.shape_cast %433 : vector<1x1x32xf32> to vector<1x32xf32>
    %c1_295 = arith.constant 1 : index
    %c2_296 = arith.constant 2 : index
    %c0_297 = arith.constant 0 : index
    %435 = vector.load %arg7[%c1_295, %c2_296, %c0_297] : memref<2x7x64xf32, #tpu.memory_space<vmem>>, vector<1x1x32xf32>
    %436 = vector.shape_cast %435 : vector<1x1x32xf32> to vector<1x32xf32>
    %cst_298 = arith.constant dense<0.000000e+00> : vector<2x8xf32>
    %437 = vector.multi_reduction <add>, %432, %cst_298 [2] : vector<2x8x32xf32> to vector<2x8xf32>
    %438 = vector.shape_cast %437 : vector<2x8xf32> to vector<2x8x1xf32>
    %cst_299 = arith.constant 3.200000e+01 : f32
    %439 = vector.broadcast %cst_299 : f32 to vector<2x8x1xf32>
    %440 = arith.divf %438, %439 : vector<2x8x1xf32>
    %441 = vector.broadcast %440 : vector<2x8x1xf32> to vector<2x8x32xf32>
    %442 = arith.subf %432, %441 : vector<2x8x32xf32>
    %443 = arith.mulf %442, %442 : vector<2x8x32xf32>
    %cst_300 = arith.constant dense<0.000000e+00> : vector<2x8xf32>
    %444 = vector.multi_reduction <add>, %443, %cst_300 [2] : vector<2x8x32xf32> to vector<2x8xf32>
    %445 = vector.shape_cast %444 : vector<2x8xf32> to vector<2x8x1xf32>
    %cst_301 = arith.constant 3.200000e+01 : f32
    %446 = vector.broadcast %cst_301 : f32 to vector<2x8x1xf32>
    %447 = arith.divf %445, %446 : vector<2x8x1xf32>
    %cst_302 = arith.constant 9.99999996E-13 : f32
    %448 = vector.broadcast %cst_302 : f32 to vector<2x8x1xf32>
    %449 = arith.addf %447, %448 : vector<2x8x1xf32>
    %450 = math.rsqrt %449 : vector<2x8x1xf32>
    %451 = vector.broadcast %450 : vector<2x8x1xf32> to vector<2x8x32xf32>
    %452 = arith.mulf %442, %451 : vector<2x8x32xf32>
    %453 = vector.shape_cast %434 : vector<1x32xf32> to vector<1x1x32xf32>
    %454 = vector.broadcast %453 : vector<1x1x32xf32> to vector<2x8x32xf32>
    %455 = arith.mulf %454, %452 : vector<2x8x32xf32>
    %456 = vector.shape_cast %436 : vector<1x32xf32> to vector<1x1x32xf32>
    %457 = vector.broadcast %456 : vector<1x1x32xf32> to vector<2x8x32xf32>
    %458 = arith.addf %455, %457 : vector<2x8x32xf32>
    %459 = vector.shape_cast %458 : vector<2x8x32xf32> to vector<16x32xf32>
    %c1_303 = arith.constant 1 : index
    %c0_304 = arith.constant 0 : index
    %c0_305 = arith.constant 0 : index
    %460 = vector.load %arg6[%c1_303, %c0_304, %c0_305] : memref<2x32x64xf32, #tpu.memory_space<vmem>>, vector<1x32x64xf32>
    %461 = vector.shape_cast %460 : vector<1x32x64xf32> to vector<32x64xf32>
    %cst_306 = arith.constant dense<0.000000e+00> : vector<16x64xf32>
    %462 = tpu.matmul %459, %461, %cst_306 {dimension_numbers = #tpu.dot_dimension_numbers<[1], [0], [0], [1], [0, 0, 1, 1], [], []>} : vector<16x32xf32>, vector<32x64xf32>, vector<16x64xf32> -> vector<16x64xf32>
    %c1_307 = arith.constant 1 : index
    %c3_308 = arith.constant 3 : index
    %c0_309 = arith.constant 0 : index
    %463 = vector.load %arg7[%c1_307, %c3_308, %c0_309] : memref<2x7x64xf32, #tpu.memory_space<vmem>>, vector<1x1x64xf32>
    %464 = vector.shape_cast %463 : vector<1x1x64xf32> to vector<1x64xf32>
    %465 = vector.broadcast %464 : vector<1x64xf32> to vector<16x64xf32>
    %466 = arith.addf %462, %465 : vector<16x64xf32>
    %cst_310 = arith.constant 5.000000e-01 : f32
    %467 = vector.broadcast %cst_310 : f32 to vector<16x64xf32>
    %468 = arith.mulf %466, %467 : vector<16x64xf32>
    %cst_311 = arith.constant 0.707106769 : f32
    %469 = vector.broadcast %cst_311 : f32 to vector<16x64xf32>
    %470 = arith.mulf %466, %469 : vector<16x64xf32>
    %cst_312 = arith.constant 0.000000e+00 : f32
    %471 = vector.broadcast %cst_312 : f32 to vector<16x64xf32>
    %472 = arith.cmpf oge, %470, %471 : vector<16x64xf32>
    %cst_313 = arith.constant 1.000000e+00 : f32
    %cst_314 = arith.constant -1.000000e+00 : f32
    %473 = vector.broadcast %cst_313 : f32 to vector<16x64xf32>
    %474 = vector.broadcast %cst_314 : f32 to vector<16x64xf32>
    %475 = arith.select %472, %473, %474 : vector<16x64xi1>, vector<16x64xf32>
    %476 = math.absf %470 : vector<16x64xf32>
    %cst_315 = arith.constant 0.327591091 : f32
    %477 = vector.broadcast %cst_315 : f32 to vector<16x64xf32>
    %478 = arith.mulf %477, %476 : vector<16x64xf32>
    %cst_316 = arith.constant 1.000000e+00 : f32
    %479 = vector.broadcast %cst_316 : f32 to vector<16x64xf32>
    %480 = arith.addf %479, %478 : vector<16x64xf32>
    %481 = tpu.reciprocal %480 {approx = true} : vector<16x64xf32> -> vector<16x64xf32>
    %cst_317 = arith.constant 1.06140542 : f32
    %482 = vector.broadcast %cst_317 : f32 to vector<16x64xf32>
    %483 = arith.mulf %482, %481 : vector<16x64xf32>
    %cst_318 = arith.constant -1.45315206 : f32
    %484 = vector.broadcast %cst_318 : f32 to vector<16x64xf32>
    %485 = arith.addf %483, %484 : vector<16x64xf32>
    %486 = arith.mulf %485, %481 : vector<16x64xf32>
    %cst_319 = arith.constant 1.42141378 : f32
    %487 = vector.broadcast %cst_319 : f32 to vector<16x64xf32>
    %488 = arith.addf %486, %487 : vector<16x64xf32>
    %489 = arith.mulf %488, %481 : vector<16x64xf32>
    %cst_320 = arith.constant -0.284496725 : f32
    %490 = vector.broadcast %cst_320 : f32 to vector<16x64xf32>
    %491 = arith.addf %489, %490 : vector<16x64xf32>
    %492 = arith.mulf %491, %481 : vector<16x64xf32>
    %cst_321 = arith.constant 0.254829586 : f32
    %493 = vector.broadcast %cst_321 : f32 to vector<16x64xf32>
    %494 = arith.addf %492, %493 : vector<16x64xf32>
    %495 = arith.mulf %494, %481 : vector<16x64xf32>
    %cst_322 = arith.constant 0.000000e+00 : f32
    %496 = vector.broadcast %cst_322 : f32 to vector<16x64xf32>
    %497 = arith.subf %496, %476 : vector<16x64xf32>
    %498 = arith.mulf %497, %476 : vector<16x64xf32>
    %499 = math.exp %498 : vector<16x64xf32>
    %500 = arith.mulf %495, %499 : vector<16x64xf32>
    %cst_323 = arith.constant 1.000000e+00 : f32
    %501 = vector.broadcast %cst_323 : f32 to vector<16x64xf32>
    %502 = arith.subf %501, %500 : vector<16x64xf32>
    %503 = arith.mulf %475, %502 : vector<16x64xf32>
    %cst_324 = arith.constant 1.000000e+00 : f32
    %504 = vector.broadcast %cst_324 : f32 to vector<16x64xf32>
    %505 = arith.addf %504, %503 : vector<16x64xf32>
    %506 = arith.mulf %468, %505 : vector<16x64xf32>
    %cst_325 = arith.constant dense<0.000000e+00> : vector<16x32xf32>
    %507 = tpu.matmul %506, %282, %cst_325 {dimension_numbers = #tpu.dot_dimension_numbers<[1], [0], [0], [1], [0, 0, 1, 1], [], []>} : vector<16x64xf32>, vector<64x32xf32>, vector<16x32xf32> -> vector<16x32xf32>
    %508 = vector.shape_cast %507 : vector<16x32xf32> to vector<2x8x32xf32>
    %c1_326 = arith.constant 1 : index
    %c4_327 = arith.constant 4 : index
    %c0_328 = arith.constant 0 : index
    %509 = vector.load %arg7[%c1_326, %c4_327, %c0_328] : memref<2x7x64xf32, #tpu.memory_space<vmem>>, vector<1x1x32xf32>
    %510 = vector.shape_cast %509 : vector<1x1x32xf32> to vector<1x32xf32>
    %511 = vector.shape_cast %510 : vector<1x32xf32> to vector<1x1x32xf32>
    %512 = vector.broadcast %511 : vector<1x1x32xf32> to vector<2x8x32xf32>
    %513 = arith.addf %508, %512 : vector<2x8x32xf32>
    %514 = arith.addf %513, %458 : vector<2x8x32xf32>
    %c1_329 = arith.constant 1 : index
    %c5_330 = arith.constant 5 : index
    %c0_331 = arith.constant 0 : index
    %515 = vector.load %arg7[%c1_329, %c5_330, %c0_331] : memref<2x7x64xf32, #tpu.memory_space<vmem>>, vector<1x1x32xf32>
    %516 = vector.shape_cast %515 : vector<1x1x32xf32> to vector<1x32xf32>
    %c1_332 = arith.constant 1 : index
    %c6_333 = arith.constant 6 : index
    %c0_334 = arith.constant 0 : index
    %517 = vector.load %arg7[%c1_332, %c6_333, %c0_334] : memref<2x7x64xf32, #tpu.memory_space<vmem>>, vector<1x1x32xf32>
    %518 = vector.shape_cast %517 : vector<1x1x32xf32> to vector<1x32xf32>
    %cst_335 = arith.constant dense<0.000000e+00> : vector<2x8xf32>
    %519 = vector.multi_reduction <add>, %514, %cst_335 [2] : vector<2x8x32xf32> to vector<2x8xf32>
    %520 = vector.shape_cast %519 : vector<2x8xf32> to vector<2x8x1xf32>
    %cst_336 = arith.constant 3.200000e+01 : f32
    %521 = vector.broadcast %cst_336 : f32 to vector<2x8x1xf32>
    %522 = arith.divf %520, %521 : vector<2x8x1xf32>
    %523 = vector.broadcast %522 : vector<2x8x1xf32> to vector<2x8x32xf32>
    %524 = arith.subf %514, %523 : vector<2x8x32xf32>
    %525 = arith.mulf %524, %524 : vector<2x8x32xf32>
    %cst_337 = arith.constant dense<0.000000e+00> : vector<2x8xf32>
    %526 = vector.multi_reduction <add>, %525, %cst_337 [2] : vector<2x8x32xf32> to vector<2x8xf32>
    %527 = vector.shape_cast %526 : vector<2x8xf32> to vector<2x8x1xf32>
    %cst_338 = arith.constant 3.200000e+01 : f32
    %528 = vector.broadcast %cst_338 : f32 to vector<2x8x1xf32>
    %529 = arith.divf %527, %528 : vector<2x8x1xf32>
    %cst_339 = arith.constant 9.99999996E-13 : f32
    %530 = vector.broadcast %cst_339 : f32 to vector<2x8x1xf32>
    %531 = arith.addf %529, %530 : vector<2x8x1xf32>
    %532 = math.rsqrt %531 : vector<2x8x1xf32>
    %533 = vector.broadcast %532 : vector<2x8x1xf32> to vector<2x8x32xf32>
    %534 = arith.mulf %524, %533 : vector<2x8x32xf32>
    %535 = vector.shape_cast %516 : vector<1x32xf32> to vector<1x1x32xf32>
    %536 = vector.broadcast %535 : vector<1x1x32xf32> to vector<2x8x32xf32>
    %537 = arith.mulf %536, %534 : vector<2x8x32xf32>
    %538 = vector.shape_cast %518 : vector<1x32xf32> to vector<1x1x32xf32>
    %539 = vector.broadcast %538 : vector<1x1x32xf32> to vector<2x8x32xf32>
    %540 = arith.addf %537, %539 : vector<2x8x32xf32>
    %541 = vector.extract_strided_slice %540 {offsets = [0, 0, 0], sizes = [2, 1, 32], strides = [1, 1, 1]} : vector<2x8x32xf32> to vector<2x1x32xf32>
    %542 = vector.shape_cast %541 : vector<2x1x32xf32> to vector<2x32xf32>
    %c24 = arith.constant 24 : index
    %c0_340 = arith.constant 0 : index
    %543 = vector.load %arg2[%c24, %c0_340] : memref<120x32xf32, #tpu.memory_space<vmem>>, vector<32x32xf32>
    %c56 = arith.constant 56 : index
    %c0_341 = arith.constant 0 : index
    %544 = vector.load %arg2[%c56, %c0_341] : memref<120x32xf32, #tpu.memory_space<vmem>>, vector<32x32xf32>
    %c88 = arith.constant 88 : index
    %c0_342 = arith.constant 0 : index
    %545 = vector.load %arg2[%c88, %c0_342] : memref<120x32xf32, #tpu.memory_space<vmem>>, vector<32x32xf32>
    %cst_343 = arith.constant dense<0.000000e+00> : vector<2x32xf32>
    %546 = tpu.matmul %542, %543, %cst_343 {dimension_numbers = #tpu.dot_dimension_numbers<[1], [0], [0], [1], [0, 0, 1, 1], [], []>} : vector<2x32xf32>, vector<32x32xf32>, vector<2x32xf32> -> vector<2x32xf32>
    %c0_344 = arith.constant 0 : index
    %c0_345 = arith.constant 0 : index
    %547 = vector.load %arg8[%c0_344, %c0_345] : memref<5x32xf32, #tpu.memory_space<vmem>>, vector<1x32xf32>
    %548 = vector.broadcast %547 : vector<1x32xf32> to vector<2x32xf32>
    %549 = arith.addf %546, %548 : vector<2x32xf32>
    %550 = math.tanh %549 : vector<2x32xf32>
    %cst_346 = arith.constant dense<0.000000e+00> : vector<2x32xf32>
    %551 = tpu.matmul %550, %544, %cst_346 {dimension_numbers = #tpu.dot_dimension_numbers<[1], [0], [0], [1], [0, 0, 1, 1], [], []>} : vector<2x32xf32>, vector<32x32xf32>, vector<2x32xf32> -> vector<2x32xf32>
    %c1_347 = arith.constant 1 : index
    %c0_348 = arith.constant 0 : index
    %552 = vector.load %arg8[%c1_347, %c0_348] : memref<5x32xf32, #tpu.memory_space<vmem>>, vector<1x32xf32>
    %553 = vector.broadcast %552 : vector<1x32xf32> to vector<2x32xf32>
    %554 = arith.addf %551, %553 : vector<2x32xf32>
    %cst_349 = arith.constant 5.000000e-01 : f32
    %555 = vector.broadcast %cst_349 : f32 to vector<2x32xf32>
    %556 = arith.mulf %554, %555 : vector<2x32xf32>
    %cst_350 = arith.constant 0.707106769 : f32
    %557 = vector.broadcast %cst_350 : f32 to vector<2x32xf32>
    %558 = arith.mulf %554, %557 : vector<2x32xf32>
    %cst_351 = arith.constant 0.000000e+00 : f32
    %559 = vector.broadcast %cst_351 : f32 to vector<2x32xf32>
    %560 = arith.cmpf oge, %558, %559 : vector<2x32xf32>
    %cst_352 = arith.constant 1.000000e+00 : f32
    %cst_353 = arith.constant -1.000000e+00 : f32
    %561 = vector.broadcast %cst_352 : f32 to vector<2x32xf32>
    %562 = vector.broadcast %cst_353 : f32 to vector<2x32xf32>
    %563 = arith.select %560, %561, %562 : vector<2x32xi1>, vector<2x32xf32>
    %564 = math.absf %558 : vector<2x32xf32>
    %cst_354 = arith.constant 0.327591091 : f32
    %565 = vector.broadcast %cst_354 : f32 to vector<2x32xf32>
    %566 = arith.mulf %565, %564 : vector<2x32xf32>
    %cst_355 = arith.constant 1.000000e+00 : f32
    %567 = vector.broadcast %cst_355 : f32 to vector<2x32xf32>
    %568 = arith.addf %567, %566 : vector<2x32xf32>
    %569 = tpu.reciprocal %568 {approx = true} : vector<2x32xf32> -> vector<2x32xf32>
    %cst_356 = arith.constant 1.06140542 : f32
    %570 = vector.broadcast %cst_356 : f32 to vector<2x32xf32>
    %571 = arith.mulf %570, %569 : vector<2x32xf32>
    %cst_357 = arith.constant -1.45315206 : f32
    %572 = vector.broadcast %cst_357 : f32 to vector<2x32xf32>
    %573 = arith.addf %571, %572 : vector<2x32xf32>
    %574 = arith.mulf %573, %569 : vector<2x32xf32>
    %cst_358 = arith.constant 1.42141378 : f32
    %575 = vector.broadcast %cst_358 : f32 to vector<2x32xf32>
    %576 = arith.addf %574, %575 : vector<2x32xf32>
    %577 = arith.mulf %576, %569 : vector<2x32xf32>
    %cst_359 = arith.constant -0.284496725 : f32
    %578 = vector.broadcast %cst_359 : f32 to vector<2x32xf32>
    %579 = arith.addf %577, %578 : vector<2x32xf32>
    %580 = arith.mulf %579, %569 : vector<2x32xf32>
    %cst_360 = arith.constant 0.254829586 : f32
    %581 = vector.broadcast %cst_360 : f32 to vector<2x32xf32>
    %582 = arith.addf %580, %581 : vector<2x32xf32>
    %583 = arith.mulf %582, %569 : vector<2x32xf32>
    %cst_361 = arith.constant 0.000000e+00 : f32
    %584 = vector.broadcast %cst_361 : f32 to vector<2x32xf32>
    %585 = arith.subf %584, %564 : vector<2x32xf32>
    %586 = arith.mulf %585, %564 : vector<2x32xf32>
    %587 = math.exp %586 : vector<2x32xf32>
    %588 = arith.mulf %583, %587 : vector<2x32xf32>
    %cst_362 = arith.constant 1.000000e+00 : f32
    %589 = vector.broadcast %cst_362 : f32 to vector<2x32xf32>
    %590 = arith.subf %589, %588 : vector<2x32xf32>
    %591 = arith.mulf %563, %590 : vector<2x32xf32>
    %cst_363 = arith.constant 1.000000e+00 : f32
    %592 = vector.broadcast %cst_363 : f32 to vector<2x32xf32>
    %593 = arith.addf %592, %591 : vector<2x32xf32>
    %594 = arith.mulf %556, %593 : vector<2x32xf32>
    %c2_364 = arith.constant 2 : index
    %c0_365 = arith.constant 0 : index
    %595 = vector.load %arg8[%c2_364, %c0_365] : memref<5x32xf32, #tpu.memory_space<vmem>>, vector<1x32xf32>
    %c3_366 = arith.constant 3 : index
    %c0_367 = arith.constant 0 : index
    %596 = vector.load %arg8[%c3_366, %c0_367] : memref<5x32xf32, #tpu.memory_space<vmem>>, vector<1x32xf32>
    %cst_368 = arith.constant dense<0.000000e+00> : vector<2xf32>
    %597 = vector.multi_reduction <add>, %594, %cst_368 [1] : vector<2x32xf32> to vector<2xf32>
    %598 = vector.shape_cast %597 : vector<2xf32> to vector<2x1xf32>
    %cst_369 = arith.constant 3.200000e+01 : f32
    %599 = vector.broadcast %cst_369 : f32 to vector<2x1xf32>
    %600 = arith.divf %598, %599 : vector<2x1xf32>
    %601 = vector.broadcast %600 : vector<2x1xf32> to vector<2x32xf32>
    %602 = arith.subf %594, %601 : vector<2x32xf32>
    %603 = arith.mulf %602, %602 : vector<2x32xf32>
    %cst_370 = arith.constant dense<0.000000e+00> : vector<2xf32>
    %604 = vector.multi_reduction <add>, %603, %cst_370 [1] : vector<2x32xf32> to vector<2xf32>
    %605 = vector.shape_cast %604 : vector<2xf32> to vector<2x1xf32>
    %cst_371 = arith.constant 3.200000e+01 : f32
    %606 = vector.broadcast %cst_371 : f32 to vector<2x1xf32>
    %607 = arith.divf %605, %606 : vector<2x1xf32>
    %cst_372 = arith.constant 9.99999996E-13 : f32
    %608 = vector.broadcast %cst_372 : f32 to vector<2x1xf32>
    %609 = arith.addf %607, %608 : vector<2x1xf32>
    %610 = math.rsqrt %609 : vector<2x1xf32>
    %611 = vector.broadcast %610 : vector<2x1xf32> to vector<2x32xf32>
    %612 = arith.mulf %602, %611 : vector<2x32xf32>
    %613 = vector.broadcast %595 : vector<1x32xf32> to vector<2x32xf32>
    %614 = arith.mulf %613, %612 : vector<2x32xf32>
    %615 = vector.broadcast %596 : vector<1x32xf32> to vector<2x32xf32>
    %616 = arith.addf %614, %615 : vector<2x32xf32>
    %cst_373 = arith.constant dense<0.000000e+00> : vector<2x32xf32>
    %617 = tpu.matmul %616, %545, %cst_373 {dimension_numbers = #tpu.dot_dimension_numbers<[1], [0], [0], [1], [0, 0, 1, 1], [], []>} : vector<2x32xf32>, vector<32x32xf32>, vector<2x32xf32> -> vector<2x32xf32>
    %c4_374 = arith.constant 4 : index
    %c0_375 = arith.constant 0 : index
    %618 = vector.load %arg8[%c4_374, %c0_375] : memref<5x32xf32, #tpu.memory_space<vmem>>, vector<1x32xf32>
    %619 = vector.broadcast %618 : vector<1x32xf32> to vector<2x32xf32>
    %620 = arith.addf %617, %619 : vector<2x32xf32>
    %621 = vector.extract_strided_slice %620 {offsets = [0, 0], sizes = [2, 8], strides = [1, 1]} : vector<2x32xf32> to vector<2x8xf32>
    %622 = tpu.iota {dimensions = array<i32: 1>} : vector<2x8xi32>
    %cst_376 = arith.constant 5.000000e-01 : f32
    %623 = vector.broadcast %cst_376 : f32 to vector<2x8xf32>
    %624 = arith.mulf %623, %621 : vector<2x8xf32>
    %625 = math.tanh %624 : vector<2x8xf32>
    %cst_377 = arith.constant 1.000000e+00 : f32
    %626 = vector.broadcast %cst_377 : f32 to vector<2x8xf32>
    %627 = arith.addf %626, %625 : vector<2x8xf32>
    %cst_378 = arith.constant 5.000000e-01 : f32
    %628 = vector.broadcast %cst_378 : f32 to vector<2x8xf32>
    %629 = arith.mulf %628, %627 : vector<2x8xf32>
    %c1_i32 = arith.constant 1 : i32
    %630 = vector.broadcast %c1_i32 : i32 to vector<2x8xi32>
    %631 = arith.cmpi sge, %622, %630 : vector<2x8xi32>
    %632 = arith.select %631, %629, %621 : vector<2x8xi1>, vector<2x8xf32>
    %c0_379 = arith.constant 0 : index
    %c0_380 = arith.constant 0 : index
    %633 = vector.load %arg9[%c0_379, %c0_380] : memref<2x8xf32, #tpu.memory_space<vmem>>, vector<2x8xf32>
    tpu.vector_store %arg9[%c0_379, %c0_380], %632 {strides = array<i32>} : memref<2x8xf32, #tpu.memory_space<vmem>>, vector<2x8xf32>,
    return
  }
}

</mosaic_0001>

<bundles_post_ra>
// kernel: tpu_custom_call.1
= control target key start
LH: loop header
LB: loop body
LE: loop exit
PB: predicated region body
PF: predicated region fallthrough
CT: control target
= control target key end

     0   :  { %vm38_vm0 = vcmask 130048   ;;  %s8661_s0 = inlined_call_operand.vmem [shape: f32[2,8,16], index: 0, kind: input, shape index: {}]   ;;  %s8662_s1 = inlined_call_operand.vmem [shape: f32[2,8], index: 1, kind: input, shape index: {}]   ;;  %s8663_s2 = inlined_call_operand.vmem [shape: f32[120,32], index: 2, kind: input, shape index: {}]   ;;  %s8664_s3 = inlined_call_operand.vmem [shape: f32[2,3,4,32,8], index: 3, kind: input, shape index: {}]   ;;  %s8665_s4 = inlined_call_operand.vmem [shape: f32[2,4,1,8], index: 4, kind: input, shape index: {}]   ;;  %s8666_s5 = inlined_call_operand.vmem [shape: f32[2,96,32], index: 5, kind: input, shape index: {}]   ;;  %s8667_s6 = inlined_call_operand.vmem [shape: f32[2,32,64], index: 6, kind: input, shape index: {}]   ;;  %s8668_s7 = inlined_call_operand.vmem [shape: f32[2,7,64], index: 7, kind: input, shape index: {}]   ;;  %s8669_s8 = inlined_call_operand.vmem [shape: f32[5,32], index: 8, kind: input, shape index: {}]   ;;  %s8670_s9 = inlined_call_operand.hbm [shape: f32[2,8], index: 9, kind: output, shape index: {}]  }
   0x1   :  { %v34_v0 = vld [vmem:[%s8663_s2 + $0x8] sm:$0xff]  ;;  %v33_v1 = vld [vmem:[%s8663_s2] sm:$0xff]  ;;  %v163_v4 = vld [vmem:[%s8664_s3 + $0x18] sm:$0xff] }
   0x2   :  { %v36_v2 = vld [vmem:[%s8661_s0] sm:$0xff]  ;;  %6957 = vmatprep.subr.mxu0 %v34_v0  ;;  %v37_v3 = vld [vmem:[%s8661_s0 + $0x8] sm:$0xff]  ;;  %6964 = vmatprep.subr.mxu1 %v163_v4  ;;  %v6405_v5 = vld [vmem:[%s8664_s3 + $0x98] sm:$0xff] }
   0x3   :  { %6961 = vmatprep.mubr.msk.f32.mxu0 %vm38_vm0, %v36_v2  ;;  %6958 = vmatpush3.msra.mxu0 %v34_v0  ;;  %v162_v6 = vld [vmem:[%s8664_s3 + $0x10] sm:$0xff] }
   0x4   :  { %14 = vsyncpa [#allocation3], 0  ;;  %6959 = vmatprep.subr.mxu0 %v33_v1  ;;  %6965 = vmatpush3.msra.mxu1 %v163_v4  ;;  %v6404_v7 = vld [vmem:[%s8664_s3 + $0x90] sm:$0xff]  ;;  %v161_v8 = vld [vmem:[%s8664_s3 + $0x8] sm:$0xff]  ;;  %vm181_vm1 = vcmask 261120   ;;  %v7654_v21 = vmov 0.0   ;;  %v129_v33 = vlaneseq }
   0x5   :  { %6960 = vmatpush3.msra.mxu0 %v33_v1  ;;  %6966 = vmatprep.subr.mxu1 %v162_v6  ;;  %v6403_v9 = vld [vmem:[%s8664_s3 + $0x88] sm:$0xff]  ;;  %v160_v10 = vld [vmem:[%s8664_s3] sm:$0xff]  ;;  %v6409_v12 = vld [vmem:[%s8664_s3 + $0x118] sm:$0xff]  ;;  %vm7655_vm2 = vmmov 0   ;;  %vm413_vm3 = vcmask 64512   ;;  %vm2984_vm6 = vcmask 523264  }
   0x6   :  { %6962 = vmatmul.mubr.msk.f32.vlgmr.msra.gmra.mxu0 %vm38_vm0, %v37_v3  ;;  %6975 = vmatprep.subr.mxu0 %v6405_v5  ;;  %v6402_v11 = vld [vmem:[%s8664_s3 + $0x80] sm:$0xff]  ;;  %v35_v14 = vld [vmem:[%s8663_s2 + $0x10] sm:$0xff]  ;;  %v6407_v19 = vld [vmem:[%s8664_s3 + $0x108] sm:$0xff]  ;;  %v7656_v31 = vmov 1966171168   ;;  %v130_v37 = vshrl.u32 %v129_v33, 7 }
   0x7   :  { %6976 = vmatpush3.msra.mxu0 %v6405_v5  ;;  %6967 = vmatpush3.msra.mxu1 %v162_v6  ;;  %v6408_v18 = vld [vmem:[%s8664_s3 + $0x110] sm:$0xff]  ;;  %v6406_v20 = vld [vmem:[%s8664_s3 + $0x100] sm:$0xff]  ;;  %v127_v32 = vunpack.c.l.s4 %v7656_v31  ;;  %v6430_v3 = vld [vmem:[%s8664_s3 + $0xb8] sm:$0xff]  ;;  %vm6093_vm9 = vcmask 1041409   ;;  %vm6274_vm11 = vcmask 254976   ;;  %s7658_s21 = smov [#allocation2]  }
   0x8   :  { %6977 = vmatprep.subr.mxu0 %v6404_v7  ;;  %6968 = vmatprep.subr.mxu1 %v161_v8  ;;  %v6410_v24 = vld [vmem:[%s8665_s4] ss:$0 sm:$0xff]  ;;  %v570_v44 = vsub.s32 0, %v130_v37  ;;  %v6426_v4 = vld [vmem:[%s8664_s3 + $0x38] sm:$0xff]  ;;  %v6436_v31 = vld [vmem:[%s8665_s4 + $0x1] ss:$0 sm:$0xff] }
   0x9   :  { %6978 = vmatpush3.msra.mxu0 %v6404_v7  ;;  %6969 = vmatpush3.msra.mxu1 %v161_v8  ;;  %v122_v34 = vld [vmem:[%s8662_s1] sm:$0x3]  ;;  %v128_v36 = vunpack.c.0.s8 %v127_v32  ;;  %s6392_s22 = sshll.u32 %s7658_s21, 4  ;;  %vm6384_vm13 = vcmask 58368   ;;  %s6393_s22 = int_to_ptr.vmem [resolvable:$true] %s6392_s22 }
   0xa   :  { %6979 = vmatprep.subr.mxu0 %v6403_v9  ;;  %6970 = vmatprep.subr.mxu1 %v160_v10  ;;  %v123_v35 = vsub.f32 1.0, %v122_v34  ;;  %s7632_s0 = scalar_lea.vmem %s6393_s22, 32  ;;  %p7637_p1 = scmp.lt.s32.totalorder %s6393_s22, %s6393_s22 }
   0xb   :  { %6980 = vmatpush3.msra.mxu0 %v6403_v9  ;;  %6971 = vmatpush3.msra.mxu1 %v160_v10  ;;  %v131_v39 = vsub.s32 %v128_v36, %v130_v37  ;;  %v6429_v9 = vld [vmem:[%s8664_s3 + $0xb0] sm:$0xff]  ;;  %p7633_p0 = scmp.ne.s32.totalorder %s6393_s22, %s7632_s0  ;;  %p7638_p2 = scmp.lt.s32.totalorder %s7632_s0, %s7632_s0 }
   0xc   :  { %6981 = vmatprep.subr.mxu0 %v6402_v11  ;;  %6986 = vmatprep.subr.mxu1 %v6409_v12  ;;  %v124_v38 = vmul.f32 -10000.0, %v123_v35 }
   0xd   :  { %6982 = vmatpush3.msra.mxu0 %v6402_v11  ;;  %v6428_v11 = vld [vmem:[%s8664_s3 + $0xa8] sm:$0xff]  ;;  %p7639_p3 = por %p7638_p2, %p7637_p1 }
   0xe   :  { %6997 = vmatprep.subr.mxu0 %v7654_v21  ;;  %v132_v40 = vrot.slane %v124_v38, %v131_v39 }
   0xf   :  { %p7640_p4 = pnand %p7639_p3, %p7633_p0 }
  0x10   :  { %v133_v41 = vcombine.high %v132_v40, %v132_v40  ;;  %v140_v45 = vrot.slane %v132_v40, %v131_v39 }
  0x12   :  { %v147_v42 = vrot.slane %v133_v41, %v131_v39  ;;  %v7801_v51 = vrot.slane %v140_v45, %v570_v44 }
  0x14   :  { %v7799_v47 = vrot.slane %v147_v42, %v570_v44 }
  0xc6   :  { %v6963_v13 = vpop.f32.mrf.mxu0 }
  0xc7   :  { %v7753_v17 = vadd.f32 %v6963_v13, %v35_v14  ;;  %v6425_v13 = vld [vmem:[%s8664_s3 + $0x30] sm:$0xff] }
  0xc8   :  { %v111_v15 = vpop.f32.mrf.mxu0 }
  0xc9   :  { %v7751_v16 = vadd.f32 %v111_v15, %v35_v14  ;;  %v6427_v14 = vld [vmem:[%s8664_s3 + $0xa0] sm:$0xff]  ;;  %v6424_v15 = vld [vmem:[%s8664_s3 + $0x28] sm:$0xff] }
  0xcb   :  { %6972 = vmatprep.mubr.msk.f32.mxu1 %vm181_vm1, %v7751_v16  ;;  %6983 = vmatprep.mubr.msk.f32.mxu0 %vm181_vm1, %v7751_v16 }
  0xcc   :  { %6973 = vmatmul.mubr.msk.f32.vlgmr.msra.gmra.mxu1 %vm181_vm1, %v7753_v17  ;;  %6984 = vmatmul.mubr.msk.f32.vlgmr.msra.gmra.mxu0 %vm181_vm1, %v7753_v17 }
  0xcd   :  { %6987 = vmatpush3.msra.mxu1 %v6409_v12  ;;  %6994 = vmatprep.mubr.msk.f32.mxu1 %vm181_vm1, %v7751_v16 }
  0xce   :  { %6988 = vmatprep.subr.mxu1 %v6408_v18  ;;  %6999 = vmatprep.mubr.msk.f32.mxu0 %vm7655_vm2, %v7654_v21 }
  0xcf   :  { %6989 = vmatpush3.msra.mxu1 %v6408_v18  ;;  %v6423_v18 = vld [vmem:[%s8664_s3 + $0x20] sm:$0xff] }
  0xd0   :  { %6990 = vmatprep.subr.mxu1 %v6407_v19 }
  0xd1   :  { %6991 = vmatpush3.msra.mxu1 %v6407_v19  ;;  %v6434_v19 = vld [vmem:[%s8664_s3 + $0x138] sm:$0xff] }
  0xd2   :  { %6992 = vmatprep.subr.mxu1 %v6406_v20 }
  0xd3   :  { %6993 = vmatpush3.msra.mxu1 %v6406_v20  ;;  %v6433_v20 = vld [vmem:[%s8664_s3 + $0x130] sm:$0xff] }
  0xd4   :  { %6995 = vmatmul.mubr.msk.f32.vlgmr.msra.gmra.mxu1 %vm181_vm1, %v7753_v17  ;;  %7007 = vmatprep.subr.mxu1 %v7654_v21 }
  0xd5   :  { %7009 = vmatprep.mubr.msk.f32.mxu1 %vm7655_vm2, %v7654_v21 }
 0x18c   :  { %v6974_v22 = vpop.f32.mrf.mxu1  ;;  %v6985_v23 = vpop.f32.mrf.mxu0 }
 0x18d   :  { %v260_v28 = vadd.f32 %v6974_v22, %v6410_v24  ;;  %v6432_v22 = vld [vmem:[%s8664_s3 + $0x128] sm:$0xff] }
 0x18e   :  { %v254_v25 = vpop.f32.mrf.mxu1  ;;  %v329_v26 = vpop.f32.mrf.mxu0 }
 0x18f   :  { %v255_v27 = vadd.f32 %v6410_v24, %v254_v25  ;;  %6998 = vmatpush3.xpose.msk.msra.mxu0 %vm413_vm3, %v329_v26 }
 0x190   :  { %7002 = vmatprep.subr.mxu0 %v7654_v21 }
 0x192   :  { %7000 = vmatmul.mubr.msk.f32.vlgmr.msra.gmra.mxu0 %vm413_vm3, %v255_v27 }
 0x193   :  { %7003 = vmatpush3.xpose.msk.msra.mxu0 %vm413_vm3, %v6985_v23  ;;  %7004 = vmatprep.mubr.msk.f32.mxu0 %vm7655_vm2, %v7654_v21  ;;  %v6431_v23 = vld [vmem:[%s8664_s3 + $0x120] sm:$0xff] }
 0x194   :  { %v6996_v29 = vpop.f32.mrf.mxu1  ;;  %7012 = vmatprep.subr.mxu0 %v7654_v21 }
 0x196   :  { %v404_v30 = vpop.f32.mrf.mxu1  ;;  %7005 = vmatmul.mubr.msk.f32.vlgmr.msra.gmra.mxu0 %vm413_vm3, %v260_v28 }
 0x197   :  { %7008 = vmatpush3.msra.mxu1 %v404_v30  ;;  %7013 = vmatpush3.msra.mxu0 %v6996_v29 }
 0x198   :  { %7014 = vmatprep.mubr.msk.f32.mxu0 %vm7655_vm2, %v7654_v21  ;;  %7028 = vmatprep.subr.mxu0 %v6430_v3 }
 0x199   :  { %7017 = vmatprep.subr.mxu1 %v6426_v4 }
 0x252   :  { %v486_v43 = vpop.f32.mrf.mxu0 }
 0x253   :  { %v566_v49 = vmul.f32 0.35355338, %v486_v43 }
 0x254   :  { %v7001_v46 = vpop.f32.mrf.mxu0 }
 0x255   :  { %v578_v55 = vadd.f32 %v7801_v51, %v566_v49 }
 0x256   :  { %v562_v48 = vpop.f32.mrf.mxu0 }
 0x257   :  { %v567_v50 = vmul.f32 0.35355338, %v562_v48  ;;  %v580_v56 = vsel %vm413_vm3, %v578_v55, -inf }
 0x258   :  { %v7006_v52 = vpop.f32.mrf.mxu0 }
 0x259   :  { %v579_v53 = vadd.f32 %v7799_v47, %v567_v50 }
 0x25b   :  { %v583_v54 = vsel %vm413_vm3, %v579_v53, -inf }
 0x25c   :  { %584 = vmax.xlane.f32.xlu0 %v583_v54 }
 0x260   :  { %581 = vmax.xlane.f32.xlu0 %v580_v56 }
 0x2e5   :  { %v585_v57 = vpop.xlane.xlu0 %584 }
 0x2e6   :  { %v587_v58 = vsub.f32 %v579_v53, %v585_v57 }
 0x2e8   :  { %v590_v59 = vmul.f32 1.442695, %v587_v58 }
 0x2e9   :  { %v582_v60 = vpop.xlane.xlu0 %581 }
 0x2ea   :  { %7526 = vpow2.f32 %v590_v59  ;;  %v586_v61 = vsub.f32 %v578_v55, %v582_v60  ;;  %v148_v60 = vld [vmem:[%s8666_s5] sm:$0xff] }
 0x2ec   :  { %v588_v62 = vmul.f32 1.442695, %v586_v61 }
 0x2ee   :  { %7528 = vpow2.f32 %v588_v62 }
 0x2f7   :  { %v7527_v63 = vpop.eup %7526 }
 0x2f8   :  { %v595_v0 = vsel %vm413_vm3, %v7527_v63, 0.0 }
 0x2f9   :  { %596 = vadd.xlane.f32.xlu1 %v595_v0 }
 0x2fb   :  { %v7529_v1 = vpop.eup %7528 }
 0x2fc   :  { %v592_v2 = vsel %vm413_vm3, %v7529_v1, 0.0 }
 0x2fd   :  { %593 = vadd.xlane.f32.xlu1 %v592_v2 }
 0x382   :  { %v597_v5 = vpop.xlane.xlu1 %596 }
 0x383   :  { %7530 = vrcp.f32 %v597_v5  ;;  %v6458_v5 = vld [vmem:[%s8664_s3 + $0xc8] sm:$0xff] }
 0x386   :  { %v594_v6 = vpop.xlane.xlu1 %593 }
 0x387   :  { %7532 = vrcp.f32 %v594_v6  ;;  %v6457_v6 = vld [vmem:[%s8664_s3 + $0xc0] sm:$0xff] }
 0x390   :  { %v7531_v7 = vpop.eup %7530 }
 0x391   :  { %v601_v8 = vmul.f32 %v7531_v7, %v7527_v63  ;;  %v149_v7 = vld [vmem:[%s8666_s5 + $0x8] sm:$0xff] }
 0x393   :  { %7015 = vmatmul.mubr.msk.f32.vlgmr.msra.gmra.mxu0 %vm413_vm3, %v601_v8  ;;  %v6456_v8 = vld [vmem:[%s8664_s3 + $0x58] sm:$0xff] }
 0x394   :  { %v7533_v10 = vpop.eup %7532  ;;  %7029 = vmatpush3.msra.mxu0 %v6430_v3  ;;  %7036 = vmatprep.mubr.msk.f32.mxu0 %vm181_vm1, %v7751_v16  ;;  %v6460_v3 = vld [vmem:[%s8664_s3 + $0xd8] sm:$0xff] }
 0x395   :  { %7030 = vmatprep.subr.mxu0 %v6429_v9  ;;  %v600_v12 = vmul.f32 %v7533_v10, %v7529_v1 }
 0x396   :  { %7031 = vmatpush3.msra.mxu0 %v6429_v9 }
 0x397   :  { %7032 = vmatprep.subr.mxu0 %v6428_v11  ;;  %7010 = vmatmul.mubr.msk.f32.vlgmr.msra.gmra.mxu1 %vm413_vm3, %v600_v12  ;;  %v6455_v12 = vld [vmem:[%s8664_s3 + $0x50] sm:$0xff] }
 0x398   :  { %7018 = vmatpush3.msra.mxu1 %v6426_v4  ;;  %7033 = vmatpush3.msra.mxu0 %v6428_v11  ;;  %v6459_v4 = vld [vmem:[%s8664_s3 + $0xd0] sm:$0xff] }
 0x399   :  { %7019 = vmatprep.subr.mxu1 %v6425_v13  ;;  %7025 = vmatprep.mubr.msk.f32.mxu1 %vm181_vm1, %v7751_v16 }
 0x39a   :  { %7034 = vmatprep.subr.mxu0 %v6427_v14  ;;  %7020 = vmatpush3.msra.mxu1 %v6425_v13 }
 0x39b   :  { %7035 = vmatpush3.msra.mxu0 %v6427_v14  ;;  %7021 = vmatprep.subr.mxu1 %v6424_v15  ;;  %v6454_v14 = vld [vmem:[%s8664_s3 + $0x48] sm:$0xff] }
 0x39c   :  { %7037 = vmatmul.mubr.msk.f32.vlgmr.msra.gmra.mxu0 %vm181_vm1, %v7753_v17  ;;  %7022 = vmatpush3.msra.mxu1 %v6424_v15  ;;  %v6453_v15 = vld [vmem:[%s8664_s3 + $0x40] sm:$0xff] }
 0x39d   :  { %7023 = vmatprep.subr.mxu1 %v6423_v18  ;;  %7050 = vmatprep.subr.mxu0 %v7654_v21 }
 0x39e   :  { %7024 = vmatpush3.msra.mxu1 %v6423_v18  ;;  %7052 = vmatprep.mubr.msk.f32.mxu0 %vm7655_vm2, %v7654_v21 }
 0x39f   :  { %7026 = vmatmul.mubr.msk.f32.vlgmr.msra.gmra.mxu1 %vm181_vm1, %v7753_v17  ;;  %7039 = vmatprep.subr.mxu1 %v6434_v19 }
 0x3a0   :  { %7040 = vmatpush3.msra.mxu1 %v6434_v19  ;;  %7047 = vmatprep.mubr.msk.f32.mxu1 %vm181_vm1, %v7751_v16  ;;  %v6464_v19 = vld [vmem:[%s8664_s3 + $0x158] sm:$0xff] }
 0x3a1   :  { %7041 = vmatprep.subr.mxu1 %v6433_v20 }
 0x3a2   :  { %7042 = vmatpush3.msra.mxu1 %v6433_v20  ;;  %v6463_v20 = vld [vmem:[%s8664_s3 + $0x150] sm:$0xff] }
 0x3a3   :  { %7043 = vmatprep.subr.mxu1 %v6432_v22 }
 0x3a4   :  { %7044 = vmatpush3.msra.mxu1 %v6432_v22 }
 0x3a5   :  { %7045 = vmatprep.subr.mxu1 %v6431_v23 }
 0x3a6   :  { %7046 = vmatpush3.msra.mxu1 %v6431_v23  ;;  %v6462_v23 = vld [vmem:[%s8664_s3 + $0x148] sm:$0xff] }
 0x3a7   :  { %7048 = vmatmul.mubr.msk.f32.vlgmr.msra.gmra.mxu1 %vm181_vm1, %v7753_v17  ;;  %7060 = vmatprep.subr.mxu1 %v7654_v21 }
 0x3a8   :  { %7062 = vmatprep.mubr.msk.f32.mxu1 %vm7655_vm2, %v7654_v21 }
 0x453   :  { %v7865_v24 = vpop.f32.mrf.mxu0 }
 0x455   :  { %v7016_v25 = vpop.f32.mrf.mxu0 }
 0x456   :  { %v6461_v25 = vld [vmem:[%s8664_s3 + $0x140] sm:$0xff] }
 0x457   :  { %v671_v26 = vpop.f32.mrf.mxu1 }
 0x459   :  { %v7011_v27 = vpop.f32.mrf.mxu1 }
 0x45c   :  { %v7038_v28 = vpop.f32.mrf.mxu0 }
 0x45e   :  { %v912_v29 = vpop.f32.mrf.mxu0 }
 0x45f   :  { %7051 = vmatpush3.xpose.msk.msra.mxu0 %vm413_vm3, %v912_v29  ;;  %v7027_v30 = vpop.f32.mrf.mxu1 }
 0x460   :  { %7055 = vmatprep.subr.mxu0 %v7654_v21  ;;  %v843_v35 = vadd.f32 %v7027_v30, %v6436_v31  ;;  %v6466_v30 = vld [vmem:[%s8665_s4 + $0x2] ss:$0 sm:$0xff] }
 0x461   :  { %v837_v32 = vpop.f32.mrf.mxu1 }
 0x462   :  { %v838_v34 = vadd.f32 %v6436_v31, %v837_v32 }
 0x464   :  { %7053 = vmatmul.mubr.msk.f32.vlgmr.msra.gmra.mxu0 %vm413_vm3, %v838_v34 }
 0x465   :  { %7056 = vmatpush3.xpose.msk.msra.mxu0 %vm413_vm3, %v7038_v28  ;;  %7057 = vmatprep.mubr.msk.f32.mxu0 %vm7655_vm2, %v7654_v21 }
 0x466   :  { %7065 = vmatprep.subr.mxu0 %v7654_v21 }
 0x467   :  { %v7049_v36 = vpop.f32.mrf.mxu1 }
 0x468   :  { %7058 = vmatmul.mubr.msk.f32.vlgmr.msra.gmra.mxu0 %vm413_vm3, %v843_v35 }
 0x469   :  { %7066 = vmatpush3.msra.mxu0 %v7049_v36  ;;  %v987_v37 = vpop.f32.mrf.mxu1  ;;  %7067 = vmatprep.mubr.msk.f32.mxu0 %vm7655_vm2, %v7654_v21 }
 0x46a   :  { %7061 = vmatpush3.msra.mxu1 %v987_v37  ;;  %7075 = vmatprep.subr.mxu0 %v148_v60 }
 0x46b   :  { %7070 = vmatprep.subr.mxu1 %v149_v7 }
 0x524   :  { %v1068_v38 = vpop.f32.mrf.mxu0 }
 0x525   :  { %v1148_v39 = vmul.f32 0.35355338, %v1068_v38 }
 0x526   :  { %v7054_v40 = vpop.f32.mrf.mxu0 }
 0x527   :  { %v1150_v41 = vadd.f32 %v1148_v39, %v7801_v51 }
 0x528   :  { %v1144_v42 = vpop.f32.mrf.mxu0 }
 0x529   :  { %v1149_v43 = vmul.f32 0.35355338, %v1144_v42  ;;  %v1152_v44 = vsel %vm413_vm3, %v1150_v41, -inf }
 0x52a   :  { %1153 = vmax.xlane.f32.xlu0 %v1152_v44  ;;  %v7059_v45 = vpop.f32.mrf.mxu0 }
 0x52b   :  { %v1151_v46 = vadd.f32 %v1149_v43, %v7799_v47 }
 0x52d   :  { %v1155_v48 = vsel %vm413_vm3, %v1151_v46, -inf }
 0x52e   :  { %1156 = vmax.xlane.f32.xlu1 %v1155_v48 }
 0x5b3   :  { %v1154_v49 = vpop.xlane.xlu0 %1153 }
 0x5b4   :  { %v1158_v50 = vsub.f32 %v1150_v41, %v1154_v49 }
 0x5b6   :  { %v1160_v52 = vmul.f32 1.442695, %v1158_v50 }
 0x5b7   :  { %v1157_v53 = vpop.xlane.xlu1 %1156 }
 0x5b8   :  { %7534 = vpow2.f32 %v1160_v52  ;;  %v1159_v54 = vsub.f32 %v1151_v46, %v1157_v53 }
 0x5ba   :  { %v1162_v55 = vmul.f32 1.442695, %v1159_v54 }
 0x5bc   :  { %7536 = vpow2.f32 %v1162_v55 }
 0x5c5   :  { %v7535_v56 = vpop.eup %7534 }
 0x5c6   :  { %v1164_v57 = vsel %vm413_vm3, %v7535_v56, 0.0 }
 0x5c7   :  { %1165 = vadd.xlane.f32.xlu0 %v1164_v57 }
 0x5c9   :  { %v7537_v58 = vpop.eup %7536 }
 0x5ca   :  { %v1167_v59 = vsel %vm413_vm3, %v7537_v58, 0.0 }
 0x5cb   :  { %1168 = vadd.xlane.f32.xlu1 %v1167_v59  ;;  %v6484_v59 = vld [vmem:[%s8664_s3 + $0x78] sm:$0xff] }
 0x650   :  { %v1166_v61 = vpop.xlane.xlu0 %1165 }
 0x651   :  { %7538 = vrcp.f32 %v1166_v61 }
 0x654   :  { %v1169_v62 = vpop.xlane.xlu1 %1168 }
 0x655   :  { %7540 = vrcp.f32 %v1169_v62 }
 0x65e   :  { %v7539_v63 = vpop.eup %7538 }
 0x65f   :  { %v1172_v0 = vmul.f32 %v7539_v63, %v7535_v56 }
 0x661   :  { %7063 = vmatmul.mubr.msk.f32.vlgmr.msra.gmra.mxu1 %vm413_vm3, %v1172_v0 }
 0x662   :  { %v7541_v1 = vpop.eup %7540  ;;  %7071 = vmatpush3.msra.mxu1 %v149_v7  ;;  %v6490_v7 = vld [vmem:[%s8664_s3 + $0x168] sm:$0xff] }
 0x663   :  { %v1173_v2 = vmul.f32 %v7541_v1, %v7537_v58  ;;  %7080 = vmatprep.subr.mxu1 %v6456_v8 }
 0x665   :  { %7068 = vmatmul.mubr.msk.f32.vlgmr.msra.gmra.mxu0 %vm413_vm3, %v1173_v2  ;;  %v6483_v2 = vld [vmem:[%s8664_s3 + $0x70] sm:$0xff] }
 0x666   :  { %7077 = vmatprep.mubr.msk.f32.mxu0 %vm413_vm3, %v671_v26  ;;  %7076 = vmatpush3.msra.mxu0 %v148_v60 }
 0x667   :  { %7091 = vmatprep.subr.mxu0 %v6460_v3 }
 0x669   :  { %7078 = vmatmul.mubr.msk.f32.vlgmr.msra.gmra.mxu0 %vm413_vm3, %v7865_v24 }
 0x66a   :  { %7092 = vmatpush3.msra.mxu0 %v6460_v3  ;;  %7099 = vmatprep.mubr.msk.f32.mxu0 %vm181_vm1, %v7751_v16  ;;  %v6482_v3 = vld [vmem:[%s8664_s3 + $0x68] sm:$0xff] }
 0x66b   :  { %7093 = vmatprep.subr.mxu0 %v6459_v4 }
 0x66c   :  { %7094 = vmatpush3.msra.mxu0 %v6459_v4  ;;  %v6481_v4 = vld [vmem:[%s8664_s3 + $0x60] sm:$0xff] }
 0x66d   :  { %7095 = vmatprep.subr.mxu0 %v6458_v5 }
 0x66e   :  { %7096 = vmatpush3.msra.mxu0 %v6458_v5  ;;  %v6492_v5 = vld [vmem:[%s8664_s3 + $0x178] sm:$0xff] }
 0x66f   :  { %7097 = vmatprep.subr.mxu0 %v6457_v6 }
 0x670   :  { %7098 = vmatpush3.msra.mxu0 %v6457_v6  ;;  %v6491_v6 = vld [vmem:[%s8664_s3 + $0x170] sm:$0xff] }
 0x671   :  { %7100 = vmatmul.mubr.msk.f32.vlgmr.msra.gmra.mxu0 %vm181_vm1, %v7753_v17  ;;  %7113 = vmatprep.subr.mxu0 %v7654_v21 }
 0x672   :  { %7115 = vmatprep.mubr.msk.f32.mxu0 %vm7655_vm2, %v7654_v21 }
 0x721   :  { %v1243_v9 = vpop.f32.mrf.mxu1 }
 0x722   :  { %7072 = vmatprep.mubr.msk.f32.mxu1 %vm413_vm3, %v1243_v9  ;;  %v150_v9 = vld [vmem:[%s8666_s5 + $0x10] sm:$0xff] }
 0x723   :  { %v7064_v10 = vpop.f32.mrf.mxu1 }
 0x724   :  { %v6488_v10 = vld [vmem:[%s8664_s3 + $0xf8] sm:$0xff] }
 0x725   :  { %v1316_v11 = vpop.f32.mrf.mxu0 }
 0x726   :  { %7073 = vmatmul.mubr.msk.f32.vlgmr.msra.gmra.mxu1 %vm413_vm3, %v1316_v11 }
 0x727   :  { %7081 = vmatpush3.msra.mxu1 %v6456_v8  ;;  %v7069_v13 = vpop.f32.mrf.mxu0  ;;  %7088 = vmatprep.mubr.msk.f32.mxu1 %vm181_vm1, %v7751_v16  ;;  %v6489_v8 = vld [vmem:[%s8664_s3 + $0x160] sm:$0xff] }
 0x728   :  { %7082 = vmatprep.subr.mxu1 %v6455_v12 }
 0x729   :  { %7083 = vmatpush3.msra.mxu1 %v6455_v12  ;;  %v7932_v18 = vpop.f32.mrf.mxu0 }
 0x72a   :  { %7084 = vmatprep.subr.mxu1 %v6454_v14 }
 0x72b   :  { %7085 = vmatpush3.msra.mxu1 %v6454_v14  ;;  %v7942_v22 = vpop.f32.mrf.mxu0  ;;  %v6487_v14 = vld [vmem:[%s8664_s3 + $0xf0] sm:$0xff] }
 0x72c   :  { %7086 = vmatprep.subr.mxu1 %v6453_v15 }
 0x72d   :  { %7087 = vmatpush3.msra.mxu1 %v6453_v15 }
 0x72e   :  { %7089 = vmatmul.mubr.msk.f32.vlgmr.msra.gmra.mxu1 %vm181_vm1, %v7753_v17  ;;  %7102 = vmatprep.subr.mxu1 %v6464_v19 }
 0x72f   :  { %7103 = vmatpush3.msra.mxu1 %v6464_v19  ;;  %7110 = vmatprep.mubr.msk.f32.mxu1 %vm181_vm1, %v7751_v16  ;;  %v6486_v19 = vld [vmem:[%s8664_s3 + $0xe8] sm:$0xff] }
 0x730   :  { %7104 = vmatprep.subr.mxu1 %v6463_v20 }
 0x731   :  { %v7101_v24 = vpop.f32.mrf.mxu0  ;;  %7105 = vmatpush3.msra.mxu1 %v6463_v20  ;;  %v6485_v20 = vld [vmem:[%s8664_s3 + $0xe0] sm:$0xff] }
 0x732   :  { %7106 = vmatprep.subr.mxu1 %v6462_v23 }
 0x733   :  { %v1646_v26 = vpop.f32.mrf.mxu0  ;;  %7107 = vmatpush3.msra.mxu1 %v6462_v23 }
 0x734   :  { %7108 = vmatprep.subr.mxu1 %v6461_v25  ;;  %7114 = vmatpush3.xpose.msk.msra.mxu0 %vm413_vm3, %v1646_v26 }
 0x735   :  { %7109 = vmatpush3.msra.mxu1 %v6461_v25  ;;  %7118 = vmatprep.subr.mxu0 %v7654_v21 }
 0x736   :  { %7111 = vmatmul.mubr.msk.f32.vlgmr.msra.gmra.mxu1 %vm181_vm1, %v7753_v17  ;;  %7123 = vmatprep.subr.mxu1 %v7654_v21 }
 0x737   :  { %7125 = vmatprep.mubr.msk.f32.mxu1 %vm7655_vm2, %v7654_v21 }
 0x7e6   :  { %v7959_v27 = vpop.f32.mrf.mxu1 }
 0x7e8   :  { %v7961_v28 = vpop.f32.mrf.mxu1 }
 0x7ee   :  { %v7090_v29 = vpop.f32.mrf.mxu1 }
 0x7ef   :  { %v1577_v34 = vadd.f32 %v7090_v29, %v6466_v30  ;;  %v1479_v29 = vadd.f32 %v7932_v18, %v7959_v27 }
 0x7f0   :  { %v1571_v31 = vpop.f32.mrf.mxu1 }
 0x7f1   :  { %v1572_v32 = vadd.f32 %v6466_v30, %v1571_v31  ;;  %v1474_v31 = vadd.f32 %v7942_v22, %v7961_v28 }
 0x7f3   :  { %7116 = vmatmul.mubr.msk.f32.vlgmr.msra.gmra.mxu0 %vm413_vm3, %v1572_v32 }
 0x7f4   :  { %7119 = vmatpush3.xpose.msk.msra.mxu0 %vm413_vm3, %v7101_v24  ;;  %7120 = vmatprep.mubr.msk.f32.mxu0 %vm7655_vm2, %v7654_v21 }
 0x7f5   :  { %7128 = vmatprep.subr.mxu0 %v7654_v21 }
 0x7f6   :  { %v7112_v35 = vpop.f32.mrf.mxu1 }
 0x7f7   :  { %7121 = vmatmul.mubr.msk.f32.vlgmr.msra.gmra.mxu0 %vm413_vm3, %v1577_v34 }
 0x7f8   :  { %7129 = vmatpush3.msra.mxu0 %v7112_v35  ;;  %v1721_v36 = vpop.f32.mrf.mxu1  ;;  %7130 = vmatprep.mubr.msk.f32.mxu0 %vm7655_vm2, %v7654_v21 }
 0x7f9   :  { %7124 = vmatpush3.msra.mxu1 %v1721_v36  ;;  %7138 = vmatprep.subr.mxu0 %v6484_v59 }
 0x7fa   :  { %7133 = vmatprep.subr.mxu1 %v150_v9 }
 0x8b3   :  { %v1802_v37 = vpop.f32.mrf.mxu0 }
 0x8b4   :  { %v1882_v38 = vmul.f32 0.35355338, %v1802_v37 }
 0x8b5   :  { %v7117_v39 = vpop.f32.mrf.mxu0 }
 0x8b6   :  { %v1884_v40 = vadd.f32 %v1882_v38, %v7801_v51  ;;  %v6494_v38 = vld [vmem:[%s8665_s4 + $0x3] ss:$0 sm:$0xff] }
 0x8b7   :  { %v1878_v41 = vpop.f32.mrf.mxu0 }
 0x8b8   :  { %v1883_v42 = vmul.f32 0.35355338, %v1878_v41  ;;  %v1886_v43 = vsel %vm413_vm3, %v1884_v40, -inf }
 0x8b9   :  { %1887 = vmax.xlane.f32.xlu0 %v1886_v43  ;;  %v7122_v44 = vpop.f32.mrf.mxu0 }
 0x8ba   :  { %v1885_v45 = vadd.f32 %v1883_v42, %v7799_v47 }
 0x8bc   :  { %v1889_v46 = vsel %vm413_vm3, %v1885_v45, -inf }
 0x8bd   :  { %1890 = vmax.xlane.f32.xlu1 %v1889_v46 }
 0x942   :  { %v1888_v48 = vpop.xlane.xlu0 %1887 }
 0x943   :  { %v1892_v49 = vsub.f32 %v1884_v40, %v1888_v48 }
 0x945   :  { %v1894_v50 = vmul.f32 1.442695, %v1892_v49 }
 0x946   :  { %v1891_v52 = vpop.xlane.xlu1 %1890 }
 0x947   :  { %7542 = vpow2.f32 %v1894_v50  ;;  %v1893_v53 = vsub.f32 %v1885_v45, %v1891_v52 }
 0x949   :  { %v1896_v54 = vmul.f32 1.442695, %v1893_v53 }
 0x94b   :  { %7544 = vpow2.f32 %v1896_v54 }
 0x954   :  { %v7543_v55 = vpop.eup %7542 }
 0x955   :  { %v1898_v56 = vsel %vm413_vm3, %v7543_v55, 0.0 }
 0x956   :  { %1899 = vadd.xlane.f32.xlu0 %v1898_v56 }
 0x958   :  { %v7545_v57 = vpop.eup %7544 }
 0x959   :  { %v1901_v58 = vsel %vm413_vm3, %v7545_v57, 0.0 }
 0x95a   :  { %1902 = vadd.xlane.f32.xlu1 %v1901_v58 }
 0x9df   :  { %v1900_v60 = vpop.xlane.xlu0 %1899 }
 0x9e0   :  { %7546 = vrcp.f32 %v1900_v60 }
 0x9e3   :  { %v1903_v61 = vpop.xlane.xlu1 %1902 }
 0x9e4   :  { %7548 = vrcp.f32 %v1903_v61 }
 0x9ed   :  { %v7547_v62 = vpop.eup %7546 }
 0x9ee   :  { %v1906_v63 = vmul.f32 %v7547_v62, %v7543_v55 }
 0x9f0   :  { %7126 = vmatmul.mubr.msk.f32.vlgmr.msra.gmra.mxu1 %vm413_vm3, %v1906_v63 }
 0x9f1   :  { %v7549_v0 = vpop.eup %7548  ;;  %7134 = vmatpush3.msra.mxu1 %v150_v9 }
 0x9f2   :  { %v1907_v1 = vmul.f32 %v7549_v0, %v7545_v57  ;;  %7149 = vmatprep.subr.mxu1 %v6488_v10 }
 0x9f4   :  { %7131 = vmatmul.mubr.msk.f32.vlgmr.msra.gmra.mxu0 %vm413_vm3, %v1907_v1  ;;  %v151_v1 = vld [vmem:[%s8666_s5 + $0x18] sm:$0xff] }
 0x9f5   :  { %7139 = vmatpush3.msra.mxu0 %v6484_v59  ;;  %7146 = vmatprep.mubr.msk.f32.mxu0 %vm181_vm1, %v7751_v16 }
 0x9f6   :  { %7140 = vmatprep.subr.mxu0 %v6483_v2 }
 0x9f7   :  { %7141 = vmatpush3.msra.mxu0 %v6483_v2 }
 0x9f8   :  { %7142 = vmatprep.subr.mxu0 %v6482_v3 }
 0x9f9   :  { %7143 = vmatpush3.msra.mxu0 %v6482_v3 }
 0x9fa   :  { %7144 = vmatprep.subr.mxu0 %v6481_v4 }
 0x9fb   :  { %7145 = vmatpush3.msra.mxu0 %v6481_v4 }
 0x9fc   :  { %7147 = vmatmul.mubr.msk.f32.vlgmr.msra.gmra.mxu0 %vm181_vm1, %v7753_v17  ;;  %7160 = vmatprep.subr.mxu0 %v6492_v5 }
 0x9fd   :  { %7161 = vmatpush3.msra.mxu0 %v6492_v5  ;;  %7168 = vmatprep.mubr.msk.f32.mxu0 %vm181_vm1, %v7751_v16 }
 0x9fe   :  { %7162 = vmatprep.subr.mxu0 %v6491_v6 }
 0x9ff   :  { %7163 = vmatpush3.msra.mxu0 %v6491_v6 }
 0xa00   :  { %7164 = vmatprep.subr.mxu0 %v6490_v7 }
 0xa01   :  { %7165 = vmatpush3.msra.mxu0 %v6490_v7  ;;  %v6509_v7 = vld [vmem:[%s8668_s7] ss:$0 sm:$0xff] }
 0xa02   :  { %7166 = vmatprep.subr.mxu0 %v6489_v8 }
 0xa03   :  { %7167 = vmatpush3.msra.mxu0 %v6489_v8 }
 0xa04   :  { %7169 = vmatmul.mubr.msk.f32.vlgmr.msra.gmra.mxu0 %vm181_vm1, %v7753_v17  ;;  %7181 = vmatprep.subr.mxu0 %v7654_v21 }
 0xa05   :  { %7183 = vmatprep.mubr.msk.f32.mxu0 %vm7655_vm2, %v7654_v21 }
 0xab0   :  { %v1977_v11 = vpop.f32.mrf.mxu1 }
 0xab1   :  { %7135 = vmatprep.mubr.msk.f32.mxu1 %vm413_vm3, %v1977_v11 }
 0xab2   :  { %v7127_v12 = vpop.f32.mrf.mxu1 }
 0xab4   :  { %v2050_v13 = vpop.f32.mrf.mxu0 }
 0xab5   :  { %7136 = vmatmul.mubr.msk.f32.vlgmr.msra.gmra.mxu1 %vm413_vm3, %v2050_v13 }
 0xab6   :  { %7150 = vmatpush3.msra.mxu1 %v6488_v10  ;;  %v7132_v15 = vpop.f32.mrf.mxu0  ;;  %7157 = vmatprep.mubr.msk.f32.mxu1 %vm181_vm1, %v7751_v16 }
 0xab7   :  { %7151 = vmatprep.subr.mxu1 %v6487_v14 }
 0xab8   :  { %7152 = vmatpush3.msra.mxu1 %v6487_v14 }
 0xab9   :  { %7153 = vmatprep.subr.mxu1 %v6486_v19 }
 0xaba   :  { %7154 = vmatpush3.msra.mxu1 %v6486_v19 }
 0xabb   :  { %7155 = vmatprep.subr.mxu1 %v6485_v20 }
 0xabc   :  { %7156 = vmatpush3.msra.mxu1 %v6485_v20  ;;  %v7148_v23 = vpop.f32.mrf.mxu0 }
 0xabd   :  { %7158 = vmatmul.mubr.msk.f32.vlgmr.msra.gmra.mxu1 %vm181_vm1, %v7753_v17  ;;  %7171 = vmatprep.subr.mxu1 %v7654_v21  ;;  %v2232_v18 = vadd.f32 %v7148_v23, %v6494_v38 }
 0xabe   :  { %7173 = vmatprep.mubr.msk.f32.mxu1 %vm7655_vm2, %v7654_v21  ;;  %v2226_v24 = vpop.f32.mrf.mxu0 }
 0xabf   :  { %v2227_v39 = vadd.f32 %v6494_v38, %v2226_v24 }
 0xac4   :  { %v7170_v25 = vpop.f32.mrf.mxu0 }
 0xac6   :  { %v2376_v26 = vpop.f32.mrf.mxu0 }
 0xac7   :  { %7182 = vmatpush3.msra.mxu0 %v2376_v26 }
 0xac8   :  { %7191 = vmatprep.subr.mxu0 %v151_v1 }
 0xb75   :  { %v7137_v30 = vpop.f32.mrf.mxu1 }
 0xb76   :  { %v8045_v32 = vadd.f32 %v7137_v30, %v1479_v29 }
 0xb77   :  { %v2126_v34 = vpop.f32.mrf.mxu1 }
 0xb78   :  { %v8047_v35 = vadd.f32 %v2126_v34, %v1474_v31  ;;  %v2844_v34 = vld [vmem:[%s8667_s6 + $0x10] sm:$0xff] }
 0xb7d   :  { %v7159_v36 = vpop.f32.mrf.mxu1 }
 0xb7f   :  { %v2301_v37 = vpop.f32.mrf.mxu1 }
 0xb80   :  { %7172 = vmatpush3.xpose.msk.msra.mxu1 %vm413_vm3, %v2301_v37 }
 0xb81   :  { %7176 = vmatprep.subr.mxu1 %v7654_v21 }
 0xb83   :  { %7174 = vmatmul.mubr.msk.f32.vlgmr.msra.gmra.mxu1 %vm413_vm3, %v2227_v39 }
 0xb84   :  { %7177 = vmatpush3.xpose.msk.msra.mxu1 %vm413_vm3, %v7159_v36  ;;  %7178 = vmatprep.mubr.msk.f32.mxu1 %vm7655_vm2, %v7654_v21  ;;  %v2842_v36 = vld [vmem:[%s8667_s6] sm:$0xff] }
 0xb85   :  { %7186 = vmatprep.subr.mxu1 %v7654_v21 }
 0xb87   :  { %7179 = vmatmul.mubr.msk.f32.vlgmr.msra.gmra.mxu1 %vm413_vm3, %v2232_v18 }
 0xb88   :  { %7187 = vmatpush3.msra.mxu1 %v7170_v25  ;;  %7188 = vmatprep.mubr.msk.f32.mxu1 %vm7655_vm2, %v7654_v21 }
 0xc43   :  { %v2457_v22 = vpop.f32.mrf.mxu1 }
 0xc44   :  { %v2537_v27 = vmul.f32 0.35355338, %v2457_v22 }
 0xc45   :  { %v7175_v28 = vpop.f32.mrf.mxu1 }
 0xc46   :  { %v2539_v40 = vadd.f32 %v2537_v27, %v7801_v51 }
 0xc47   :  { %v2533_v41 = vpop.f32.mrf.mxu1 }
 0xc48   :  { %v2538_v42 = vmul.f32 0.35355338, %v2533_v41  ;;  %v2541_v43 = vsel %vm413_vm3, %v2539_v40, -inf }
 0xc49   :  { %2542 = vmax.xlane.f32.xlu0 %v2541_v43  ;;  %v7180_v44 = vpop.f32.mrf.mxu1 }
 0xc4a   :  { %v2540_v45 = vadd.f32 %v2538_v42, %v7799_v47 }
 0xc4c   :  { %v2544_v46 = vsel %vm413_vm3, %v2540_v45, -inf }
 0xc4d   :  { %2545 = vmax.xlane.f32.xlu1 %v2544_v46 }
 0xcd2   :  { %v2543_v48 = vpop.xlane.xlu0 %2542 }
 0xcd3   :  { %v2547_v49 = vsub.f32 %v2539_v40, %v2543_v48  ;;  %v6510_v40 = vld [vmem:[%s8668_s7 + $0x1] ss:$0 sm:$0xff] }
 0xcd5   :  { %v2549_v50 = vmul.f32 1.442695, %v2547_v49 }
 0xcd6   :  { %v2546_v52 = vpop.xlane.xlu1 %2545 }
 0xcd7   :  { %7550 = vpow2.f32 %v2549_v50  ;;  %v2548_v53 = vsub.f32 %v2540_v45, %v2546_v52  ;;  %v6511_v45 = vld [vmem:[%s8668_s7 + $0x2] ss:$0 sm:$0xff]  ;;  %v159_v50 = vld [vmem:[%s8666_s5 + $0x58] sm:$0xff]  ;;  %v158_v52 = vld [vmem:[%s8666_s5 + $0x50] sm:$0xff] }
 0xcd9   :  { %v2551_v54 = vmul.f32 1.442695, %v2548_v53  ;;  %v157_v53 = vld [vmem:[%s8666_s5 + $0x48] sm:$0xff] }
 0xcdb   :  { %7552 = vpow2.f32 %v2551_v54  ;;  %v156_v54 = vld [vmem:[%s8666_s5 + $0x40] sm:$0xff] }
 0xce4   :  { %v7551_v55 = vpop.eup %7550 }
 0xce5   :  { %v2553_v56 = vsel %vm413_vm3, %v7551_v55, 0.0 }
 0xce6   :  { %2554 = vadd.xlane.f32.xlu0 %v2553_v56  ;;  %v154_v56 = vld [vmem:[%s8666_s5 + $0x30] sm:$0xff] }
 0xce8   :  { %v7553_v57 = vpop.eup %7552 }
 0xce9   :  { %v2556_v58 = vsel %vm413_vm3, %v7553_v57, 0.0 }
 0xcea   :  { %2557 = vadd.xlane.f32.xlu1 %v2556_v58  ;;  %v152_v58 = vld [vmem:[%s8666_s5 + $0x20] sm:$0xff] }
 0xd6f   :  { %v2555_v59 = vpop.xlane.xlu0 %2554 }
 0xd70   :  { %7554 = vrcp.f32 %v2555_v59  ;;  %v6512_v59 = vld [vmem:[%s8668_s7 + $0x3] ss:$0 sm:$0xff] }
 0xd73   :  { %v2558_v60 = vpop.xlane.xlu1 %2557 }
 0xd74   :  { %7556 = vrcp.f32 %v2558_v60 }
 0xd7d   :  { %v7555_v61 = vpop.eup %7554 }
 0xd7e   :  { %v2561_v62 = vmul.f32 %v7555_v61, %v7551_v55  ;;  %v155_v55 = vld [vmem:[%s8666_s5 + $0x38] sm:$0xff] }
 0xd80   :  { %7184 = vmatmul.mubr.msk.f32.vlgmr.msra.gmra.mxu0 %vm413_vm3, %v2561_v62 }
 0xd81   :  { %v7557_v63 = vpop.eup %7556  ;;  %7192 = vmatpush3.msra.mxu0 %v151_v1 }
 0xd82   :  { %v2562_v0 = vmul.f32 %v7557_v63, %v7553_v57  ;;  %7207 = vmatprep.subr.mxu0 %v159_v50  ;;  %v153_v57 = vld [vmem:[%s8666_s5 + $0x28] sm:$0xff] }
 0xd84   :  { %7189 = vmatmul.mubr.msk.f32.vlgmr.msra.gmra.mxu1 %vm413_vm3, %v2562_v0 }
 0xe40   :  { %v2632_v2 = vpop.f32.mrf.mxu0 }
 0xe41   :  { %7193 = vmatprep.mubr.msk.f32.mxu0 %vm413_vm3, %v2632_v2 }
 0xe42   :  { %v7185_v3 = vpop.f32.mrf.mxu0 }
 0xe44   :  { %v2705_v4 = vpop.f32.mrf.mxu1 }
 0xe45   :  { %7194 = vmatmul.mubr.msk.f32.vlgmr.msra.gmra.mxu0 %vm413_vm3, %v2705_v4 }
 0xe46   :  { %v7190_v5 = vpop.f32.mrf.mxu1  ;;  %7208 = vmatpush3.msra.mxu0 %v159_v50 }
 0xe47   :  { %7209 = vmatprep.subr.mxu0 %v158_v52 }
 0xe48   :  { %7210 = vmatpush3.msra.mxu0 %v158_v52 }
 0xe49   :  { %7211 = vmatprep.subr.mxu0 %v157_v53 }
 0xe4a   :  { %7212 = vmatpush3.msra.mxu0 %v157_v53 }
 0xe4b   :  { %7213 = vmatprep.subr.mxu0 %v156_v54 }
 0xe4c   :  { %7214 = vmatpush3.msra.mxu0 %v156_v54 }
 0xe4d   :  { %7215 = vmatprep.subr.mxu0 %v155_v55 }
 0xe4e   :  { %7216 = vmatpush3.msra.mxu0 %v155_v55 }
 0xe4f   :  { %7217 = vmatprep.subr.mxu0 %v154_v56 }
 0xe50   :  { %7218 = vmatpush3.msra.mxu0 %v154_v56 }
 0xe51   :  { %7219 = vmatprep.subr.mxu0 %v153_v57 }
 0xe52   :  { %7220 = vmatpush3.msra.mxu0 %v153_v57  ;;  %v6517_v57 = vld [vmem:[%s8668_s7 + $0x4] ss:$0 sm:$0xff] }
 0xe53   :  { %7221 = vmatprep.subr.mxu0 %v152_v58 }
 0xe54   :  { %7222 = vmatpush3.msra.mxu0 %v152_v58 }
 0xf05   :  { %v7195_v6 = vpop.f32.mrf.mxu0 }
 0xf06   :  { %v2791_v8 = vadd.f32 %v7195_v6, %v8045_v32 }
 0xf07   :  { %v2781_v9 = vpop.f32.mrf.mxu0 }
 0xf08   :  { %v2798_v10 = vadd.f32 %v6509_v7, %v2791_v8  ;;  %v2790_v11 = vadd.f32 %v2781_v9, %v8047_v35  ;;  %v2843_v35 = vld [vmem:[%s8667_s6 + $0x8] sm:$0xff] }
 0xf0a   :  { %v2797_v12 = vadd.f32 %v6509_v7, %v2790_v11  ;;  %v2800_v13 = vadd.f32 %v2798_v10, %v7753_v17 }
 0xf0c   :  { %v2806_v14 = vsel %vm181_vm1, %v2800_v13, 0.0  ;;  %v2799_v15 = vadd.f32 %v2797_v12, %v7751_v16  ;;  %v2845_v16 = vld [vmem:[%s8667_s6 + $0x18] sm:$0xff] }
 0xf0d   :  { %2807 = vadd.xlane.f32.xlu1 %v2806_v14  ;;  %7196 = vmatprep.subr.mxu1 %v2845_v16 }
 0xf0e   :  { %v2803_v19 = vsel %vm181_vm1, %v2799_v15, 0.0  ;;  %7197 = vmatpush3.msra.mxu1 %v2845_v16 }
 0xf0f   :  { %2804 = vadd.xlane.f32.xlu0 %v2803_v19  ;;  %7198 = vmatprep.subr.mxu1 %v2844_v34 }
 0xf10   :  { %7199 = vmatpush3.msra.mxu1 %v2844_v34 }
 0xf11   :  { %7200 = vmatprep.subr.mxu1 %v2843_v35 }
 0xf12   :  { %7201 = vmatpush3.msra.mxu1 %v2843_v35 }
 0xf13   :  { %7202 = vmatprep.subr.mxu1 %v2842_v36 }
 0xf14   :  { %7203 = vmatpush3.msra.mxu1 %v2842_v36 }
 0xf96   :  { %v2808_v20 = vpop.xlane.xlu1 %2807 }
 0xf97   :  { %v2811_v23 = vmul.f32 0.03125, %v2808_v20 }
 0xf98   :  { %v2805_v24 = vpop.xlane.xlu0 %2804 }
 0xf99   :  { %v2813_v25 = vsub.f32 %v2800_v13, %v2811_v23  ;;  %v2810_v26 = vmul.f32 0.03125, %v2805_v24 }
 0xf9b   :  { %v2812_v29 = vsub.f32 %v2799_v15, %v2810_v26  ;;  %v2815_v30 = vmul.f32 %v2813_v25, %v2813_v25 }
 0xf9d   :  { %v2819_v31 = vsel %vm181_vm1, %v2815_v30, 0.0  ;;  %v2814_v32 = vmul.f32 %v2812_v29, %v2812_v29 }
 0xf9e   :  { %2820 = vadd.xlane.f32.xlu1 %v2819_v31 }
 0xf9f   :  { %v2816_v17 = vsel %vm181_vm1, %v2814_v32, 0.0 }
 0xfa0   :  { %2817 = vadd.xlane.f32.xlu0 %v2816_v17 }
0x1027   :  { %v2821_v37 = vpop.xlane.xlu1 %2820 }
0x1028   :  { %v2823_v38 = vmul.f32 0.03125, %v2821_v37 }
0x1029   :  { %v2818_v39 = vpop.xlane.xlu0 %2817 }
0x102a   :  { %v2825_v18 = vadd.f32 1e-12, %v2823_v38  ;;  %v2822_v22 = vmul.f32 0.03125, %v2818_v39 }
0x102c   :  { %7558 = vrsqrt.f32 %v2825_v18  ;;  %v2824_v27 = vadd.f32 1e-12, %v2822_v22 }
0x102e   :  { %7560 = vrsqrt.f32 %v2824_v27 }
0x1039   :  { %v7559_v28 = vpop.eup %7558 }
0x103a   :  { %v2829_v41 = vmul.f32 %v7559_v28, %v2813_v25 }
0x103b   :  { %v7561_v42 = vpop.eup %7560 }
0x103c   :  { %v2828_v43 = vmul.f32 %v7561_v42, %v2812_v29  ;;  %v2835_v44 = vmul.f32 %v6510_v40, %v2829_v41 }
0x103e   :  { %v2834_v46 = vmul.f32 %v6510_v40, %v2828_v43  ;;  %v8106_v49 = vadd.f32 %v6511_v45, %v2835_v44  ;;  %v7657_v40 = vmov -1.0  }
0x1040   :  { %v8104_v48 = vadd.f32 %v6511_v45, %v2834_v46 }
0x1042   :  { %7204 = vmatprep.mubr.msk.f32.mxu1 %vm181_vm1, %v8104_v48 }
0x1043   :  { %7205 = vmatmul.mubr.msk.f32.vlgmr.msra.gmra.mxu1 %vm181_vm1, %v8106_v49 }
0x1103   :  { %v7206_v60 = vpop.f32.mrf.mxu1 }
0x1104   :  { %v2929_v61 = vadd.f32 %v7206_v60, %v6512_v59 }
0x1105   :  { %v2923_v62 = vpop.f32.mrf.mxu1 }
0x1106   :  { %v2935_v63 = vmul.f32 0.70710677, %v2929_v61  ;;  %v2924_v0 = vadd.f32 %v6512_v59, %v2923_v62  ;;  %v2933_v54 = vmul.f32 0.5, %v2929_v61 }
0x1108   :  { %v2941_v1 = vand.u32 2147483647, %v2935_v63  ;;  %v2934_v2 = vmul.f32 0.70710677, %v2924_v0  ;;  %vm2937_vm4 = vcmp.ge.f32.partialorder %v2935_v63, 0.0  ;;  %v2932_v52 = vmul.f32 0.5, %v2924_v0 }
0x1109   :  { %v2939_v41 = vsel %vm2937_vm4, 1.0, %v7657_v40 }
0x110a   :  { %v2943_v3 = vmul.f32 0.3275911, %v2941_v1  ;;  %v2940_v4 = vand.u32 2147483647, %v2934_v2  ;;  %v2967_v8 = vsub.f32 0.0, %v2941_v1  ;;  %vm2936_vm5 = vcmp.ge.f32.partialorder %v2934_v2, 0.0 }
0x110b   :  { %v2938_v45 = vsel %vm2936_vm5, 1.0, %v7657_v40 }
0x110c   :  { %v2945_v5 = vadd.f32 1.0, %v2943_v3  ;;  %v2942_v6 = vmul.f32 0.3275911, %v2940_v4  ;;  %v2966_v9 = vsub.f32 0.0, %v2940_v4  ;;  %v2969_v10 = vmul.f32 %v2967_v8, %v2941_v1 }
0x110e   :  { %7562 = vrcp.f32 %v2945_v5  ;;  %v2944_v7 = vadd.f32 1.0, %v2942_v6  ;;  %v2968_v12 = vmul.f32 %v2966_v9, %v2940_v4  ;;  %v2972_v14 = vmul.f32 1.442695, %v2969_v10 }
0x1110   :  { %7564 = vrcp.f32 %v2944_v7  ;;  %v2970_v23 = vmul.f32 1.442695, %v2968_v12  ;;  %v6534_v12 = vld [vmem:[%s8664_s3 + $0x190] sm:$0xff] }
0x1111   :  { %7566 = vpow2.f32 %v2972_v14  ;;  %v6533_v14 = vld [vmem:[%s8664_s3 + $0x188] sm:$0xff] }
0x1112   :  { %7568 = vpow2.f32 %v2970_v23  ;;  %v6539_v23 = vld [vmem:[%s8664_s3 + $0x218] sm:$0xff] }
0x111b   :  { %v7563_v11 = vpop.eup %7562 }
0x111c   :  { %v2949_v13 = vmul.f32 1.0614054, %v7563_v11 }
0x111d   :  { %v7565_v15 = vpop.eup %7564 }
0x111e   :  { %v2951_v19 = vadd.f32 -1.4531521, %v2949_v13  ;;  %v2948_v20 = vmul.f32 1.0614054, %v7565_v15  ;;  %v7567_v38 = vpop.eup %7566  ;;  %v6542_v13 = vld [vmem:[%s8664_s3 + $0x290] sm:$0xff] }
0x111f   :  { %v7569_v27 = vpop.eup %7568 }
0x1120   :  { %v2953_v24 = vmul.f32 %v7563_v11, %v2951_v19  ;;  %v2950_v25 = vadd.f32 -1.4531521, %v2948_v20  ;;  %v6532_v19 = vld [vmem:[%s8664_s3 + $0x180] sm:$0xff] }
0x1121   :  { %v6540_v20 = vld [vmem:[%s8664_s3 + $0x280] sm:$0xff] }
0x1122   :  { %v2955_v26 = vadd.f32 1.4214138, %v2953_v24  ;;  %v2952_v29 = vmul.f32 %v7565_v15, %v2950_v25 }
0x1124   :  { %v2957_v30 = vmul.f32 %v7563_v11, %v2955_v26  ;;  %v2954_v31 = vadd.f32 1.4214138, %v2952_v29 }
0x1126   :  { %v2959_v32 = vadd.f32 -0.28449672, %v2957_v30  ;;  %v2956_v17 = vmul.f32 %v7565_v15, %v2954_v31 }
0x1128   :  { %v2961_v16 = vmul.f32 %v7563_v11, %v2959_v32  ;;  %v2958_v34 = vadd.f32 -0.28449672, %v2956_v17  ;;  %v6518_v17 = vld [vmem:[%s8668_s7 + $0x5] ss:$0 sm:$0xff] }
0x112a   :  { %v2963_v35 = vadd.f32 0.2548296, %v2961_v16  ;;  %v2960_v36 = vmul.f32 %v7565_v15, %v2958_v34 }
0x112c   :  { %v2965_v37 = vmul.f32 %v7563_v11, %v2963_v35  ;;  %v2962_v39 = vadd.f32 0.2548296, %v2960_v36  ;;  %v6543_v11 = vld [vmem:[%s8664_s3 + $0x298] sm:$0xff] }
0x112d   :  { %7248 = vmatprep.subr.mxu0 %v6543_v11 }
0x112e   :  { %v2975_v18 = vmul.f32 %v7567_v38, %v2965_v37  ;;  %v2964_v22 = vmul.f32 %v7565_v15, %v2962_v39  ;;  %v6541_v15 = vld [vmem:[%s8664_s3 + $0x288] sm:$0xff]  ;;  %v6519_v37 = vld [vmem:[%s8668_s7 + $0x6] ss:$0 sm:$0xff] }
0x1130   :  { %v2977_v28 = vsub.f32 1.0, %v2975_v18  ;;  %v2974_v42 = vmul.f32 %v7569_v27, %v2964_v22  ;;  %v6538_v22 = vld [vmem:[%s8664_s3 + $0x210] sm:$0xff]  ;;  %v6537_v27 = vld [vmem:[%s8664_s3 + $0x208] sm:$0xff] }
0x1132   :  { %v2979_v43 = vmul.f32 %v2977_v28, %v2939_v41  ;;  %v2976_v44 = vsub.f32 1.0, %v2974_v42  ;;  %v6536_v28 = vld [vmem:[%s8664_s3 + $0x200] sm:$0xff] }
0x1134   :  { %v2978_v46 = vmul.f32 %v2976_v44, %v2938_v45  ;;  %v2981_v50 = vadd.f32 1.0, %v2979_v43  ;;  %v6545_v43 = vld [vmem:[%s8665_s4 + $0x4] ss:$0 sm:$0xff] }
0x1136   :  { %v2980_v53 = vadd.f32 1.0, %v2978_v46  ;;  %v2983_v56 = vmul.f32 %v2981_v50, %v2933_v54 }
0x1138   :  { %v2982_v55 = vmul.f32 %v2980_v53, %v2932_v52 }
0x113a   :  { %7223 = vmatprep.mubr.msk.f32.mxu0 %vm2984_vm6, %v2982_v55 }
0x113b   :  { %7224 = vmatmul.mubr.msk.f32.vlgmr.msra.gmra.mxu0 %vm2984_vm6, %v2983_v56 }
0x113c   :  { %7249 = vmatpush3.msra.mxu0 %v6543_v11 }
0x113d   :  { %7250 = vmatprep.subr.mxu0 %v6542_v13 }
0x113e   :  { %7251 = vmatpush3.msra.mxu0 %v6542_v13 }
0x113f   :  { %7252 = vmatprep.subr.mxu0 %v6541_v15 }
0x1140   :  { %7253 = vmatpush3.msra.mxu0 %v6541_v15  ;;  %v6564_v15 = vld [vmem:[%s8664_s3 + $0x230] sm:$0xff] }
0x1141   :  { %7254 = vmatprep.subr.mxu0 %v6540_v20 }
0x1142   :  { %7255 = vmatpush3.msra.mxu0 %v6540_v20  ;;  %v6560_v20 = vld [vmem:[%s8664_s3 + $0x1b0] sm:$0xff] }
0x1143   :  { %7264 = vmatprep.subr.mxu0 %v7654_v21 }
0x11fb   :  { %v7225_v58 = vpop.f32.mrf.mxu0 }
0x11fc   :  { %v3072_v59 = vadd.f32 %v7225_v58, %v6517_v57 }
0x11fd   :  { %v3057_v60 = vpop.f32.mrf.mxu0 }
0x11fe   :  { %v3071_v62 = vadd.f32 %v6517_v57, %v3057_v60  ;;  %v3074_v63 = vadd.f32 %v3072_v59, %v8106_v49 }
0x1200   :  { %v3080_v0 = vsel %vm181_vm1, %v3074_v63, 0.0  ;;  %v3073_v61 = vadd.f32 %v3071_v62, %v8104_v48  ;;  %v6535_v48 = vld [vmem:[%s8664_s3 + $0x198] sm:$0xff] }
0x1201   :  { %3081 = vadd.xlane.f32.xlu1 %v3080_v0  ;;  %7226 = vmatprep.subr.mxu1 %v6535_v48 }
0x1202   :  { %v3077_v1 = vsel %vm181_vm1, %v3073_v61, 0.0  ;;  %7227 = vmatpush3.msra.mxu1 %v6535_v48 }
0x1203   :  { %3078 = vadd.xlane.f32.xlu0 %v3077_v1  ;;  %7228 = vmatprep.subr.mxu1 %v6534_v12 }
0x1204   :  { %7229 = vmatpush3.msra.mxu1 %v6534_v12 }
0x1205   :  { %7230 = vmatprep.subr.mxu1 %v6533_v14 }
0x1206   :  { %7231 = vmatpush3.msra.mxu1 %v6533_v14 }
0x1207   :  { %7232 = vmatprep.subr.mxu1 %v6532_v19 }
0x1208   :  { %7233 = vmatpush3.msra.mxu1 %v6532_v19 }
0x1209   :  { %7237 = vmatprep.subr.mxu1 %v6539_v23 }
0x128a   :  { %v3082_v2 = vpop.xlane.xlu1 %3081 }
0x128b   :  { %v3084_v3 = vmul.f32 0.03125, %v3082_v2 }
0x128c   :  { %v3079_v4 = vpop.xlane.xlu0 %3078 }
0x128d   :  { %v3086_v5 = vsub.f32 %v3074_v63, %v3084_v3  ;;  %v3083_v6 = vmul.f32 0.03125, %v3079_v4 }
0x128f   :  { %v3085_v7 = vsub.f32 %v3073_v61, %v3083_v6  ;;  %v3088_v8 = vmul.f32 %v3086_v5, %v3086_v5 }
0x1291   :  { %v3092_v9 = vsel %vm181_vm1, %v3088_v8, 0.0  ;;  %v3087_v10 = vmul.f32 %v3085_v7, %v3085_v7 }
0x1292   :  { %3093 = vadd.xlane.f32.xlu1 %v3092_v9 }
0x1293   :  { %v3089_v49 = vsel %vm181_vm1, %v3087_v10, 0.0  ;;  %v6565_v10 = vld [vmem:[%s8664_s3 + $0x238] sm:$0xff] }
0x1294   :  { %3090 = vadd.xlane.f32.xlu0 %v3089_v49  ;;  %v6561_v49 = vld [vmem:[%s8664_s3 + $0x1b8] sm:$0xff] }
0x131b   :  { %v3094_v24 = vpop.xlane.xlu1 %3093 }
0x131c   :  { %v3096_v25 = vmul.f32 0.03125, %v3094_v24  ;;  %v6559_v24 = vld [vmem:[%s8664_s3 + $0x1a8] sm:$0xff] }
0x131d   :  { %v3091_v26 = vpop.xlane.xlu0 %3090 }
0x131e   :  { %v3098_v29 = vadd.f32 1e-12, %v3096_v25  ;;  %v3095_v30 = vmul.f32 0.03125, %v3091_v26  ;;  %v6562_v25 = vld [vmem:[%s8664_s3 + $0x220] sm:$0xff] }
0x131f   :  { %v6558_v26 = vld [vmem:[%s8664_s3 + $0x1a0] sm:$0xff] }
0x1320   :  { %7570 = vrsqrt.f32 %v3098_v29  ;;  %v3097_v31 = vadd.f32 1e-12, %v3095_v30  ;;  %v6569_v29 = vld [vmem:[%s8664_s3 + $0x2b8] sm:$0xff]  ;;  %v6568_v30 = vld [vmem:[%s8664_s3 + $0x2b0] sm:$0xff] }
0x1322   :  { %7572 = vrsqrt.f32 %v3097_v31  ;;  %v6567_v31 = vld [vmem:[%s8664_s3 + $0x2a8] sm:$0xff] }
0x132d   :  { %v7571_v32 = vpop.eup %7570 }
0x132e   :  { %v3102_v16 = vmul.f32 %v7571_v32, %v3086_v5  ;;  %v6566_v32 = vld [vmem:[%s8664_s3 + $0x2a0] sm:$0xff] }
0x132f   :  { %v7573_v34 = vpop.eup %7572 }
0x1330   :  { %v3101_v35 = vmul.f32 %v7573_v34, %v3085_v7  ;;  %v3108_v36 = vmul.f32 %v6518_v17, %v3102_v16 }
0x1332   :  { %v3107_v38 = vmul.f32 %v6518_v17, %v3101_v35  ;;  %v8188_v18 = vadd.f32 %v6519_v37, %v3108_v36 }
0x1334   :  { %v8186_v39 = vadd.f32 %v6519_v37, %v3107_v38 }
0x1336   :  { %7234 = vmatprep.mubr.msk.f32.mxu1 %vm181_vm1, %v8186_v39  ;;  %7256 = vmatprep.mubr.msk.f32.mxu0 %vm181_vm1, %v8186_v39 }
0x1337   :  { %7235 = vmatmul.mubr.msk.f32.vlgmr.msra.gmra.mxu1 %vm181_vm1, %v8188_v18  ;;  %7257 = vmatmul.mubr.msk.f32.vlgmr.msra.gmra.mxu0 %vm181_vm1, %v8188_v18 }
0x1338   :  { %7238 = vmatpush3.msra.mxu1 %v6539_v23  ;;  %7245 = vmatprep.mubr.msk.f32.mxu1 %vm181_vm1, %v8186_v39  ;;  %v6563_v23 = vld [vmem:[%s8664_s3 + $0x228] sm:$0xff] }
0x1339   :  { %7239 = vmatprep.subr.mxu1 %v6538_v22  ;;  %7266 = vmatprep.mubr.msk.f32.mxu0 %vm7655_vm2, %v7654_v21 }
0x133a   :  { %7240 = vmatpush3.msra.mxu1 %v6538_v22  ;;  %v6571_v22 = vld [vmem:[%s8665_s4 + $0x5] ss:$0 sm:$0xff] }
0x133b   :  { %7241 = vmatprep.subr.mxu1 %v6537_v27 }
0x133c   :  { %7242 = vmatpush3.msra.mxu1 %v6537_v27 }
0x133d   :  { %7243 = vmatprep.subr.mxu1 %v6536_v28 }
0x133e   :  { %7244 = vmatpush3.msra.mxu1 %v6536_v28 }
0x133f   :  { %7246 = vmatmul.mubr.msk.f32.vlgmr.msra.gmra.mxu1 %vm181_vm1, %v8188_v18  ;;  %7259 = vmatprep.subr.mxu1 %v7654_v21 }
0x1340   :  { %7261 = vmatprep.mubr.msk.f32.mxu1 %vm7655_vm2, %v7654_v21 }
0x13f7   :  { %v7236_v41 = vpop.f32.mrf.mxu1  ;;  %v7258_v46 = vpop.f32.mrf.mxu0 }
0x13f8   :  { %v3229_v45 = vadd.f32 %v7236_v41, %v6545_v43 }
0x13f9   :  { %v3223_v42 = vpop.f32.mrf.mxu1  ;;  %v3373_v53 = vpop.f32.mrf.mxu0 }
0x13fa   :  { %v3224_v52 = vadd.f32 %v6545_v43, %v3223_v42 }
0x13ff   :  { %v7247_v44 = vpop.f32.mrf.mxu1 }
0x1400   :  { %7265 = vmatpush3.xpose.msk.msra.mxu0 %vm413_vm3, %v7247_v44 }
0x1401   :  { %v3298_v50 = vpop.f32.mrf.mxu1  ;;  %7274 = vmatprep.subr.mxu0 %v7654_v21 }
0x1402   :  { %7260 = vmatpush3.xpose.msk.msra.mxu1 %vm413_vm3, %v3298_v50 }
0x1403   :  { %7267 = vmatmul.mubr.msk.f32.vlgmr.msra.gmra.mxu0 %vm413_vm3, %v3229_v45  ;;  %7269 = vmatprep.subr.mxu1 %v7654_v21 }
0x1404   :  { %7275 = vmatpush3.msra.mxu0 %v7258_v46  ;;  %7276 = vmatprep.mubr.msk.f32.mxu0 %vm7655_vm2, %v7654_v21 }
0x1405   :  { %7262 = vmatmul.mubr.msk.f32.vlgmr.msra.gmra.mxu1 %vm413_vm3, %v3224_v52  ;;  %7290 = vmatprep.subr.mxu0 %v6565_v10 }
0x1406   :  { %7270 = vmatpush3.msra.mxu1 %v3373_v53  ;;  %7271 = vmatprep.mubr.msk.f32.mxu1 %vm7655_vm2, %v7654_v21 }
0x1407   :  { %7279 = vmatprep.subr.mxu1 %v6561_v49 }
0x14c3   :  { %v3530_v54 = vpop.f32.mrf.mxu0 }
0x14c4   :  { %v3535_v55 = vmul.f32 0.35355338, %v3530_v54 }
0x14c5   :  { %v3454_v56 = vpop.f32.mrf.mxu1  ;;  %v7268_v57 = vpop.f32.mrf.mxu0 }
0x14c6   :  { %v3534_v58 = vmul.f32 0.35355338, %v3454_v56  ;;  %v3537_v59 = vadd.f32 %v3535_v55, %v7799_v47 }
0x14c7   :  { %v7263_v60 = vpop.f32.mrf.mxu1 }
0x14c8   :  { %v3541_v62 = vsel %vm413_vm3, %v3537_v59, -inf  ;;  %v3536_v63 = vadd.f32 %v3534_v58, %v7801_v51 }
0x14c9   :  { %3542 = vmax.xlane.f32.xlu0 %v3541_v62 }
0x14ca   :  { %v3538_v0 = vsel %vm413_vm3, %v3536_v63, -inf }
0x14cb   :  { %3539 = vmax.xlane.f32.xlu1 %v3538_v0 }
0x1552   :  { %v3543_v61 = vpop.xlane.xlu0 %3542 }
0x1553   :  { %v3545_v1 = vsub.f32 %v3537_v59, %v3543_v61 }
0x1554   :  { %v3540_v2 = vpop.xlane.xlu1 %3539 }
0x1555   :  { %v3548_v3 = vmul.f32 1.442695, %v3545_v1  ;;  %v3544_v4 = vsub.f32 %v3536_v63, %v3540_v2 }
0x1557   :  { %7574 = vpow2.f32 %v3548_v3  ;;  %v3546_v5 = vmul.f32 1.442695, %v3544_v4  ;;  %v6520_v4 = vld [vmem:[%s8666_s5 + $0x60] sm:$0xff] }
0x1559   :  { %7576 = vpow2.f32 %v3546_v5 }
0x1564   :  { %v7575_v6 = vpop.eup %7574 }
0x1565   :  { %v3553_v7 = vsel %vm413_vm3, %v7575_v6, 0.0 }
0x1566   :  { %v7577_v8 = vpop.eup %7576  ;;  %3554 = vadd.xlane.f32.xlu0 %v3553_v7 }
0x1567   :  { %v3550_v9 = vsel %vm413_vm3, %v7577_v8, 0.0 }
0x1568   :  { %3551 = vadd.xlane.f32.xlu1 %v3550_v9 }
0x15ef   :  { %v3555_v48 = vpop.xlane.xlu0 %3554 }
0x15f0   :  { %7578 = vrcp.f32 %v3555_v48  ;;  %v6594_v48 = vld [vmem:[%s8664_s3 + $0x250] sm:$0xff] }
0x15f1   :  { %v3552_v11 = vpop.xlane.xlu1 %3551 }
0x15f2   :  { %7580 = vrcp.f32 %v3552_v11  ;;  %v6593_v11 = vld [vmem:[%s8664_s3 + $0x248] sm:$0xff] }
0x15fd   :  { %v7579_v12 = vpop.eup %7578 }
0x15fe   :  { %v3559_v13 = vmul.f32 %v7579_v12, %v7575_v6  ;;  %v6592_v12 = vld [vmem:[%s8664_s3 + $0x240] sm:$0xff] }
0x15ff   :  { %v7581_v14 = vpop.eup %7580 }
0x1600   :  { %7277 = vmatmul.mubr.msk.f32.vlgmr.msra.gmra.mxu0 %vm413_vm3, %v3559_v13  ;;  %v3558_v19 = vmul.f32 %v7581_v14, %v7577_v8  ;;  %v6521_v13 = vld [vmem:[%s8666_s5 + $0x68] sm:$0xff]  ;;  %v6591_v14 = vld [vmem:[%s8664_s3 + $0x1d8] sm:$0xff] }
0x1601   :  { %7291 = vmatpush3.msra.mxu0 %v6565_v10  ;;  %7298 = vmatprep.mubr.msk.f32.mxu0 %vm181_vm1, %v8186_v39 }
0x1602   :  { %7292 = vmatprep.subr.mxu0 %v6564_v15  ;;  %7272 = vmatmul.mubr.msk.f32.vlgmr.msra.gmra.mxu1 %vm413_vm3, %v3558_v19 }
0x1603   :  { %7280 = vmatpush3.msra.mxu1 %v6561_v49  ;;  %7293 = vmatpush3.msra.mxu0 %v6564_v15  ;;  %v6595_v49 = vld [vmem:[%s8664_s3 + $0x258] sm:$0xff] }
0x1604   :  { %7281 = vmatprep.subr.mxu1 %v6560_v20  ;;  %7287 = vmatprep.mubr.msk.f32.mxu1 %vm181_vm1, %v8186_v39 }
0x1605   :  { %7294 = vmatprep.subr.mxu0 %v6563_v23  ;;  %7282 = vmatpush3.msra.mxu1 %v6560_v20 }
0x1606   :  { %7295 = vmatpush3.msra.mxu0 %v6563_v23  ;;  %7283 = vmatprep.subr.mxu1 %v6559_v24  ;;  %v6590_v23 = vld [vmem:[%s8664_s3 + $0x1d0] sm:$0xff] }
0x1607   :  { %7296 = vmatprep.subr.mxu0 %v6562_v25  ;;  %7284 = vmatpush3.msra.mxu1 %v6559_v24 }
0x1608   :  { %7297 = vmatpush3.msra.mxu0 %v6562_v25  ;;  %7285 = vmatprep.subr.mxu1 %v6558_v26  ;;  %v6589_v25 = vld [vmem:[%s8664_s3 + $0x1c8] sm:$0xff] }
0x1609   :  { %7299 = vmatmul.mubr.msk.f32.vlgmr.msra.gmra.mxu0 %vm181_vm1, %v8188_v18  ;;  %7286 = vmatpush3.msra.mxu1 %v6558_v26  ;;  %v6588_v26 = vld [vmem:[%s8664_s3 + $0x1c0] sm:$0xff] }
0x160a   :  { %7288 = vmatmul.mubr.msk.f32.vlgmr.msra.gmra.mxu1 %vm181_vm1, %v8188_v18  ;;  %7301 = vmatprep.subr.mxu1 %v6569_v29 }
0x160b   :  { %7302 = vmatpush3.msra.mxu1 %v6569_v29  ;;  %7309 = vmatprep.mubr.msk.f32.mxu1 %vm181_vm1, %v8186_v39 }
0x160c   :  { %7303 = vmatprep.subr.mxu1 %v6568_v30  ;;  %7312 = vmatprep.subr.mxu0 %v7654_v21 }
0x160d   :  { %7304 = vmatpush3.msra.mxu1 %v6568_v30  ;;  %7314 = vmatprep.mubr.msk.f32.mxu0 %vm7655_vm2, %v7654_v21  ;;  %v6599_v30 = vld [vmem:[%s8664_s3 + $0x2d8] sm:$0xff] }
0x160e   :  { %7305 = vmatprep.subr.mxu1 %v6567_v31 }
0x160f   :  { %7306 = vmatpush3.msra.mxu1 %v6567_v31  ;;  %v6598_v31 = vld [vmem:[%s8664_s3 + $0x2d0] sm:$0xff] }
0x1610   :  { %7307 = vmatprep.subr.mxu1 %v6566_v32 }
0x1611   :  { %7308 = vmatpush3.msra.mxu1 %v6566_v32 }
0x1612   :  { %7310 = vmatmul.mubr.msk.f32.vlgmr.msra.gmra.mxu1 %vm181_vm1, %v8188_v18  ;;  %7322 = vmatprep.subr.mxu1 %v7654_v21 }
0x1613   :  { %7324 = vmatprep.mubr.msk.f32.mxu1 %vm7655_vm2, %v7654_v21 }
0x16c0   :  { %v8291_v17 = vpop.f32.mrf.mxu0 }
0x16c2   :  { %v3629_v16 = vpop.f32.mrf.mxu1  ;;  %v7278_v34 = vpop.f32.mrf.mxu0 }
0x16c3   :  { %v6596_v34 = vld [vmem:[%s8664_s3 + $0x2c0] sm:$0xff] }
0x16c4   :  { %v7273_v35 = vpop.f32.mrf.mxu1 }
0x16c9   :  { %v7300_v36 = vpop.f32.mrf.mxu0 }
0x16ca   :  { %v7289_v37 = vpop.f32.mrf.mxu1 }
0x16cb   :  { %v3870_v38 = vpop.f32.mrf.mxu0  ;;  %v3801_v41 = vadd.f32 %v7289_v37, %v6571_v22 }
0x16cc   :  { %7313 = vmatpush3.xpose.msk.msra.mxu0 %vm413_vm3, %v3870_v38  ;;  %v3795_v27 = vpop.f32.mrf.mxu1 }
0x16cd   :  { %v3796_v28 = vadd.f32 %v6571_v22, %v3795_v27  ;;  %7317 = vmatprep.subr.mxu0 %v7654_v21  ;;  %v6601_v22 = vld [vmem:[%s8665_s4 + $0x6] ss:$0 sm:$0xff] }
0x16cf   :  { %7315 = vmatmul.mubr.msk.f32.vlgmr.msra.gmra.mxu0 %vm413_vm3, %v3796_v28 }
0x16d0   :  { %7318 = vmatpush3.xpose.msk.msra.mxu0 %vm413_vm3, %v7300_v36  ;;  %7319 = vmatprep.mubr.msk.f32.mxu0 %vm7655_vm2, %v7654_v21 }
0x16d1   :  { %7327 = vmatprep.subr.mxu0 %v7654_v21 }
0x16d2   :  { %v7311_v42 = vpop.f32.mrf.mxu1 }
0x16d3   :  { %7320 = vmatmul.mubr.msk.f32.vlgmr.msra.gmra.mxu0 %vm413_vm3, %v3801_v41 }
0x16d4   :  { %7328 = vmatpush3.msra.mxu0 %v7311_v42  ;;  %v3945_v43 = vpop.f32.mrf.mxu1  ;;  %7329 = vmatprep.mubr.msk.f32.mxu0 %vm7655_vm2, %v7654_v21 }
0x16d5   :  { %7323 = vmatpush3.msra.mxu1 %v3945_v43  ;;  %7337 = vmatprep.subr.mxu0 %v6520_v4 }
0x16d6   :  { %7332 = vmatprep.subr.mxu1 %v6521_v13 }
0x178f   :  { %v4026_v44 = vpop.f32.mrf.mxu0 }
0x1790   :  { %v4106_v45 = vmul.f32 0.35355338, %v4026_v44 }
0x1791   :  { %v7316_v46 = vpop.f32.mrf.mxu0 }
0x1792   :  { %v4108_v50 = vadd.f32 %v4106_v45, %v7801_v51 }
0x1793   :  { %v4102_v52 = vpop.f32.mrf.mxu0 }
0x1794   :  { %v4107_v53 = vmul.f32 0.35355338, %v4102_v52  ;;  %v4110_v54 = vsel %vm413_vm3, %v4108_v50, -inf }
0x1795   :  { %4111 = vmax.xlane.f32.xlu0 %v4110_v54  ;;  %v7321_v55 = vpop.f32.mrf.mxu0 }
0x1796   :  { %v4109_v56 = vadd.f32 %v4107_v53, %v7799_v47 }
0x1798   :  { %v4113_v57 = vsel %vm413_vm3, %v4109_v56, -inf }
0x1799   :  { %4114 = vmax.xlane.f32.xlu1 %v4113_v57 }
0x181e   :  { %v4112_v58 = vpop.xlane.xlu0 %4111 }
0x181f   :  { %v4116_v59 = vsub.f32 %v4108_v50, %v4112_v58 }
0x1821   :  { %v4118_v60 = vmul.f32 1.442695, %v4116_v59 }
0x1822   :  { %v4115_v62 = vpop.xlane.xlu1 %4114 }
0x1823   :  { %7582 = vpow2.f32 %v4118_v60  ;;  %v4117_v63 = vsub.f32 %v4109_v56, %v4115_v62 }
0x1825   :  { %v4120_v0 = vmul.f32 1.442695, %v4117_v63 }
0x1827   :  { %7584 = vpow2.f32 %v4120_v0 }
0x1830   :  { %v7583_v61 = vpop.eup %7582 }
0x1831   :  { %v4122_v1 = vsel %vm413_vm3, %v7583_v61, 0.0 }
0x1832   :  { %4123 = vadd.xlane.f32.xlu0 %v4122_v1 }
0x1834   :  { %v7585_v2 = vpop.eup %7584 }
0x1835   :  { %v4125_v3 = vsel %vm413_vm3, %v7585_v2, 0.0 }
0x1836   :  { %4126 = vadd.xlane.f32.xlu1 %v4125_v3 }
0x18bb   :  { %v4124_v5 = vpop.xlane.xlu0 %4123 }
0x18bc   :  { %7586 = vrcp.f32 %v4124_v5 }
0x18bf   :  { %v4127_v6 = vpop.xlane.xlu1 %4126 }
0x18c0   :  { %7588 = vrcp.f32 %v4127_v6 }
0x18c9   :  { %v7587_v7 = vpop.eup %7586 }
0x18ca   :  { %v4130_v8 = vmul.f32 %v7587_v7, %v7583_v61 }
0x18cc   :  { %7325 = vmatmul.mubr.msk.f32.vlgmr.msra.gmra.mxu1 %vm413_vm3, %v4130_v8 }
0x18cd   :  { %v7589_v9 = vpop.eup %7588  ;;  %7333 = vmatpush3.msra.mxu1 %v6521_v13  ;;  %v6626_v13 = vld [vmem:[%s8664_s3 + $0x2f0] sm:$0xff] }
0x18ce   :  { %v4131_v10 = vmul.f32 %v7589_v9, %v7585_v2  ;;  %7342 = vmatprep.subr.mxu1 %v6591_v14 }
0x18d0   :  { %7330 = vmatmul.mubr.msk.f32.vlgmr.msra.gmra.mxu0 %vm413_vm3, %v4131_v10 }
0x18d1   :  { %7339 = vmatprep.mubr.msk.f32.mxu0 %vm413_vm3, %v3629_v16  ;;  %7338 = vmatpush3.msra.mxu0 %v6520_v4  ;;  %v6619_v4 = vld [vmem:[%s8664_s3 + $0x1f8] sm:$0xff] }
0x18d2   :  { %7353 = vmatprep.subr.mxu0 %v6595_v49 }
0x18d4   :  { %7340 = vmatmul.mubr.msk.f32.vlgmr.msra.gmra.mxu0 %vm413_vm3, %v8291_v17  ;;  %v6597_v17 = vld [vmem:[%s8664_s3 + $0x2c8] sm:$0xff] }
0x18d5   :  { %7354 = vmatpush3.msra.mxu0 %v6595_v49  ;;  %7361 = vmatprep.mubr.msk.f32.mxu0 %vm181_vm1, %v8186_v39  ;;  %v6618_v49 = vld [vmem:[%s8664_s3 + $0x1f0] sm:$0xff] }
0x18d6   :  { %7355 = vmatprep.subr.mxu0 %v6594_v48 }
0x18d7   :  { %7356 = vmatpush3.msra.mxu0 %v6594_v48  ;;  %v6617_v48 = vld [vmem:[%s8664_s3 + $0x1e8] sm:$0xff] }
0x18d8   :  { %7357 = vmatprep.subr.mxu0 %v6593_v11 }
0x18d9   :  { %7358 = vmatpush3.msra.mxu0 %v6593_v11  ;;  %v6616_v11 = vld [vmem:[%s8664_s3 + $0x1e0] sm:$0xff] }
0x18da   :  { %7359 = vmatprep.subr.mxu0 %v6592_v12 }
0x18db   :  { %7360 = vmatpush3.msra.mxu0 %v6592_v12  ;;  %v6627_v12 = vld [vmem:[%s8664_s3 + $0x2f8] sm:$0xff] }
0x18dc   :  { %7362 = vmatmul.mubr.msk.f32.vlgmr.msra.gmra.mxu0 %vm181_vm1, %v8188_v18  ;;  %7375 = vmatprep.subr.mxu0 %v7654_v21 }
0x18dd   :  { %7377 = vmatprep.mubr.msk.f32.mxu0 %vm7655_vm2, %v7654_v21 }
0x198c   :  { %v4201_v15 = vpop.f32.mrf.mxu1 }
0x198d   :  { %7334 = vmatprep.mubr.msk.f32.mxu1 %vm413_vm3, %v4201_v15  ;;  %v6624_v15 = vld [vmem:[%s8664_s3 + $0x2e0] sm:$0xff] }
0x198e   :  { %v7326_v19 = vpop.f32.mrf.mxu1 }
0x198f   :  { %v6522_v19 = vld [vmem:[%s8666_s5 + $0x70] sm:$0xff] }
0x1990   :  { %v4274_v20 = vpop.f32.mrf.mxu0 }
0x1991   :  { %7335 = vmatmul.mubr.msk.f32.vlgmr.msra.gmra.mxu1 %vm413_vm3, %v4274_v20  ;;  %v6623_v20 = vld [vmem:[%s8664_s3 + $0x278] sm:$0xff] }
0x1992   :  { %7343 = vmatpush3.msra.mxu1 %v6591_v14  ;;  %v7331_v24 = vpop.f32.mrf.mxu0  ;;  %7350 = vmatprep.mubr.msk.f32.mxu1 %vm181_vm1, %v8186_v39  ;;  %v6625_v14 = vld [vmem:[%s8664_s3 + $0x2e8] sm:$0xff] }
0x1993   :  { %7344 = vmatprep.subr.mxu1 %v6590_v23 }
0x1994   :  { %7345 = vmatpush3.msra.mxu1 %v6590_v23  ;;  %v8358_v29 = vpop.f32.mrf.mxu0 }
0x1995   :  { %7346 = vmatprep.subr.mxu1 %v6589_v25 }
0x1996   :  { %7347 = vmatpush3.msra.mxu1 %v6589_v25  ;;  %v8368_v32 = vpop.f32.mrf.mxu0 }
0x1997   :  { %7348 = vmatprep.subr.mxu1 %v6588_v26 }
0x1998   :  { %7349 = vmatpush3.msra.mxu1 %v6588_v26  ;;  %v6622_v26 = vld [vmem:[%s8664_s3 + $0x270] sm:$0xff] }
0x1999   :  { %7351 = vmatmul.mubr.msk.f32.vlgmr.msra.gmra.mxu1 %vm181_vm1, %v8188_v18  ;;  %7364 = vmatprep.subr.mxu1 %v6599_v30 }
0x199a   :  { %7365 = vmatpush3.msra.mxu1 %v6599_v30  ;;  %7372 = vmatprep.mubr.msk.f32.mxu1 %vm181_vm1, %v8186_v39 }
0x199b   :  { %7366 = vmatprep.subr.mxu1 %v6598_v31 }
0x199c   :  { %v7363_v16 = vpop.f32.mrf.mxu0  ;;  %7367 = vmatpush3.msra.mxu1 %v6598_v31  ;;  %v6621_v31 = vld [vmem:[%s8664_s3 + $0x268] sm:$0xff] }
0x199d   :  { %7368 = vmatprep.subr.mxu1 %v6597_v17 }
0x199e   :  { %v4604_v35 = vpop.f32.mrf.mxu0  ;;  %7369 = vmatpush3.msra.mxu1 %v6597_v17  ;;  %v6620_v17 = vld [vmem:[%s8664_s3 + $0x260] sm:$0xff] }
0x199f   :  { %7370 = vmatprep.subr.mxu1 %v6596_v34  ;;  %7376 = vmatpush3.xpose.msk.msra.mxu0 %vm413_vm3, %v4604_v35 }
0x19a0   :  { %7371 = vmatpush3.msra.mxu1 %v6596_v34  ;;  %7380 = vmatprep.subr.mxu0 %v7654_v21 }
0x19a1   :  { %7373 = vmatmul.mubr.msk.f32.vlgmr.msra.gmra.mxu1 %vm181_vm1, %v8188_v18  ;;  %7385 = vmatprep.subr.mxu1 %v7654_v21 }
0x19a2   :  { %7387 = vmatprep.mubr.msk.f32.mxu1 %vm7655_vm2, %v7654_v21 }
0x1a51   :  { %v8385_v36 = vpop.f32.mrf.mxu1 }
0x1a53   :  { %v8387_v37 = vpop.f32.mrf.mxu1 }
0x1a59   :  { %v7352_v38 = vpop.f32.mrf.mxu1 }
0x1a5a   :  { %v4535_v41 = vadd.f32 %v7352_v38, %v6601_v22 }
0x1a5b   :  { %v4529_v27 = vpop.f32.mrf.mxu1 }
0x1a5c   :  { %v4530_v28 = vadd.f32 %v6601_v22, %v4529_v27  ;;  %v4437_v22 = vadd.f32 %v8358_v29, %v8385_v36 }
0x1a5e   :  { %7378 = vmatmul.mubr.msk.f32.vlgmr.msra.gmra.mxu0 %vm413_vm3, %v4530_v28  ;;  %v4432_v28 = vadd.f32 %v8368_v32, %v8387_v37 }
0x1a5f   :  { %7381 = vmatpush3.xpose.msk.msra.mxu0 %vm413_vm3, %v7363_v16  ;;  %7382 = vmatprep.mubr.msk.f32.mxu0 %vm7655_vm2, %v7654_v21 }
0x1a60   :  { %7390 = vmatprep.subr.mxu0 %v7654_v21 }
0x1a61   :  { %v7374_v42 = vpop.f32.mrf.mxu1 }
0x1a62   :  { %7383 = vmatmul.mubr.msk.f32.vlgmr.msra.gmra.mxu0 %vm413_vm3, %v4535_v41 }
0x1a63   :  { %7391 = vmatpush3.msra.mxu0 %v7374_v42  ;;  %v4679_v43 = vpop.f32.mrf.mxu1  ;;  %7392 = vmatprep.mubr.msk.f32.mxu0 %vm7655_vm2, %v7654_v21 }
0x1a64   :  { %7386 = vmatpush3.msra.mxu1 %v4679_v43  ;;  %7400 = vmatprep.subr.mxu0 %v6619_v4 }
0x1a65   :  { %7395 = vmatprep.subr.mxu1 %v6522_v19 }
0x1b1e   :  { %v4760_v44 = vpop.f32.mrf.mxu0 }
0x1b1f   :  { %v4840_v45 = vmul.f32 0.35355338, %v4760_v44 }
0x1b20   :  { %v7379_v46 = vpop.f32.mrf.mxu0 }
0x1b21   :  { %v4842_v50 = vadd.f32 %v4840_v45, %v7801_v51  ;;  %v6629_v46 = vld [vmem:[%s8665_s4 + $0x7] ss:$0 sm:$0xff] }
0x1b22   :  { %v4836_v52 = vpop.f32.mrf.mxu0 }
0x1b23   :  { %v4841_v53 = vmul.f32 0.35355338, %v4836_v52  ;;  %v4844_v54 = vsel %vm413_vm3, %v4842_v50, -inf }
0x1b24   :  { %4845 = vmax.xlane.f32.xlu0 %v4844_v54  ;;  %v7384_v55 = vpop.f32.mrf.mxu0 }
0x1b25   :  { %v4843_v56 = vadd.f32 %v4841_v53, %v7799_v47 }
0x1b27   :  { %v4847_v57 = vsel %vm413_vm3, %v4843_v56, -inf }
0x1b28   :  { %4848 = vmax.xlane.f32.xlu1 %v4847_v57 }
0x1bad   :  { %v4846_v58 = vpop.xlane.xlu0 %4845 }
0x1bae   :  { %v4850_v59 = vsub.f32 %v4842_v50, %v4846_v58 }
0x1bb0   :  { %v4852_v60 = vmul.f32 1.442695, %v4850_v59 }
0x1bb1   :  { %v4849_v62 = vpop.xlane.xlu1 %4848 }
0x1bb2   :  { %7590 = vpow2.f32 %v4852_v60  ;;  %v4851_v63 = vsub.f32 %v4843_v56, %v4849_v62 }
0x1bb4   :  { %v4854_v0 = vmul.f32 1.442695, %v4851_v63 }
0x1bb6   :  { %7592 = vpow2.f32 %v4854_v0 }
0x1bbf   :  { %v7591_v61 = vpop.eup %7590 }
0x1bc0   :  { %v4856_v1 = vsel %vm413_vm3, %v7591_v61, 0.0 }
0x1bc1   :  { %4857 = vadd.xlane.f32.xlu0 %v4856_v1 }
0x1bc3   :  { %v7593_v2 = vpop.eup %7592 }
0x1bc4   :  { %v4859_v3 = vsel %vm413_vm3, %v7593_v2, 0.0 }
0x1bc5   :  { %4860 = vadd.xlane.f32.xlu1 %v4859_v3 }
0x1c4a   :  { %v4858_v5 = vpop.xlane.xlu0 %4857 }
0x1c4b   :  { %7594 = vrcp.f32 %v4858_v5 }
0x1c4e   :  { %v4861_v6 = vpop.xlane.xlu1 %4860 }
0x1c4f   :  { %7596 = vrcp.f32 %v4861_v6 }
0x1c58   :  { %v7595_v7 = vpop.eup %7594 }
0x1c59   :  { %v4864_v8 = vmul.f32 %v7595_v7, %v7591_v61 }
0x1c5b   :  { %7388 = vmatmul.mubr.msk.f32.vlgmr.msra.gmra.mxu1 %vm413_vm3, %v4864_v8 }
0x1c5c   :  { %v7597_v9 = vpop.eup %7596  ;;  %7396 = vmatpush3.msra.mxu1 %v6522_v19 }
0x1c5d   :  { %v4865_v10 = vmul.f32 %v7597_v9, %v7593_v2  ;;  %7411 = vmatprep.subr.mxu1 %v6623_v20  ;;  %v6523_v9 = vld [vmem:[%s8666_s5 + $0x78] sm:$0xff] }
0x1c5f   :  { %7393 = vmatmul.mubr.msk.f32.vlgmr.msra.gmra.mxu0 %vm413_vm3, %v4865_v10 }
0x1c60   :  { %7401 = vmatpush3.msra.mxu0 %v6619_v4  ;;  %7408 = vmatprep.mubr.msk.f32.mxu0 %vm181_vm1, %v8186_v39 }
0x1c61   :  { %7402 = vmatprep.subr.mxu0 %v6618_v49 }
0x1c62   :  { %7403 = vmatpush3.msra.mxu0 %v6618_v49 }
0x1c63   :  { %7404 = vmatprep.subr.mxu0 %v6617_v48 }
0x1c64   :  { %7405 = vmatpush3.msra.mxu0 %v6617_v48 }
0x1c65   :  { %7406 = vmatprep.subr.mxu0 %v6616_v11 }
0x1c66   :  { %7407 = vmatpush3.msra.mxu0 %v6616_v11 }
0x1c67   :  { %7409 = vmatmul.mubr.msk.f32.vlgmr.msra.gmra.mxu0 %vm181_vm1, %v8188_v18  ;;  %7422 = vmatprep.subr.mxu0 %v6627_v12 }
0x1c68   :  { %7423 = vmatpush3.msra.mxu0 %v6627_v12  ;;  %7430 = vmatprep.mubr.msk.f32.mxu0 %vm181_vm1, %v8186_v39 }
0x1c69   :  { %7424 = vmatprep.subr.mxu0 %v6626_v13 }
0x1c6a   :  { %7425 = vmatpush3.msra.mxu0 %v6626_v13  ;;  %v6645_v13 = vld [vmem:[%s8668_s7 + $0x8] ss:$0 sm:$0xff] }
0x1c6b   :  { %7426 = vmatprep.subr.mxu0 %v6625_v14 }
0x1c6c   :  { %7427 = vmatpush3.msra.mxu0 %v6625_v14 }
0x1c6d   :  { %7428 = vmatprep.subr.mxu0 %v6624_v15 }
0x1c6e   :  { %7429 = vmatpush3.msra.mxu0 %v6624_v15 }
0x1c6f   :  { %7431 = vmatmul.mubr.msk.f32.vlgmr.msra.gmra.mxu0 %vm181_vm1, %v8188_v18  ;;  %7443 = vmatprep.subr.mxu0 %v7654_v21 }
0x1c70   :  { %7445 = vmatprep.mubr.msk.f32.mxu0 %vm7655_vm2, %v7654_v21 }
0x1d1b   :  { %v4935_v23 = vpop.f32.mrf.mxu1 }
0x1d1c   :  { %7397 = vmatprep.mubr.msk.f32.mxu1 %vm413_vm3, %v4935_v23 }
0x1d1d   :  { %v7389_v24 = vpop.f32.mrf.mxu1 }
0x1d1f   :  { %v5008_v25 = vpop.f32.mrf.mxu0 }
0x1d20   :  { %7398 = vmatmul.mubr.msk.f32.vlgmr.msra.gmra.mxu1 %vm413_vm3, %v5008_v25 }
0x1d21   :  { %7412 = vmatpush3.msra.mxu1 %v6623_v20  ;;  %v7394_v30 = vpop.f32.mrf.mxu0  ;;  %7419 = vmatprep.mubr.msk.f32.mxu1 %vm181_vm1, %v8186_v39 }
0x1d22   :  { %7413 = vmatprep.subr.mxu1 %v6622_v26 }
0x1d23   :  { %7414 = vmatpush3.msra.mxu1 %v6622_v26 }
0x1d24   :  { %7415 = vmatprep.subr.mxu1 %v6621_v31 }
0x1d25   :  { %7416 = vmatpush3.msra.mxu1 %v6621_v31 }
0x1d26   :  { %7417 = vmatprep.subr.mxu1 %v6620_v17 }
0x1d27   :  { %7418 = vmatpush3.msra.mxu1 %v6620_v17  ;;  %v7410_v16 = vpop.f32.mrf.mxu0 }
0x1d28   :  { %7420 = vmatmul.mubr.msk.f32.vlgmr.msra.gmra.mxu1 %vm181_vm1, %v8188_v18  ;;  %7433 = vmatprep.subr.mxu1 %v7654_v21  ;;  %v5190_v29 = vadd.f32 %v7410_v16, %v6629_v46 }
0x1d29   :  { %7435 = vmatprep.mubr.msk.f32.mxu1 %vm7655_vm2, %v7654_v21  ;;  %v5184_v34 = vpop.f32.mrf.mxu0 }
0x1d2a   :  { %v5185_v50 = vadd.f32 %v6629_v46, %v5184_v34 }
0x1d2f   :  { %v7432_v35 = vpop.f32.mrf.mxu0 }
0x1d31   :  { %v5334_v38 = vpop.f32.mrf.mxu0 }
0x1d32   :  { %7444 = vmatpush3.msra.mxu0 %v5334_v38 }
0x1d33   :  { %7453 = vmatprep.subr.mxu0 %v6523_v9 }
0x1de0   :  { %v7399_v27 = vpop.f32.mrf.mxu1 }
0x1de1   :  { %v8471_v41 = vadd.f32 %v7399_v27, %v4437_v22 }
0x1de2   :  { %v5084_v42 = vpop.f32.mrf.mxu1 }
0x1de3   :  { %v8473_v43 = vadd.f32 %v5084_v42, %v4432_v28  ;;  %v6651_v42 = vld [vmem:[%s8667_s6 + $0x28] sm:$0xff] }
0x1de8   :  { %v7421_v44 = vpop.f32.mrf.mxu1 }
0x1dea   :  { %v5259_v45 = vpop.f32.mrf.mxu1 }
0x1deb   :  { %7434 = vmatpush3.xpose.msk.msra.mxu1 %vm413_vm3, %v5259_v45 }
0x1dec   :  { %7438 = vmatprep.subr.mxu1 %v7654_v21 }
0x1dee   :  { %7436 = vmatmul.mubr.msk.f32.vlgmr.msra.gmra.mxu1 %vm413_vm3, %v5185_v50 }
0x1def   :  { %7439 = vmatpush3.xpose.msk.msra.mxu1 %vm413_vm3, %v7421_v44  ;;  %7440 = vmatprep.mubr.msk.f32.mxu1 %vm7655_vm2, %v7654_v21 }
0x1df0   :  { %7448 = vmatprep.subr.mxu1 %v7654_v21 }
0x1df2   :  { %7441 = vmatmul.mubr.msk.f32.vlgmr.msra.gmra.mxu1 %vm413_vm3, %v5190_v29 }
0x1df3   :  { %7449 = vmatpush3.msra.mxu1 %v7432_v35  ;;  %7450 = vmatprep.mubr.msk.f32.mxu1 %vm7655_vm2, %v7654_v21 }
0x1eae   :  { %v5415_v32 = vpop.f32.mrf.mxu1 }
0x1eaf   :  { %v5495_v36 = vmul.f32 0.35355338, %v5415_v32 }
0x1eb0   :  { %v7437_v37 = vpop.f32.mrf.mxu1 }
0x1eb1   :  { %v5497_v52 = vadd.f32 %v5495_v36, %v7801_v51  ;;  %v6648_v37 = vld [vmem:[%s8668_s7 + $0x9] ss:$0 sm:$0xff] }
0x1eb2   :  { %v5491_v53 = vpop.f32.mrf.mxu1 }
0x1eb3   :  { %v5496_v54 = vmul.f32 0.35355338, %v5491_v53  ;;  %v5499_v55 = vsel %vm413_vm3, %v5497_v52, -inf }
0x1eb4   :  { %5500 = vmax.xlane.f32.xlu0 %v5499_v55  ;;  %v7442_v56 = vpop.f32.mrf.mxu1 }
0x1eb5   :  { %v5498_v57 = vadd.f32 %v5496_v54, %v7799_v47  ;;  %v6649_v56 = vld [vmem:[%s8668_s7 + $0xa] ss:$0 sm:$0xff] }
0x1eb7   :  { %v5502_v58 = vsel %vm413_vm3, %v5498_v57, -inf }
0x1eb8   :  { %5503 = vmax.xlane.f32.xlu1 %v5502_v58 }
0x1f3d   :  { %v5501_v59 = vpop.xlane.xlu0 %5500 }
0x1f3e   :  { %v5505_v60 = vsub.f32 %v5497_v52, %v5501_v59 }
0x1f40   :  { %v5507_v62 = vmul.f32 1.442695, %v5505_v60  ;;  %v6531_v60 = vld [vmem:[%s8666_s5 + $0xb8] sm:$0xff] }
0x1f41   :  { %v5504_v63 = vpop.xlane.xlu1 %5503 }
0x1f42   :  { %7598 = vpow2.f32 %v5507_v62  ;;  %v5506_v0 = vsub.f32 %v5498_v57, %v5504_v63  ;;  %v6530_v62 = vld [vmem:[%s8666_s5 + $0xb0] sm:$0xff]  ;;  %v6529_v63 = vld [vmem:[%s8666_s5 + $0xa8] sm:$0xff] }
0x1f44   :  { %v5509_v61 = vmul.f32 1.442695, %v5506_v0  ;;  %v6528_v0 = vld [vmem:[%s8666_s5 + $0xa0] sm:$0xff] }
0x1f46   :  { %7600 = vpow2.f32 %v5509_v61  ;;  %v6527_v61 = vld [vmem:[%s8666_s5 + $0x98] sm:$0xff] }
0x1f4f   :  { %v7599_v51 = vpop.eup %7598 }
0x1f50   :  { %v5511_v1 = vsel %vm413_vm3, %v7599_v51, 0.0 }
0x1f51   :  { %5512 = vadd.xlane.f32.xlu0 %v5511_v1  ;;  %v6525_v1 = vld [vmem:[%s8666_s5 + $0x88] sm:$0xff] }
0x1f53   :  { %v7601_v2 = vpop.eup %7600 }
0x1f54   :  { %v5514_v3 = vsel %vm413_vm3, %v7601_v2, 0.0 }
0x1f55   :  { %5515 = vadd.xlane.f32.xlu1 %v5514_v3  ;;  %v6655_v3 = vld [vmem:[%s8668_s7 + $0xb] ss:$0 sm:$0xff] }
0x1fda   :  { %v5513_v47 = vpop.xlane.xlu0 %5512 }
0x1fdb   :  { %7602 = vrcp.f32 %v5513_v47 }
0x1fde   :  { %v5516_v4 = vpop.xlane.xlu1 %5515 }
0x1fdf   :  { %7604 = vrcp.f32 %v5516_v4 }
0x1fe8   :  { %v7603_v5 = vpop.eup %7602 }
0x1fe9   :  { %v5519_v6 = vmul.f32 %v7603_v5, %v7599_v51  ;;  %v6526_v51 = vld [vmem:[%s8666_s5 + $0x90] sm:$0xff] }
0x1feb   :  { %7446 = vmatmul.mubr.msk.f32.vlgmr.msra.gmra.mxu0 %vm413_vm3, %v5519_v6 }
0x1fec   :  { %v7605_v7 = vpop.eup %7604  ;;  %7454 = vmatpush3.msra.mxu0 %v6523_v9 }
0x1fed   :  { %v5520_v8 = vmul.f32 %v7605_v7, %v7601_v2  ;;  %7469 = vmatprep.subr.mxu0 %v6531_v60  ;;  %v6524_v2 = vld [vmem:[%s8666_s5 + $0x80] sm:$0xff] }
0x1fef   :  { %7451 = vmatmul.mubr.msk.f32.vlgmr.msra.gmra.mxu1 %vm413_vm3, %v5520_v8 }
0x20ab   :  { %v5590_v10 = vpop.f32.mrf.mxu0 }
0x20ac   :  { %7455 = vmatprep.mubr.msk.f32.mxu0 %vm413_vm3, %v5590_v10 }
0x20ad   :  { %v7447_v49 = vpop.f32.mrf.mxu0 }
0x20af   :  { %v5663_v48 = vpop.f32.mrf.mxu1 }
0x20b0   :  { %7456 = vmatmul.mubr.msk.f32.vlgmr.msra.gmra.mxu0 %vm413_vm3, %v5663_v48 }
0x20b1   :  { %v7452_v11 = vpop.f32.mrf.mxu1  ;;  %7470 = vmatpush3.msra.mxu0 %v6531_v60 }
0x20b2   :  { %7471 = vmatprep.subr.mxu0 %v6530_v62 }
0x20b3   :  { %7472 = vmatpush3.msra.mxu0 %v6530_v62 }
0x20b4   :  { %7473 = vmatprep.subr.mxu0 %v6529_v63 }
0x20b5   :  { %7474 = vmatpush3.msra.mxu0 %v6529_v63 }
0x20b6   :  { %7475 = vmatprep.subr.mxu0 %v6528_v0 }
0x20b7   :  { %7476 = vmatpush3.msra.mxu0 %v6528_v0 }
0x20b8   :  { %7477 = vmatprep.subr.mxu0 %v6527_v61 }
0x20b9   :  { %7478 = vmatpush3.msra.mxu0 %v6527_v61  ;;  %v6661_v61 = vld [vmem:[%s8668_s7 + $0xc] ss:$0 sm:$0xff] }
0x20ba   :  { %7479 = vmatprep.subr.mxu0 %v6526_v51 }
0x20bb   :  { %7480 = vmatpush3.msra.mxu0 %v6526_v51 }
0x20bc   :  { %7481 = vmatprep.subr.mxu0 %v6525_v1 }
0x20bd   :  { %7482 = vmatpush3.msra.mxu0 %v6525_v1 }
0x20be   :  { %7483 = vmatprep.subr.mxu0 %v6524_v2 }
0x20bf   :  { %7484 = vmatpush3.msra.mxu0 %v6524_v2 }
0x20c0   :  { %7510 = vmatprep.subr.mxu0 %v7654_v21 }
0x2170   :  { %v7457_v12 = vpop.f32.mrf.mxu0 }
0x2171   :  { %v5749_v14 = vadd.f32 %v7457_v12, %v8471_v41  ;;  %v6652_v41 = vld [vmem:[%s8667_s6 + $0x30] sm:$0xff] }
0x2172   :  { %v5739_v15 = vpop.f32.mrf.mxu0 }
0x2173   :  { %v5757_v19 = vadd.f32 %v6645_v13, %v5749_v14  ;;  %v5748_v20 = vadd.f32 %v5739_v15, %v8473_v43  ;;  %v6650_v43 = vld [vmem:[%s8667_s6 + $0x20] sm:$0xff] }
0x2175   :  { %v5756_v23 = vadd.f32 %v6645_v13, %v5748_v20  ;;  %v5759_v24 = vadd.f32 %v5757_v19, %v8188_v18 }
0x2177   :  { %v5765_v25 = vsel %vm181_vm1, %v5759_v24, 0.0  ;;  %v5758_v26 = vadd.f32 %v5756_v23, %v8186_v39  ;;  %v6653_v39 = vld [vmem:[%s8667_s6 + $0x38] sm:$0xff] }
0x2178   :  { %5766 = vadd.xlane.f32.xlu1 %v5765_v25  ;;  %7458 = vmatprep.subr.mxu1 %v6653_v39 }
0x2179   :  { %v5762_v30 = vsel %vm181_vm1, %v5758_v26, 0.0  ;;  %7459 = vmatpush3.msra.mxu1 %v6653_v39 }
0x217a   :  { %5763 = vadd.xlane.f32.xlu0 %v5762_v30  ;;  %7460 = vmatprep.subr.mxu1 %v6652_v41 }
0x217b   :  { %7461 = vmatpush3.msra.mxu1 %v6652_v41 }
0x217c   :  { %7462 = vmatprep.subr.mxu1 %v6651_v42 }
0x217d   :  { %7463 = vmatpush3.msra.mxu1 %v6651_v42 }
0x217e   :  { %7464 = vmatprep.subr.mxu1 %v6650_v43 }
0x217f   :  { %7465 = vmatpush3.msra.mxu1 %v6650_v43 }
0x2180   :  { %7488 = vmatprep.subr.mxu1 %v7654_v21 }
0x2201   :  { %v5767_v31 = vpop.xlane.xlu1 %5766 }
0x2202   :  { %v5769_v17 = vmul.f32 0.03125, %v5767_v31 }
0x2203   :  { %v5764_v16 = vpop.xlane.xlu0 %5763 }
0x2204   :  { %v5771_v34 = vsub.f32 %v5759_v24, %v5769_v17  ;;  %v5768_v35 = vmul.f32 0.03125, %v5764_v16 }
0x2206   :  { %v5770_v38 = vsub.f32 %v5758_v26, %v5768_v35  ;;  %v5773_v22 = vmul.f32 %v5771_v34, %v5771_v34 }
0x2208   :  { %v5777_v27 = vsel %vm181_vm1, %v5773_v22, 0.0  ;;  %v5772_v28 = vmul.f32 %v5770_v38, %v5770_v38 }
0x2209   :  { %5778 = vadd.xlane.f32.xlu1 %v5777_v27 }
0x220a   :  { %v5774_v18 = vsel %vm181_vm1, %v5772_v28, 0.0 }
0x220b   :  { %5775 = vadd.xlane.f32.xlu0 %v5774_v18 }
0x2292   :  { %v5779_v44 = vpop.xlane.xlu1 %5778 }
0x2293   :  { %v5781_v45 = vmul.f32 0.03125, %v5779_v44 }
0x2294   :  { %v5776_v46 = vpop.xlane.xlu0 %5775 }
0x2295   :  { %v5783_v50 = vadd.f32 1e-12, %v5781_v45  ;;  %v5780_v29 = vmul.f32 0.03125, %v5776_v46 }
0x2297   :  { %7606 = vrsqrt.f32 %v5783_v50  ;;  %v5782_v32 = vadd.f32 1e-12, %v5780_v29 }
0x2299   :  { %7608 = vrsqrt.f32 %v5782_v32 }
0x22a4   :  { %v7607_v36 = vpop.eup %7606 }
0x22a5   :  { %v5787_v52 = vmul.f32 %v7607_v36, %v5771_v34 }
0x22a6   :  { %v7609_v53 = vpop.eup %7608 }
0x22a7   :  { %v5786_v54 = vmul.f32 %v7609_v53, %v5770_v38  ;;  %v5793_v55 = vmul.f32 %v6648_v37, %v5787_v52 }
0x22a9   :  { %v5792_v57 = vmul.f32 %v6648_v37, %v5786_v54  ;;  %v8533_v59 = vadd.f32 %v6649_v56, %v5793_v55 }
0x22ab   :  { %v8531_v58 = vadd.f32 %v6649_v56, %v5792_v57 }
0x22ad   :  { %7466 = vmatprep.mubr.msk.f32.mxu1 %vm181_vm1, %v8531_v58 }
0x22ae   :  { %7467 = vmatmul.mubr.msk.f32.vlgmr.msra.gmra.mxu1 %vm181_vm1, %v8533_v59 }
0x22af   :  { %7496 = vmatprep.mubr.msk.f32.mxu1 %vm7655_vm2, %v7654_v21 }
0x236e   :  { %v7468_v47 = vpop.f32.mrf.mxu1 }
0x236f   :  { %v5888_v4 = vadd.f32 %v7468_v47, %v6655_v3 }
0x2370   :  { %v5882_v5 = vpop.f32.mrf.mxu1 }
0x2371   :  { %v5894_v6 = vmul.f32 0.70710677, %v5888_v4  ;;  %v5883_v7 = vadd.f32 %v6655_v3, %v5882_v5  ;;  %v5892_v62 = vmul.f32 0.5, %v5888_v4 }
0x2373   :  { %v5900_v8 = vand.u32 2147483647, %v5894_v6  ;;  %v5893_v9 = vmul.f32 0.70710677, %v5883_v7  ;;  %vm5896_vm7 = vcmp.ge.f32.partialorder %v5894_v6, 0.0  ;;  %v5891_v57 = vmul.f32 0.5, %v5883_v7 }
0x2374   :  { %v5898_v36 = vsel %vm5896_vm7, 1.0, %v7657_v40 }
0x2375   :  { %v5902_v10 = vmul.f32 0.3275911, %v5900_v8  ;;  %v5899_v49 = vand.u32 2147483647, %v5893_v9  ;;  %v5926_v13 = vsub.f32 0.0, %v5900_v8  ;;  %vm5895_vm8 = vcmp.ge.f32.partialorder %v5893_v9, 0.0 }
0x2376   :  { %v5897_v54 = vsel %vm5895_vm8, 1.0, %v7657_v40 }
0x2377   :  { %v5904_v48 = vadd.f32 1.0, %v5902_v10  ;;  %v5901_v11 = vmul.f32 0.3275911, %v5899_v49  ;;  %v5925_v14 = vsub.f32 0.0, %v5899_v49  ;;  %v5928_v15 = vmul.f32 %v5926_v13, %v5900_v8 }
0x2379   :  { %7610 = vrcp.f32 %v5904_v48  ;;  %v5903_v12 = vadd.f32 1.0, %v5901_v11  ;;  %v5927_v20 = vmul.f32 %v5925_v14, %v5899_v49  ;;  %v5931_v24 = vmul.f32 1.442695, %v5928_v15  ;;  %v6075_v14 = vld [vmem:[%s8663_s2 + $0x28] sm:$0xff]  ;;  %v6074_v15 = vld [vmem:[%s8663_s2 + $0x20] sm:$0xff] }
0x237b   :  { %7612 = vrcp.f32 %v5903_v12  ;;  %v5929_v31 = vmul.f32 1.442695, %v5927_v20 }
0x237c   :  { %7614 = vpow2.f32 %v5931_v24 }
0x237d   :  { %7616 = vpow2.f32 %v5929_v31 }
0x2386   :  { %v7611_v19 = vpop.eup %7610 }
0x2387   :  { %v5908_v23 = vmul.f32 1.0614054, %v7611_v19 }
0x2388   :  { %v7613_v25 = vpop.eup %7612 }
0x2389   :  { %v5910_v26 = vadd.f32 -1.4531521, %v5908_v23  ;;  %v5907_v30 = vmul.f32 1.0614054, %v7613_v25  ;;  %v7615_v44 = vpop.eup %7614 }
0x238a   :  { %v7617_v29 = vpop.eup %7616 }
0x238b   :  { %v5912_v17 = vmul.f32 %v7611_v19, %v5910_v26  ;;  %v5909_v16 = vadd.f32 -1.4531521, %v5907_v30 }
0x238d   :  { %v5914_v34 = vadd.f32 1.4214138, %v5912_v17  ;;  %v5911_v35 = vmul.f32 %v7613_v25, %v5909_v16  ;;  %v6664_v17 = vld [vmem:[%s8668_s7 + $0xd] ss:$0 sm:$0xff] }
0x238f   :  { %v5916_v38 = vmul.f32 %v7611_v19, %v5914_v34  ;;  %v5913_v22 = vadd.f32 1.4214138, %v5911_v35  ;;  %v6665_v35 = vld [vmem:[%s8668_s7 + $0xe] ss:$0 sm:$0xff] }
0x2391   :  { %v5918_v27 = vadd.f32 -0.28449672, %v5916_v38  ;;  %v5915_v28 = vmul.f32 %v7613_v25, %v5913_v22 }
0x2393   :  { %v5920_v18 = vmul.f32 %v7611_v19, %v5918_v27  ;;  %v5917_v39 = vadd.f32 -0.28449672, %v5915_v28 }
0x2395   :  { %v5922_v41 = vadd.f32 0.2548296, %v5920_v18  ;;  %v5919_v42 = vmul.f32 %v7613_v25, %v5917_v39 }
0x2397   :  { %v5924_v43 = vmul.f32 %v7611_v19, %v5922_v41  ;;  %v5921_v45 = vadd.f32 0.2548296, %v5919_v42  ;;  %v6073_v19 = vld [vmem:[%s8663_s2 + $0x18] sm:$0xff]  ;;  %v6080_v42 = vld [vmem:[%s8663_s2 + $0x50] sm:$0xff] }
0x2399   :  { %v5934_v46 = vmul.f32 %v7615_v44, %v5924_v43  ;;  %v5923_v50 = vmul.f32 %v7613_v25, %v5921_v45  ;;  %v6079_v43 = vld [vmem:[%s8663_s2 + $0x48] sm:$0xff]  ;;  %v6078_v44 = vld [vmem:[%s8663_s2 + $0x40] sm:$0xff]  ;;  %v6077_v45 = vld [vmem:[%s8663_s2 + $0x38] sm:$0xff] }
0x239b   :  { %v5936_v32 = vsub.f32 1.0, %v5934_v46  ;;  %v5933_v37 = vmul.f32 %v7617_v29, %v5923_v50  ;;  %v6666_v46 = vld [vmem:[%s8669_s8] ss:$0 sm:$0xff] }
0x239d   :  { %v5938_v52 = vmul.f32 %v5936_v32, %v5898_v36  ;;  %v5935_v53 = vsub.f32 1.0, %v5933_v37  ;;  %v6668_v37 = vld [vmem:[%s8669_s8 + $0x1] ss:$0 sm:$0xff] }
0x239f   :  { %v5937_v55 = vmul.f32 %v5935_v53, %v5897_v54  ;;  %v5940_v56 = vadd.f32 1.0, %v5938_v52 }
0x23a1   :  { %v5939_v60 = vadd.f32 1.0, %v5937_v55  ;;  %v5942_v0 = vmul.f32 %v5940_v56, %v5892_v62 }
0x23a3   :  { %v5941_v63 = vmul.f32 %v5939_v60, %v5891_v57 }
0x23a5   :  { %7485 = vmatprep.mubr.msk.f32.mxu0 %vm2984_vm6, %v5941_v63 }
0x23a6   :  { %7486 = vmatmul.mubr.msk.f32.vlgmr.msra.gmra.mxu0 %vm2984_vm6, %v5942_v0 }
0x23a7   :  { %7518 = vmatprep.mubr.msk.f32.mxu0 %vm7655_vm2, %v7654_v21 }
0x2466   :  { %v7487_v51 = vpop.f32.mrf.mxu0 }
0x2467   :  { %v6030_v1 = vadd.f32 %v7487_v51, %v6661_v61 }
0x2468   :  { %v6015_v2 = vpop.f32.mrf.mxu0 }
0x2469   :  { %v6029_v3 = vadd.f32 %v6661_v61, %v6015_v2  ;;  %v6032_v47 = vadd.f32 %v6030_v1, %v8533_v59 }
0x246b   :  { %v6038_v4 = vsel %vm181_vm1, %v6032_v47, 0.0  ;;  %v6031_v5 = vadd.f32 %v6029_v3, %v8531_v58  ;;  %v6076_v58 = vld [vmem:[%s8663_s2 + $0x30] sm:$0xff] }
0x246c   :  { %6039 = vadd.xlane.f32.xlu0 %v6038_v4  ;;  %7489 = vmatpush3.msra.mxu1 %v6076_v58 }
0x246d   :  { %v6035_v6 = vsel %vm181_vm1, %v6031_v5, 0.0  ;;  %7490 = vmatprep.subr.mxu1 %v7654_v21 }
0x246e   :  { %6036 = vadd.xlane.f32.xlu1 %v6035_v6  ;;  %7491 = vmatpush3.msra.mxu1 %v6075_v14 }
0x246f   :  { %7492 = vmatprep.subr.mxu1 %v7654_v21 }
0x2470   :  { %7493 = vmatpush3.msra.mxu1 %v6074_v15 }
0x2471   :  { %7494 = vmatprep.subr.mxu1 %v7654_v21 }
0x2472   :  { %7495 = vmatpush3.msra.mxu1 %v6073_v19 }
0x2473   :  { %7499 = vmatprep.subr.mxu1 %v7654_v21 }
0x24f5   :  { %v6040_v7 = vpop.xlane.xlu0 %6039 }
0x24f6   :  { %v6042_v8 = vmul.f32 0.03125, %v6040_v7 }
0x24f7   :  { %v6037_v9 = vpop.xlane.xlu1 %6036 }
0x24f8   :  { %v6044_v10 = vsub.f32 %v6032_v47, %v6042_v8  ;;  %v6041_v49 = vmul.f32 0.03125, %v6037_v9 }
0x24fa   :  { %v6043_v48 = vsub.f32 %v6031_v5, %v6041_v49  ;;  %v6046_v11 = vmul.f32 %v6044_v10, %v6044_v10 }
0x24fc   :  { %v6050_v12 = vsel %vm181_vm1, %v6046_v11, 0.0  ;;  %v6045_v13 = vmul.f32 %v6043_v48, %v6043_v48 }
0x24fd   :  { %6051 = vadd.xlane.f32.xlu0 %v6050_v12 }
0x24fe   :  { %v6047_v59 = vsel %vm181_vm1, %v6045_v13, 0.0 }
0x24ff   :  { %6048 = vadd.xlane.f32.xlu1 %v6047_v59 }
0x2586   :  { %v6052_v20 = vpop.xlane.xlu0 %6051 }
0x2587   :  { %v6054_v23 = vmul.f32 0.03125, %v6052_v20 }
0x2588   :  { %v6049_v24 = vpop.xlane.xlu1 %6048 }
0x2589   :  { %v6056_v25 = vadd.f32 1e-12, %v6054_v23  ;;  %v6053_v26 = vmul.f32 0.03125, %v6049_v24  ;;  %v6084_v23 = vld [vmem:[%s8663_s2 + $0x70] sm:$0xff]  ;;  %v6082_v24 = vld [vmem:[%s8663_s2 + $0x60] sm:$0xff] }
0x258a   :  { %7511 = vmatpush3.msra.mxu0 %v6084_v23 }
0x258b   :  { %7618 = vrsqrt.f32 %v6056_v25  ;;  %v6055_v30 = vadd.f32 1e-12, %v6053_v26  ;;  %7512 = vmatprep.subr.mxu0 %v7654_v21  ;;  %v6081_v25 = vld [vmem:[%s8663_s2 + $0x58] sm:$0xff] }
0x258d   :  { %7620 = vrsqrt.f32 %v6055_v30 }
0x2598   :  { %v7619_v31 = vpop.eup %7618 }
0x2599   :  { %v6060_v16 = vmul.f32 %v7619_v31, %v6044_v10 }
0x259a   :  { %v7621_v34 = vpop.eup %7620 }
0x259b   :  { %v6059_v38 = vmul.f32 %v7621_v34, %v6043_v48  ;;  %v6066_v22 = vmul.f32 %v6664_v17, %v6060_v16  ;;  %v6670_v16 = vld [vmem:[%s8669_s8 + $0x2] ss:$0 sm:$0xff] }
0x259d   :  { %v6065_v27 = vmul.f32 %v6664_v17, %v6059_v38  ;;  %v6072_v28 = vadd.f32 %v6665_v35, %v6066_v22 }
0x259f   :  { %v6071_v18 = vadd.f32 %v6665_v35, %v6065_v27  ;;  %v6092_v39 = vrot.slane %v6072_v28, 7  ;;  %v6671_v35 = vld [vmem:[%s8669_s8 + $0x3] ss:$0 sm:$0xff] }
0x25a1   :  { %v6094_v41 = vsel %vm6093_vm9, %v6092_v39, %v6071_v18 }
0x25a2   :  { %7497 = vmatmul.mubr.msk.f32.vlgmr.msra.gmra.mxu1 %vm181_vm1, %v6094_v41  ;;  %v6377_v41 = vand.u32 127, %v129_v33 }
0x25a3   :  { %7507 = vmatprep.mubr.msk.f32.mxu1 %vm7655_vm2, %v7654_v21  ;;  %7500 = vmatpush3.msra.mxu1 %v6080_v42 }
0x25a4   :  { %7501 = vmatprep.subr.mxu1 %v7654_v21  ;;  %vm6382_vm12 = vcmp.ge.s32.totalorder %v6377_v41, 1 }
0x25a5   :  { %7502 = vmatpush3.msra.mxu1 %v6079_v43 }
0x25a6   :  { %7503 = vmatprep.subr.mxu1 %v7654_v21 }
0x25a7   :  { %7504 = vmatpush3.msra.mxu1 %v6078_v44 }
0x25a8   :  { %7505 = vmatprep.subr.mxu1 %v7654_v21 }
0x25a9   :  { %7506 = vmatpush3.msra.mxu1 %v6077_v45 }
0x2662   :  { %v6163_v50 = vpop.f32.mrf.mxu1 }
0x2663   :  { %v6164_v29 = vadd.f32 %v6666_v46, %v6163_v50 }
0x2664   :  { %v7498_v32 = vpop.f32.mrf.mxu1 }
0x2665   :  { %7622 = vtanh.f32 %v6164_v29 }
0x2672   :  { %v7623_v36 = vpop.eup %7622 }
0x2673   :  { %7508 = vmatmul.mubr.msk.f32.vlgmr.msra.gmra.mxu1 %vm181_vm1, %v7623_v36 }
0x2733   :  { %v6242_v52 = vpop.f32.mrf.mxu1 }
0x2734   :  { %v6243_v53 = vadd.f32 %v6668_v37, %v6242_v52 }
0x2735   :  { %v7509_v54 = vpop.f32.mrf.mxu1 }
0x2736   :  { %v6247_v55 = vmul.f32 0.70710677, %v6243_v53  ;;  %v6246_v11 = vmul.f32 0.5, %v6243_v53 }
0x2738   :  { %v6250_v56 = vand.u32 2147483647, %v6247_v55  ;;  %vm6248_vm10 = vcmp.ge.f32.partialorder %v6247_v55, 0.0 }
0x2739   :  { %v6249_v49 = vsel %vm6248_vm10, 1.0, %v7657_v40  ;;  %v6083_v40 = vld [vmem:[%s8663_s2 + $0x68] sm:$0xff] }
0x273a   :  { %v6251_v57 = vmul.f32 0.3275911, %v6250_v56  ;;  %v6263_v62 = vsub.f32 0.0, %v6250_v56  ;;  %7513 = vmatpush3.msra.mxu0 %v6083_v40 }
0x273b   :  { %7514 = vmatprep.subr.mxu0 %v7654_v21 }
0x273c   :  { %v6252_v60 = vadd.f32 1.0, %v6251_v57  ;;  %v6264_v63 = vmul.f32 %v6263_v62, %v6250_v56  ;;  %7515 = vmatpush3.msra.mxu0 %v6082_v24 }
0x273d   :  { %7516 = vmatprep.subr.mxu0 %v7654_v21  ;;  %v6672_v21 = vld [vmem:[%s8669_s8 + $0x4] ss:$0 sm:$0xff] }
0x273e   :  { %7624 = vrcp.f32 %v6252_v60  ;;  %v6265_v61 = vmul.f32 1.442695, %v6264_v63  ;;  %7517 = vmatpush3.msra.mxu0 %v6081_v25 }
0x2740   :  { %7626 = vpow2.f32 %v6265_v61 }
0x274b   :  { %v7625_v0 = vpop.eup %7624 }
0x274c   :  { %v6254_v51 = vmul.f32 1.0614054, %v7625_v0 }
0x274d   :  { %v7627_v8 = vpop.eup %7626 }
0x274e   :  { %v6255_v1 = vadd.f32 -1.4531521, %v6254_v51 }
0x2750   :  { %v6256_v2 = vmul.f32 %v7625_v0, %v6255_v1 }
0x2752   :  { %v6257_v3 = vadd.f32 1.4214138, %v6256_v2 }
0x2754   :  { %v6258_v47 = vmul.f32 %v7625_v0, %v6257_v3 }
0x2756   :  { %v6259_v4 = vadd.f32 -0.28449672, %v6258_v47 }
0x2758   :  { %v6260_v5 = vmul.f32 %v7625_v0, %v6259_v4 }
0x275a   :  { %v6261_v6 = vadd.f32 0.2548296, %v6260_v5 }
0x275c   :  { %v6262_v7 = vmul.f32 %v7625_v0, %v6261_v6 }
0x275e   :  { %v6267_v9 = vmul.f32 %v7627_v8, %v6262_v7 }
0x2760   :  { %v6268_v10 = vsub.f32 1.0, %v6267_v9 }
0x2762   :  { %v6269_v48 = vmul.f32 %v6268_v10, %v6249_v49 }
0x2764   :  { %v6270_v12 = vadd.f32 1.0, %v6269_v48 }
0x2766   :  { %v6271_v13 = vmul.f32 %v6270_v12, %v6246_v11 }
0x2768   :  { %v6275_v59 = vsel %vm6274_vm11, %v6271_v13, 0.0 }
0x2769   :  { %6276 = vadd.xlane.f32.xlu0 %v6275_v59 }
0x27f2   :  { %v6277_v58 = vpop.xlane.xlu0 %6276 }
0x27f3   :  { %v6278_v14 = vmul.f32 0.03125, %v6277_v58 }
0x27f5   :  { %v6279_v15 = vsub.f32 %v6271_v13, %v6278_v14 }
0x27f7   :  { %v6280_v19 = vmul.f32 %v6279_v15, %v6279_v15 }
0x27f9   :  { %v6281_v20 = vsel %vm6274_vm11, %v6280_v19, 0.0 }
0x27fa   :  { %6282 = vadd.xlane.f32.xlu1 %v6281_v20 }
0x2883   :  { %v6283_v26 = vpop.xlane.xlu1 %6282 }
0x2884   :  { %v6284_v30 = vmul.f32 0.03125, %v6283_v26 }
0x2886   :  { %v6285_v31 = vadd.f32 1e-12, %v6284_v30 }
0x2888   :  { %7628 = vrsqrt.f32 %v6285_v31 }
0x2895   :  { %v7629_v17 = vpop.eup %7628 }
0x2896   :  { %v6287_v34 = vmul.f32 %v7629_v17, %v6279_v15 }
0x2898   :  { %v6292_v38 = vmul.f32 %v6670_v16, %v6287_v34 }
0x289a   :  { %v6297_v22 = vadd.f32 %v6671_v35, %v6292_v38 }
0x289c   :  { %7519 = vmatmul.mubr.msk.f32.vlgmr.msra.gmra.mxu0 %vm181_vm1, %v6297_v22 }
0x295c   :  { %v6372_v27 = vpop.f32.mrf.mxu0 }
0x295d   :  { %v6373_v28 = vadd.f32 %v6672_v21, %v6372_v27 }
0x295e   :  { %v7520_v18 = vpop.f32.mrf.mxu0 }
0x295f   :  { %v6378_v39 = vmul.f32 0.5, %v6373_v28 }
0x2961   :  { %7630 = vtanh.f32 %v6378_v39 }
0x296e   :  { %v7631_v42 = vpop.eup %7630 }
0x296f   :  { %v6380_v43 = vadd.f32 1.0, %v7631_v42 }
0x2971   :  { %v6381_v44 = vmul.f32 0.5, %v6380_v43 }
0x2973   :  { %v6383_v45 = vsel %vm6382_vm12, %v6381_v44, %v6373_v28 }
0x2974   :  { %6385 = vst.msk [vmem:[#allocation2] sm:$0x3] %vm6384_vm13, %v6383_v45 }
0x2975   :  { %7643 = shalt.err (!%p7640_p4)
}
0x2976   :  { %6395 = dma.vmem_to_hbm [thread:$0]  %s6393_s22, 32, %s8670_s9, [#allocation3]  }
0x2977   :  { %7652 = dma.done.wait [#allocation3], 32  }
0x2978   :  { %7653 = vsyncadd [#allocation3], 4294967264 }
0x2979   :  { %6399 = vsyncpa [#allocation3], 1 }

</bundles_post_ra>
